<compile_context>
chip_gen: v7x
topology: tpu7x:2x2x1
jax: 0.10.0
libtpu: 0.0.40
codegen_flags: <defaults>
</compile_context>

<pallas_src>
import functools
import math

import jax
import jax.numpy as jnp
from jax import lax
from jax.experimental import pallas as pl
from jax.experimental.pallas import tpu as pltpu


# ---------------------------------------------------------------------------
# Pass 1: 1x1-conv projections.  Reads x once; writes q^T (pre-scaled), k, v^T (bf16).
# ---------------------------------------------------------------------------
def _proj_kernel(x_ref, wq_ref, bq_ref, wk_ref, bk_ref, wv_ref, bv_ref,
                 qT_ref, k_ref, vT_ref, *, scale):
    x = x_ref[0]                                                           # (C, T) f32
    # k = wk @ x + bk -> (Cq_pad, T)
    k = jnp.dot(wk_ref[...], x, preferred_element_type=jnp.float32) + bk_ref[...]
    # q^T = x^T @ wq^T + bq -> (T, Cq_pad), with 1/sqrt(Cq) folded in.
    qT = lax.dot_general(x, wq_ref[...], (((0,), (1,)), ((), ())),
                         preferred_element_type=jnp.float32) + bq_ref[...]
    # v^T = x^T @ wv^T + bv -> (T, C)
    vT = lax.dot_general(x, wv_ref[...], (((0,), (1,)), ((), ())),
                         preferred_element_type=jnp.float32) + bv_ref[...]
    qT_ref[0] = (qT * scale).astype(qT_ref.dtype)
    k_ref[0] = k.astype(k_ref.dtype)
    vT_ref[0] = vT.astype(vT_ref.dtype)


# ---------------------------------------------------------------------------
# Pass 2: flash-style attention (online softmax) + residual add.
# ---------------------------------------------------------------------------
def _flash_kernel(x_ref, qT_ref, k_ref, vT_ref, gamma_ref, o_ref,
                  m_ref, l_ref, acc_ref):
    ki = pl.program_id(2)
    nk = pl.num_programs(2)

    @pl.when(ki == 0)
    def _():
        m_ref[...] = jnp.full(m_ref.shape, -jnp.inf, dtype=m_ref.dtype)
        l_ref[...] = jnp.zeros(l_ref.shape, dtype=l_ref.dtype)
        acc_ref[...] = jnp.zeros(acc_ref.shape, dtype=acc_ref.dtype)

    # QK^T: bf16 x bf16 -> f32 accumulate on the MXU (q already scaled by 1/sqrt(Cq)).
    s = jnp.dot(qT_ref[0], k_ref[0], preferred_element_type=jnp.float32)   # (Tq, Tk)

    # Online-softmax update (f32 math; portable to v5e).
    m_prev = m_ref[...]
    m_new = jnp.maximum(m_prev, jnp.max(s, axis=-1, keepdims=True))        # (Tq, 1)
    alpha = jnp.exp(m_prev - m_new)
    p = jnp.exp(s - m_new)                                                 # (Tq, Tk)
    l_ref[...] = alpha * l_ref[...] + jnp.sum(p, axis=-1, keepdims=True)
    v = vT_ref[0]                                                          # (Tk, C) bf16
    acc_ref[...] = alpha * acc_ref[...] + jnp.dot(
        p.astype(v.dtype), v, preferred_element_type=jnp.float32)          # (Tq, C)
    m_ref[...] = m_new

    # Finalize: normalize by 1/l (EUP), residual add, lane-dense (C, Tq) store.
    @pl.when(ki == nk - 1)
    def _():
        inv_l = pl.reciprocal(l_ref[...], approx=True)                     # (Tq, 1)
        out_nc = acc_ref[...] * inv_l                                      # (Tq, C)
        o_ref[0] = x_ref[0] + gamma_ref[0] * out_nc.T                      # (C, Tq)


def _pick_tile(n, cap):
    """Whole axis if n <= cap; else the largest multiple of 128 that divides n."""
    if n <= cap:
        return n
    best = None
    t = 128
    while t <= cap:
        if n % t == 0:
            best = t
        t += 128
    if best is None:
        best = n  # TODO(synk): pad/mask ragged spatial sizes instead of a single huge tile.
    return best


@functools.partial(jax.jit, static_argnames=("tq", "tk", "proj_dtype"))
def self_attention(x, wq, bq, wk, bk, wv, bv, gamma, *,
                   tq=None, tk=None, proj_dtype=jnp.bfloat16):
    """x: (B, C, H, W) float32. Returns (B, C, H, W)."""
    B, C, H, W = x.shape
    N = H * W
    Cq = wq.shape[0]
    scale = 1.0 / math.sqrt(Cq)                     # true Cq (pre-padding), as in PyTorch

    # Pad the q/k head dim to a sublane-friendly multiple; zero rows / zero bias
    # contribute exactly 0 to every q.k dot product.
    Cq_pad = ((Cq + 15) // 16) * 16
    pad = Cq_pad - Cq
    wq_p = jnp.pad(wq.astype(jnp.float32), ((0, pad), (0, 0)))
    wk_p = jnp.pad(wk.astype(jnp.float32), ((0, pad), (0, 0)))
    bq_row = jnp.pad(bq.astype(jnp.float32), (0, pad)).reshape(1, Cq_pad)
    bk_col = jnp.pad(bk.astype(jnp.float32), (0, pad)).reshape(Cq_pad, 1)
    bv_row = bv.reshape(1, C).astype(jnp.float32)
    gamma1 = gamma.reshape(1).astype(jnp.float32)
    x_flat = x.reshape(B, C, N)

    # Tile sizes: whole kv range in one step for realistic N; >=256 shapes for v6e/v7x MXU.
    tq = tq if tq is not None else _pick_tile(N, 512)
    tk = tk if tk is not None else _pick_tile(N, 2048)
    tp = _pick_tile(N, 512)
    assert N % tq == 0 and N % tk == 0 and N % tp == 0, \
        "H*W must be a multiple of the chosen tile size"

    # ---------------- Pass 1: projections ----------------
    qT, k, vT = pl.pallas_call(
        functools.partial(_proj_kernel, scale=scale),
        out_shape=(
            jax.ShapeDtypeStruct((B, N, Cq_pad), proj_dtype),   # q^T (pre-scaled)
            jax.ShapeDtypeStruct((B, Cq_pad, N), proj_dtype),   # k
            jax.ShapeDtypeStruct((B, N, C), proj_dtype),        # v^T
        ),
        grid_spec=pltpu.PrefetchScalarGridSpec(
            num_scalar_prefetch=0,
            grid=(B, N // tp),
            in_specs=[
                pl.BlockSpec((1, C, tp), lambda b, t: (b, 0, t)),      # x tile
                pl.BlockSpec((Cq_pad, C), lambda b, t: (0, 0)),        # wq (padded)
                pl.BlockSpec((1, Cq_pad), lambda b, t: (0, 0)),        # bq row
                pl.BlockSpec((Cq_pad, C), lambda b, t: (0, 0)),        # wk (padded)
                pl.BlockSpec((Cq_pad, 1), lambda b, t: (0, 0)),        # bk col
                pl.BlockSpec((C, C), lambda b, t: (0, 0)),             # wv
                pl.BlockSpec((1, C), lambda b, t: (0, 0)),             # bv row
            ],
            out_specs=[
                pl.BlockSpec((1, tp, Cq_pad), lambda b, t: (b, t, 0)),
                pl.BlockSpec((1, Cq_pad, tp), lambda b, t: (b, 0, t)),
                pl.BlockSpec((1, tp, C), lambda b, t: (b, t, 0)),
            ],
        ),
        compiler_params=pltpu.CompilerParams(
            dimension_semantics=("parallel", "parallel"),
            vmem_limit_bytes=32 * 1024 * 1024,
        ),
    )(x_flat, wq_p, bq_row, wk_p, bk_col, wv.astype(jnp.float32), bv_row)

    # ---------------- Pass 2: flash attention + residual ----------------
    n_q, n_k = N // tq, N // tk
    out_flat = pl.pallas_call(
        _flash_kernel,
        out_shape=jax.ShapeDtypeStruct((B, C, N), x.dtype),
        grid_spec=pltpu.PrefetchScalarGridSpec(
            num_scalar_prefetch=0,
            grid=(B, n_q, n_k),
            in_specs=[
                pl.BlockSpec((1, C, tq), lambda b, qi, ki: (b, 0, qi)),       # x (residual)
                pl.BlockSpec((1, tq, Cq_pad), lambda b, qi, ki: (b, qi, 0)),  # q^T tile
                pl.BlockSpec((1, Cq_pad, tk), lambda b, qi, ki: (b, 0, ki)),  # k tile
                pl.BlockSpec((1, tk, C), lambda b, qi, ki: (b, ki, 0)),       # v^T tile
                pl.BlockSpec(memory_space=pltpu.MemorySpace.SMEM),            # gamma
            ],
            out_specs=pl.BlockSpec((1, C, tq), lambda b, qi, ki: (b, 0, qi)),
            scratch_shapes=[
                pltpu.VMEM((tq, 1), jnp.float32),    # m (running max)
                pltpu.VMEM((tq, 1), jnp.float32),    # l (running denom)
                pltpu.VMEM((tq, C), jnp.float32),    # acc
            ],
        ),
        compiler_params=pltpu.CompilerParams(
            # q-tile axis is safely "parallel" now: no cross-q-tile cache state remains.
            dimension_semantics=("parallel", "parallel", "arbitrary"),
            vmem_limit_bytes=32 * 1024 * 1024,
        ),
    )(x_flat, qT, k, vT, gamma1)

    return out_flat.reshape(B, C, H, W)


def reference(x, wq, bq, wk, bk, wv, bv, gamma):
    """Pure-JAX reference mirroring the PyTorch forward exactly (f32)."""
    B, C, H, W = x.shape
    N = H * W
    Cq = wq.shape[0]
    xf = x.reshape(B, C, N)
    q = jnp.einsum('oc,bcn->bon', wq, xf) + bq[None, :, None]
    k = jnp.einsum('oc,bcn->bon', wk, xf) + bk[None, :, None]
    v = jnp.einsum('oc,bcn->bon', wv, xf) + bv[None, :, None]
    qT = jnp.transpose(q, (0, 2, 1))
    attn = jax.nn.softmax(jnp.einsum('bnc,bcm->bnm', qT, k) / math.sqrt(Cq), axis=-1)
    out = jnp.einsum('bcm,bnm->bcn', v, attn).reshape(B, C, H, W)
    return x + gamma * out


if __name__ == "__main__":
    key = jax.random.PRNGKey(0)
    kx, kwq, kbq, kwk, kbk, kwv, kbv = jax.random.split(key, 7)

    B, C, H, W = 2, 32, 16, 16          # N = 256 -> single (q, kv) tile pair
    Cq = C // 8
    ws = 0.25

    x = jax.random.normal(kx, (B, C, H, W), dtype=jnp.float32)
    wq = jax.random.normal(kwq, (Cq, C), dtype=jnp.float32) * ws
    bq = jax.random.normal(kbq, (Cq,), dtype=jnp.float32) * ws
    wk = jax.random.normal(kwk, (Cq, C), dtype=jnp.float32) * ws
    bk = jax.random.normal(kbk, (Cq,), dtype=jnp.float32) * ws
    wv = jax.random.normal(kwv, (C, C), dtype=jnp.float32) * ws
    bv = jax.random.normal(kbv, (C,), dtype=jnp.float32) * ws
    # PyTorch initializes gamma to 0; use a nonzero value so the attention path is tested.
    gamma = jnp.array([0.5], dtype=jnp.float32)

    y = jax.block_until_ready(self_attention(x, wq, bq, wk, bk, wv, bv, gamma))
    y_ref = reference(x, wq, bq, wk, bk, wv, bv, gamma)
    assert y.shape == (B, C, H, W)
    assert jnp.allclose(y, y_ref, atol=2e-2, rtol=2e-2), \
        float(jnp.max(jnp.abs(y - y_ref)))

    # Small-spatial path: N = 64 -> full-size single tiles everywhere.
    x2 = jax.random.normal(jax.random.PRNGKey(1), (2, C, 8, 8), dtype=jnp.float32)
    y2 = jax.block_until_ready(self_attention(x2, wq, bq, wk, bk, wv, bv, gamma))
    y2_ref = reference(x2, wq, bq, wk, bk, wv, bv, gamma)
    assert jnp.allclose(y2, y2_ref, atol=2e-2, rtol=2e-2), \
        float(jnp.max(jnp.abs(y2 - y2_ref)))

    # Multi-tile path: N = 1024 with default picks -> n_q = 2, n_k = 1 (kv in one step).
    x3 = jax.random.normal(jax.random.PRNGKey(2), (1, C, 32, 32), dtype=jnp.float32)
    y3 = jax.block_until_ready(self_attention(x3, wq, bq, wk, bk, wv, bv, gamma))
    y3_ref = reference(x3, wq, bq, wk, bk, wv, bv, gamma)
    assert jnp.allclose(y3, y3_ref, atol=2e-2, rtol=2e-2), \
        float(jnp.max(jnp.abs(y3 - y3_ref)))

    print("KERNEL_OK")
</pallas_src>

<mosaic_0001>
module attributes {stable_mosaic.version = 11 : i64} {
  func.func @_proj_kernel(%arg0: i32, %arg1: i32, %arg2: memref<1x32x256xf32, #tpu.memory_space<vmem>>, %arg3: memref<16x32xf32, #tpu.memory_space<vmem>>, %arg4: memref<1x16xf32, #tpu.memory_space<vmem>>, %arg5: memref<16x32xf32, #tpu.memory_space<vmem>>, %arg6: memref<16x1xf32, #tpu.memory_space<vmem>>, %arg7: memref<32x32xf32, #tpu.memory_space<vmem>>, %arg8: memref<1x32xf32, #tpu.memory_space<vmem>>, %arg9: memref<1x256x16xbf16, #tpu.memory_space<vmem>>, %arg10: memref<1x16x256xbf16, #tpu.memory_space<vmem>>, %arg11: memref<1x256x32xbf16, #tpu.memory_space<vmem>>) attributes {dimension_semantics = [#tpu.dimension_semantics<parallel>, #tpu.dimension_semantics<parallel>], iteration_bounds = array<i64: 2, 1>, scalar_prefetch = 0 : i64, scratch_operands = 0 : i64, tpu.core_type = #tpu.core_type<tc>, window_params = [{transform_indices = @transform_0, window_bounds = array<i64: 1, 32, 256>}, {pipeline_mode = #tpu.pipeline_mode<synchronous>, transform_indices = @transform_1, window_bounds = array<i64: 16, 32>}, {pipeline_mode = #tpu.pipeline_mode<synchronous>, transform_indices = @transform_2, window_bounds = array<i64: 1, 16>}, {pipeline_mode = #tpu.pipeline_mode<synchronous>, transform_indices = @transform_3, window_bounds = array<i64: 16, 32>}, {pipeline_mode = #tpu.pipeline_mode<synchronous>, transform_indices = @transform_4, window_bounds = array<i64: 16, 1>}, {pipeline_mode = #tpu.pipeline_mode<synchronous>, transform_indices = @transform_5, window_bounds = array<i64: 32, 32>}, {pipeline_mode = #tpu.pipeline_mode<synchronous>, transform_indices = @transform_6, window_bounds = array<i64: 1, 32>}, {transform_indices = @transform_7, window_bounds = array<i64: 1, 256, 16>}, {transform_indices = @transform_8, window_bounds = array<i64: 1, 16, 256>}, {transform_indices = @transform_9, window_bounds = array<i64: 1, 256, 32>}]} {
    %c0 = arith.constant 0 : index
    %c0_0 = arith.constant 0 : index
    %c0_1 = arith.constant 0 : index
    %0 = vector.load %arg2[%c0, %c0_0, %c0_1] : memref<1x32x256xf32, #tpu.memory_space<vmem>>, vector<1x32x256xf32>
    %1 = vector.shape_cast %0 : vector<1x32x256xf32> to vector<32x256xf32>
    %c0_2 = arith.constant 0 : index
    %c0_3 = arith.constant 0 : index
    %2 = vector.load %arg5[%c0_2, %c0_3] : memref<16x32xf32, #tpu.memory_space<vmem>>, vector<16x32xf32>
    %cst = arith.constant dense<0.000000e+00> : vector<16x256xf32>
    %3 = tpu.matmul %2, %1, %cst {dimension_numbers = #tpu.dot_dimension_numbers<[1], [0], [0], [1], [0, 0, 1, 1], [], []>} : vector<16x32xf32>, vector<32x256xf32>, vector<16x256xf32> -> vector<16x256xf32>
    %c0_4 = arith.constant 0 : index
    %c0_5 = arith.constant 0 : index
    %4 = vector.load %arg6[%c0_4, %c0_5] : memref<16x1xf32, #tpu.memory_space<vmem>>, vector<16x1xf32>
    %5 = vector.broadcast %4 : vector<16x1xf32> to vector<16x256xf32>
    %6 = arith.addf %3, %5 : vector<16x256xf32>
    %c0_6 = arith.constant 0 : index
    %c0_7 = arith.constant 0 : index
    %7 = vector.load %arg3[%c0_6, %c0_7] : memref<16x32xf32, #tpu.memory_space<vmem>>, vector<16x32xf32>
    %cst_8 = arith.constant dense<0.000000e+00> : vector<256x16xf32>
    %8 = tpu.matmul %1, %7, %cst_8 {dimension_numbers = #tpu.dot_dimension_numbers<[0], [1], [1], [0], [0, 1, 1, 0], [], []>} : vector<32x256xf32>, vector<16x32xf32>, vector<256x16xf32> -> vector<256x16xf32>
    %c0_9 = arith.constant 0 : index
    %c0_10 = arith.constant 0 : index
    %9 = vector.load %arg4[%c0_9, %c0_10] : memref<1x16xf32, #tpu.memory_space<vmem>>, vector<1x16xf32>
    %10 = vector.broadcast %9 : vector<1x16xf32> to vector<256x16xf32>
    %11 = arith.addf %8, %10 : vector<256x16xf32>
    %c0_11 = arith.constant 0 : index
    %c0_12 = arith.constant 0 : index
    %12 = vector.load %arg7[%c0_11, %c0_12] : memref<32x32xf32, #tpu.memory_space<vmem>>, vector<32x32xf32>
    %cst_13 = arith.constant dense<0.000000e+00> : vector<256x32xf32>
    %13 = tpu.matmul %1, %12, %cst_13 {dimension_numbers = #tpu.dot_dimension_numbers<[0], [1], [1], [0], [0, 1, 1, 0], [], []>} : vector<32x256xf32>, vector<32x32xf32>, vector<256x32xf32> -> vector<256x32xf32>
    %c0_14 = arith.constant 0 : index
    %c0_15 = arith.constant 0 : index
    %14 = vector.load %arg8[%c0_14, %c0_15] : memref<1x32xf32, #tpu.memory_space<vmem>>, vector<1x32xf32>
    %15 = vector.broadcast %14 : vector<1x32xf32> to vector<256x32xf32>
    %16 = arith.addf %13, %15 : vector<256x32xf32>
    %cst_16 = arith.constant 5.000000e-01 : f32
    %17 = vector.broadcast %cst_16 : f32 to vector<256x16xf32>
    %18 = arith.mulf %11, %17 : vector<256x16xf32>
    %19 = arith.truncf %18 : vector<256x16xf32> to vector<256x16xbf16>
    %c0_17 = arith.constant 0 : index
    %c0_18 = arith.constant 0 : index
    %c0_19 = arith.constant 0 : index
    %20 = vector.load %arg9[%c0_17, %c0_18, %c0_19] : memref<1x256x16xbf16, #tpu.memory_space<vmem>>, vector<1x256x16xbf16>
    %21 = vector.shape_cast %20 : vector<1x256x16xbf16> to vector<256x16xbf16>
    %22 = vector.shape_cast %19 : vector<256x16xbf16> to vector<1x256x16xbf16>
    tpu.vector_store %arg9[%c0_17, %c0_18, %c0_19], %22 {strides = array<i32>} : memref<1x256x16xbf16, #tpu.memory_space<vmem>>, vector<1x256x16xbf16>,
    %23 = arith.truncf %6 : vector<16x256xf32> to vector<16x256xbf16>
    %c0_20 = arith.constant 0 : index
    %c0_21 = arith.constant 0 : index
    %c0_22 = arith.constant 0 : index
    %24 = vector.load %arg10[%c0_20, %c0_21, %c0_22] : memref<1x16x256xbf16, #tpu.memory_space<vmem>>, vector<1x16x256xbf16>
    %25 = vector.shape_cast %24 : vector<1x16x256xbf16> to vector<16x256xbf16>
    %26 = vector.shape_cast %23 : vector<16x256xbf16> to vector<1x16x256xbf16>
    tpu.vector_store %arg10[%c0_20, %c0_21, %c0_22], %26 {strides = array<i32>} : memref<1x16x256xbf16, #tpu.memory_space<vmem>>, vector<1x16x256xbf16>,
    %27 = arith.truncf %16 : vector<256x32xf32> to vector<256x32xbf16>
    %c0_23 = arith.constant 0 : index
    %c0_24 = arith.constant 0 : index
    %c0_25 = arith.constant 0 : index
    %28 = vector.load %arg11[%c0_23, %c0_24, %c0_25] : memref<1x256x32xbf16, #tpu.memory_space<vmem>>, vector<1x256x32xbf16>
    %29 = vector.shape_cast %28 : vector<1x256x32xbf16> to vector<256x32xbf16>
    %30 = vector.shape_cast %27 : vector<256x32xbf16> to vector<1x256x32xbf16>
    tpu.vector_store %arg11[%c0_23, %c0_24, %c0_25], %30 {strides = array<i32>} : memref<1x256x32xbf16, #tpu.memory_space<vmem>>, vector<1x256x32xbf16>,
    return
  }
  func.func @transform_0(%arg0: i32, %arg1: i32) -> (i32, i32, i32) {
    %c0_i32 = arith.constant 0 : i32
    %c0_i32_0 = arith.constant 0 : i32
    return %arg0, %c0_i32, %arg1 : i32, i32, i32
  }
  func.func @transform_1(%arg0: i32, %arg1: i32) -> (i32, i32) {
    %c0_i32 = arith.constant 0 : i32
    %c0_i32_0 = arith.constant 0 : i32
    %c0_i32_1 = arith.constant 0 : i32
    return %c0_i32, %c0_i32_0 : i32, i32
  }
  func.func @transform_2(%arg0: i32, %arg1: i32) -> (i32, i32) {
    %c0_i32 = arith.constant 0 : i32
    %c0_i32_0 = arith.constant 0 : i32
    %c0_i32_1 = arith.constant 0 : i32
    return %c0_i32, %c0_i32_0 : i32, i32
  }
  func.func @transform_3(%arg0: i32, %arg1: i32) -> (i32, i32) {
    %c0_i32 = arith.constant 0 : i32
    %c0_i32_0 = arith.constant 0 : i32
    %c0_i32_1 = arith.constant 0 : i32
    return %c0_i32, %c0_i32_0 : i32, i32
  }
  func.func @transform_4(%arg0: i32, %arg1: i32) -> (i32, i32) {
    %c0_i32 = arith.constant 0 : i32
    %c0_i32_0 = arith.constant 0 : i32
    %c0_i32_1 = arith.constant 0 : i32
    return %c0_i32, %c0_i32_0 : i32, i32
  }
  func.func @transform_5(%arg0: i32, %arg1: i32) -> (i32, i32) {
    %c0_i32 = arith.constant 0 : i32
    %c0_i32_0 = arith.constant 0 : i32
    %c0_i32_1 = arith.constant 0 : i32
    return %c0_i32, %c0_i32_0 : i32, i32
  }
  func.func @transform_6(%arg0: i32, %arg1: i32) -> (i32, i32) {
    %c0_i32 = arith.constant 0 : i32
    %c0_i32_0 = arith.constant 0 : i32
    %c0_i32_1 = arith.constant 0 : i32
    return %c0_i32, %c0_i32_0 : i32, i32
  }
  func.func @transform_7(%arg0: i32, %arg1: i32) -> (i32, i32, i32) {
    %c0_i32 = arith.constant 0 : i32
    %c0_i32_0 = arith.constant 0 : i32
    return %arg0, %arg1, %c0_i32 : i32, i32, i32
  }
  func.func @transform_8(%arg0: i32, %arg1: i32) -> (i32, i32, i32) {
    %c0_i32 = arith.constant 0 : i32
    %c0_i32_0 = arith.constant 0 : i32
    return %arg0, %c0_i32, %arg1 : i32, i32, i32
  }
  func.func @transform_9(%arg0: i32, %arg1: i32) -> (i32, i32, i32) {
    %c0_i32 = arith.constant 0 : i32
    %c0_i32_0 = arith.constant 0 : i32
    return %arg0, %arg1, %c0_i32 : i32, i32, i32
  }
}

module attributes {stable_mosaic.version = 11 : i64} {
  func.func @_flash_kernel(%arg0: i32, %arg1: i32, %arg2: i32, %arg3: memref<1x32x256xf32, #tpu.memory_space<vmem>>, %arg4: memref<1x256x16xbf16, #tpu.memory_space<vmem>>, %arg5: memref<1x16x256xbf16, #tpu.memory_space<vmem>>, %arg6: memref<1x256x32xbf16, #tpu.memory_space<vmem>>, %arg7: memref<1xf32, #tpu.memory_space<smem>>, %arg8: memref<1x32x256xf32, #tpu.memory_space<vmem>>, %arg9: memref<256x1xf32, #tpu.memory_space<vmem>>, %arg10: memref<256x1xf32, #tpu.memory_space<vmem>>, %arg11: memref<256x32xf32, #tpu.memory_space<vmem>>) attributes {dimension_semantics = [#tpu.dimension_semantics<parallel>, #tpu.dimension_semantics<parallel>, #tpu.dimension_semantics<arbitrary>], iteration_bounds = array<i64: 2, 1, 1>, scalar_prefetch = 0 : i64, scratch_operands = 3 : i64, tpu.core_type = #tpu.core_type<tc>, window_params = [{transform_indices = @transform_0, window_bounds = array<i64: 1, 32, 256>}, {transform_indices = @transform_1, window_bounds = array<i64: 1, 256, 16>}, {transform_indices = @transform_2, window_bounds = array<i64: 1, 16, 256>}, {transform_indices = @transform_3, window_bounds = array<i64: 1, 256, 32>}, {transform_indices = @transform_4, window_bounds = array<i64: 1>}, {transform_indices = @transform_5, window_bounds = array<i64: 1, 32, 256>}]} {
    %c0_i32 = arith.constant 0 : i32
    %0 = arith.cmpi eq, %arg2, %c0_i32 : i32
    %1 = arith.extui %0 : i1 to i32
    %c0_i32_0 = arith.constant 0 : i32
    %2 = arith.cmpi ne, %1, %c0_i32_0 : i32
    scf.if %2 {
      %cst_26 = arith.constant 0xFF800000 : f32
      %36 = vector.broadcast %cst_26 : f32 to vector<256x1xf32>
      %c0_27 = arith.constant 0 : index
      %c0_28 = arith.constant 0 : index
      %37 = vector.load %arg9[%c0_27, %c0_28] : memref<256x1xf32, #tpu.memory_space<vmem>>, vector<256x1xf32>
      tpu.vector_store %arg9[%c0_27, %c0_28], %36 {strides = array<i32>} : memref<256x1xf32, #tpu.memory_space<vmem>>, vector<256x1xf32>,
      %cst_29 = arith.constant 0.000000e+00 : f32
      %38 = vector.broadcast %cst_29 : f32 to vector<256x1xf32>
      %c0_30 = arith.constant 0 : index
      %c0_31 = arith.constant 0 : index
      %39 = vector.load %arg10[%c0_30, %c0_31] : memref<256x1xf32, #tpu.memory_space<vmem>>, vector<256x1xf32>
      tpu.vector_store %arg10[%c0_30, %c0_31], %38 {strides = array<i32>} : memref<256x1xf32, #tpu.memory_space<vmem>>, vector<256x1xf32>,
      %cst_32 = arith.constant 0.000000e+00 : f32
      %40 = vector.broadcast %cst_32 : f32 to vector<256x32xf32>
      %c0_33 = arith.constant 0 : index
      %c0_34 = arith.constant 0 : index
      %41 = vector.load %arg11[%c0_33, %c0_34] : memref<256x32xf32, #tpu.memory_space<vmem>>, vector<256x32xf32>
      tpu.vector_store %arg11[%c0_33, %c0_34], %40 {strides = array<i32>} : memref<256x32xf32, #tpu.memory_space<vmem>>, vector<256x32xf32>,
    } else {
    }
    %c0 = arith.constant 0 : index
    %c0_1 = arith.constant 0 : index
    %c0_2 = arith.constant 0 : index
    %3 = vector.load %arg4[%c0, %c0_1, %c0_2] : memref<1x256x16xbf16, #tpu.memory_space<vmem>>, vector<1x256x16xbf16>
    %4 = vector.shape_cast %3 : vector<1x256x16xbf16> to vector<256x16xbf16>
    %c0_3 = arith.constant 0 : index
    %c0_4 = arith.constant 0 : index
    %c0_5 = arith.constant 0 : index
    %5 = vector.load %arg5[%c0_3, %c0_4, %c0_5] : memref<1x16x256xbf16, #tpu.memory_space<vmem>>, vector<1x16x256xbf16>
    %6 = vector.shape_cast %5 : vector<1x16x256xbf16> to vector<16x256xbf16>
    %cst = arith.constant dense<0.000000e+00> : vector<256x256xf32>
    %7 = tpu.matmul %4, %6, %cst {dimension_numbers = #tpu.dot_dimension_numbers<[1], [0], [0], [1], [0, 0, 1, 1], [], []>} : vector<256x16xbf16>, vector<16x256xbf16>, vector<256x256xf32> -> vector<256x256xf32>
    %c0_6 = arith.constant 0 : index
    %c0_7 = arith.constant 0 : index
    %8 = vector.load %arg9[%c0_6, %c0_7] : memref<256x1xf32, #tpu.memory_space<vmem>>, vector<256x1xf32>
    %cst_8 = arith.constant dense<0xFF800000> : vector<256xf32>
    %9 = vector.multi_reduction <maximumf>, %7, %cst_8 [1] : vector<256x256xf32> to vector<256xf32>
    %10 = vector.shape_cast %9 : vector<256xf32> to vector<256x1xf32>
    %11 = arith.maximumf %8, %10 : vector<256x1xf32>
    %12 = arith.subf %8, %11 : vector<256x1xf32>
    %13 = math.exp %12 : vector<256x1xf32>
    %14 = vector.broadcast %11 : vector<256x1xf32> to vector<256x256xf32>
    %15 = arith.subf %7, %14 : vector<256x256xf32>
    %16 = math.exp %15 : vector<256x256xf32>
    %c0_9 = arith.constant 0 : index
    %c0_10 = arith.constant 0 : index
    %17 = vector.load %arg10[%c0_9, %c0_10] : memref<256x1xf32, #tpu.memory_space<vmem>>, vector<256x1xf32>
    %18 = arith.mulf %13, %17 : vector<256x1xf32>
    %cst_11 = arith.constant dense<0.000000e+00> : vector<256xf32>
    %19 = vector.multi_reduction <add>, %16, %cst_11 [1] : vector<256x256xf32> to vector<256xf32>
    %20 = vector.shape_cast %19 : vector<256xf32> to vector<256x1xf32>
    %21 = arith.addf %18, %20 : vector<256x1xf32>
    %c0_12 = arith.constant 0 : index
    %c0_13 = arith.constant 0 : index
    %22 = vector.load %arg10[%c0_12, %c0_13] : memref<256x1xf32, #tpu.memory_space<vmem>>, vector<256x1xf32>
    tpu.vector_store %arg10[%c0_12, %c0_13], %21 {strides = array<i32>} : memref<256x1xf32, #tpu.memory_space<vmem>>, vector<256x1xf32>,
    %c0_14 = arith.constant 0 : index
    %c0_15 = arith.constant 0 : index
    %c0_16 = arith.constant 0 : index
    %23 = vector.load %arg6[%c0_14, %c0_15, %c0_16] : memref<1x256x32xbf16, #tpu.memory_space<vmem>>, vector<1x256x32xbf16>
    %24 = vector.shape_cast %23 : vector<1x256x32xbf16> to vector<256x32xbf16>
    %c0_17 = arith.constant 0 : index
    %c0_18 = arith.constant 0 : index
    %25 = vector.load %arg11[%c0_17, %c0_18] : memref<256x32xf32, #tpu.memory_space<vmem>>, vector<256x32xf32>
    %26 = vector.broadcast %13 : vector<256x1xf32> to vector<256x32xf32>
    %27 = arith.mulf %26, %25 : vector<256x32xf32>
    %28 = arith.truncf %16 : vector<256x256xf32> to vector<256x256xbf16>
    %cst_19 = arith.constant dense<0.000000e+00> : vector<256x32xf32>
    %29 = tpu.matmul %28, %24, %cst_19 {dimension_numbers = #tpu.dot_dimension_numbers<[1], [0], [0], [1], [0, 0, 1, 1], [], []>} : vector<256x256xbf16>, vector<256x32xbf16>, vector<256x32xf32> -> vector<256x32xf32>
    %30 = arith.addf %27, %29 : vector<256x32xf32>
    %c0_20 = arith.constant 0 : index
    %c0_21 = arith.constant 0 : index
    %31 = vector.load %arg11[%c0_20, %c0_21] : memref<256x32xf32, #tpu.memory_space<vmem>>, vector<256x32xf32>
    tpu.vector_store %arg11[%c0_20, %c0_21], %30 {strides = array<i32>} : memref<256x32xf32, #tpu.memory_space<vmem>>, vector<256x32xf32>,
    %c0_22 = arith.constant 0 : index
    %c0_23 = arith.constant 0 : index
    %32 = vector.load %arg9[%c0_22, %c0_23] : memref<256x1xf32, #tpu.memory_space<vmem>>, vector<256x1xf32>
    tpu.vector_store %arg9[%c0_22, %c0_23], %11 {strides = array<i32>} : memref<256x1xf32, #tpu.memory_space<vmem>>, vector<256x1xf32>,
    %c0_i32_24 = arith.constant 0 : i32
    %33 = arith.cmpi eq, %arg2, %c0_i32_24 : i32
    %34 = arith.extui %33 : i1 to i32
    %c0_i32_25 = arith.constant 0 : i32
    %35 = arith.cmpi ne, %34, %c0_i32_25 : i32
    scf.if %35 {
      %c0_26 = arith.constant 0 : index
      %c0_27 = arith.constant 0 : index
      %36 = vector.load %arg10[%c0_26, %c0_27] : memref<256x1xf32, #tpu.memory_space<vmem>>, vector<256x1xf32>
      %37 = tpu.reciprocal %36 {approx = true} : vector<256x1xf32> -> vector<256x1xf32>
      %c0_28 = arith.constant 0 : index
      %c0_29 = arith.constant 0 : index
      %38 = vector.load %arg11[%c0_28, %c0_29] : memref<256x32xf32, #tpu.memory_space<vmem>>, vector<256x32xf32>
      %39 = vector.broadcast %37 : vector<256x1xf32> to vector<256x32xf32>
      %40 = arith.mulf %38, %39 : vector<256x32xf32>
      %c0_30 = arith.constant 0 : index
      %c0_31 = arith.constant 0 : index
      %c0_32 = arith.constant 0 : index
      %41 = vector.load %arg3[%c0_30, %c0_31, %c0_32] : memref<1x32x256xf32, #tpu.memory_space<vmem>>, vector<1x32x256xf32>
      %42 = vector.shape_cast %41 : vector<1x32x256xf32> to vector<32x256xf32>
      %c0_33 = arith.constant 0 : index
      %43 = memref.load %arg7[%c0_33] : memref<1xf32, #tpu.memory_space<smem>>
      %44 = tpu.transpose %40, [1, 0] : vector<256x32xf32> -> vector<32x256xf32>
      %45 = vector.broadcast %43 : f32 to vector<32x256xf32>
      %46 = arith.mulf %45, %44 : vector<32x256xf32>
      %47 = arith.addf %42, %46 : vector<32x256xf32>
      %c0_34 = arith.constant 0 : index
      %c0_35 = arith.constant 0 : index
      %c0_36 = arith.constant 0 : index
      %48 = vector.load %arg8[%c0_34, %c0_35, %c0_36] : memref<1x32x256xf32, #tpu.memory_space<vmem>>, vector<1x32x256xf32>
      %49 = vector.shape_cast %48 : vector<1x32x256xf32> to vector<32x256xf32>
      %50 = vector.shape_cast %47 : vector<32x256xf32> to vector<1x32x256xf32>
      tpu.vector_store %arg8[%c0_34, %c0_35, %c0_36], %50 {strides = array<i32>} : memref<1x32x256xf32, #tpu.memory_space<vmem>>, vector<1x32x256xf32>,
    } else {
    }
    return
  }
  func.func @transform_0(%arg0: i32, %arg1: i32, %arg2: i32) -> (i32, i32, i32) {
    %c0_i32 = arith.constant 0 : i32
    %c0_i32_0 = arith.constant 0 : i32
    return %arg0, %c0_i32, %arg1 : i32, i32, i32
  }
  func.func @transform_1(%arg0: i32, %arg1: i32, %arg2: i32) -> (i32, i32, i32) {
    %c0_i32 = arith.constant 0 : i32
    %c0_i32_0 = arith.constant 0 : i32
    return %arg0, %arg1, %c0_i32 : i32, i32, i32
  }
  func.func @transform_2(%arg0: i32, %arg1: i32, %arg2: i32) -> (i32, i32, i32) {
    %c0_i32 = arith.constant 0 : i32
    %c0_i32_0 = arith.constant 0 : i32
    return %arg0, %c0_i32, %arg2 : i32, i32, i32
  }
  func.func @transform_3(%arg0: i32, %arg1: i32, %arg2: i32) -> (i32, i32, i32) {
    %c0_i32 = arith.constant 0 : i32
    %c0_i32_0 = arith.constant 0 : i32
    return %arg0, %arg2, %c0_i32 : i32, i32, i32
  }
  func.func @transform_4(%arg0: i32, %arg1: i32, %arg2: i32) -> i32 {
    %c0_i32 = arith.constant 0 : i32
    %c0_i32_0 = arith.constant 0 : i32
    return %c0_i32 : i32
  }
  func.func @transform_5(%arg0: i32, %arg1: i32, %arg2: i32) -> (i32, i32, i32) {
    %c0_i32 = arith.constant 0 : i32
    %c0_i32_0 = arith.constant 0 : i32
    return %arg0, %c0_i32, %arg1 : i32, i32, i32
  }
}

</mosaic_0001>

<bundles_post_ra>
// kernel: self_attention.2
= control target key start
LH: loop header
LB: loop body
LE: loop exit
PB: predicated region body
PF: predicated region fallthrough
CT: control target
= control target key end

     0   :  { %s2261_s30 = smov 0   ;;  %s2263_s10 = smov 0   ;;  %s2625_s0 = inlined_call_operand.vmem [shape: f32[2,32,256], index: 0, kind: input, shape index: {}]   ;;  %s2626_s1 = inlined_call_operand.vmem [shape: f32[16,32], index: 1, kind: input, shape index: {}]   ;;  %s2627_s2 = inlined_call_operand.vmem [shape: f32[1,16], index: 2, kind: input, shape index: {}]   ;;  %s2628_s3 = inlined_call_operand.vmem [shape: f32[16,32], index: 3, kind: input, shape index: {}]   ;;  %s2629_s4 = inlined_call_operand.vmem [shape: f32[16,1], index: 4, kind: input, shape index: {}]   ;;  %s2630_s5 = inlined_call_operand.vmem [shape: f32[32,32], index: 5, kind: input, shape index: {}]   ;;  %s2631_s6 = inlined_call_operand.vmem [shape: f32[1,32], index: 6, kind: input, shape index: {}]   ;;  %s2632_s7 = inlined_call_operand.vmem [shape: bf16[2,256,16], index: 7, kind: output, shape index: {0}]   ;;  %s2633_s8 = inlined_call_operand.vmem [shape: bf16[2,16,256], index: 8, kind: output, shape index: {1}]   ;;  %s2634_s9 = inlined_call_operand.vmem [shape: bf16[2,256,32], index: 9, kind: output, shape index: {2}]  }
   0x1   :  { %s2265_s11 = smov 0  }
   0x2 LB: > { %s32_s12 = sadd.s32 1, %s2203_s10  ;;  %p1732_p0 = scmp.ge.s32.totalorder %s2207_s11, 1  ;;  %s2207_s11 = sphi %s2265_s11, %s20_s11   ;;  %s2203_s10 = sphi %s2263_s10, %s2638_s10   ;;  %s2199_s30 = sphi %s2261_s30, %s2637_s30  }
   0x3   : > { %p34_p1 = scmp.ge.s32.totalorder %s32_s12, 2  ;;  %p317_p2 = scmp.lt.s32.totalorder %s2207_s11, 3 }
   0x5   : > { %s2640_s12 = smov (%p34_p1, %s32_s12), 0  ;;  %p318_p3 = pnand %p1732_p0, %p317_p2 }
   0x6   : > { %p380_p4 = scmp.lt.s32.totalorder (!%p318_p3), %s2199_s30, 1  ;;  %vm441_vm0 = vcmask (!%p318_p3), 261120   ;;  %v925_v0 = vld [vmem:[%s2630_s5] sm:$0xff] (!%p318_p3)  ;;  %v926_v1 = vld [vmem:[%s2630_s5 + $0x8] sm:$0xff] (!%p318_p3)  ;;  %v2209_v4 = vmov (!%p318_p3), 0.0   ;;  %v927_v5 = vld [vmem:[%s2630_s5 + $0x10] sm:$0xff] (!%p318_p3) }
   0x7   : > { %321 = sbr.rel (%p318_p3) target bundleno = 459 (0x1cb), region = 48  ;;  %vm2287_vm1 = vmpackc.low (!%p318_p3), %vm441_vm0, %vm441_vm0  ;;  %v2145_v3 = vpack.c.bf16 (!%p318_p3), %v926_v1, %v925_v0  ;;  %512 = vmatprep.mubr.f32.mxu1 (!%p318_p3), %v2209_v4  ;;  %v928_v6 = vld [vmem:[%s2630_s5 + $0x18] sm:$0xff] (!%p318_p3)  ;;  %v525_v17 = vld [vmem:[%s2626_s1] sm:$0xff] (!%p318_p3)  ;;  %v2210_v26 = vmov (!%p318_p3), 0   ;;  %vm1508_vm2 = vcmask (!%p318_p3), 257024   ;;  %vm1333_vm3 = vcmask (!%p318_p3), 125952  }
   0x8   : > { %v2151_v7 = vpack.c.bf16 (!%p318_p3), %v928_v6, %v927_v5  ;;  %v526_v18 = vld [vmem:[%s2626_s1 + $0x8] sm:$0xff] (!%p318_p3)  ;;  %v427_v23 = vld [vmem:[%s2628_s3] sm:$0xff] (!%p318_p3) }
   0x9   : > { %2147 = vmatprep.subr.msk.bf16.mxu0 (!%p318_p3), %vm2287_vm1, %v2145_v3  ;;  %v2139_v22 = vpack.c.bf16 (!%p318_p3), %v526_v18, %v525_v17  ;;  %v428_v24 = vld [vmem:[%s2628_s3 + $0x8] sm:$0xff] (!%p318_p3)  ;;  %v429_v27 = vld [vmem:[%s2629_s4] sm:$0xff] (!%p318_p3) }
   0xa   : > { %2150 = vmatpush3.bf16.xpose.msk.msra.mxu0 (!%p318_p3), %vm2287_vm1, %v2145_v3  ;;  %v430_v25 = vld [vmem:[%s2629_s4 + $0x8] sm:$0xff] (!%p318_p3) }
   0xb   : > { %2153 = vmatprep.subr.msk.bf16.mxu0 (!%p318_p3), %vm2287_vm1, %v2151_v7 }
   0xe   : > { %s2642_s30 = smov (!%p380_p4, %s2199_s30), 1 }
   0xf   : > { %s1883_s21 = sshll.u32 %s2642_s30, 6  ;;  %s1885_s20 = sshll.u32 %s2642_s30, 4 }
  0x10   : > { %s387_s24 = scalar_lea.vmem %s2625_s0, %s1883_s21  ;;  %s407_s23 = scalar_lea.vmem %s2633_s8, %s1885_s20 }
  0x11   : > { %v419_v8 = vld [vmem:[%s387_s24] sm:$0xff]  ;;  %v421_v9 = vld [vmem:[%s387_s24 + $0x10] sm:$0xff]  ;;  %v420_v10 = vld [vmem:[%s387_s24 + $0x8] sm:$0xff]  ;;  %s1884_s28 = sshll.u32 %s2642_s30, 7 }
  0x12   : > { %534 = vxpose.xlu0.b32.start [1/4] (short) %v419_v8, 128  ;;  %v422_v11 = vld [vmem:[%s387_s24 + $0x18] sm:$0xff]  ;;  %v2133_v12 = vpack.c.bf16 %v421_v9, %v419_v8  ;;  %566 = vxpose.xlu1.b32.start [1/4] (short) %v420_v10, 128  ;;  %v424_v13 = vld [vmem:[%s387_s24 + $0x28] sm:$0xff]  ;;  %v423_v19 = vld [vmem:[%s387_s24 + $0x20] sm:$0xff]  ;;  %s2419_s14 = scalar_lea.vmem %s2634_s9, %s1884_s28  ;;  %s2426_s16 = scalar_lea.vmem %s2632_s7, %s1884_s28 }
  0x13   : > { %v426_v14 = vld [vmem:[%s387_s24 + $0x38] sm:$0xff]  ;;  %v2131_v15 = vpack.c.bf16 %v422_v11, %v420_v10  ;;  %v425_v20 = vld [vmem:[%s387_s24 + $0x30] sm:$0xff]  ;;  %2156 = vmatpush3.bf16.xpose.msk.msra.mxu0 %vm2287_vm1, %v2151_v7  ;;  %v2406_v8 = vld [vmem:[%s2627_s2] ss:$0 sm:$0xff] }
  0x14   : > { %v2135_v16 = vpack.c.bf16 %v426_v14, %v424_v13  ;;  %v2137_v21 = vpack.c.bf16 %v425_v20, %v423_v19 }
  0x15   : > { %2132 = vmatprep.subr.bf16.mxu1 %v2131_v15 }
  0x16   : > { %535 = vxpose.xlu0.b32.cont [2/4] (short) %v421_v9, 128  ;;  %2134 = vmatpush1.bf16.msra.mxu1 %v2133_v12  ;;  %v2411_v9 = vld [vmem:[%s2631_s6] ss:$0 sm:$0xff] }
  0x17   : > { %567 = vxpose.xlu1.b32.cont [2/4] (short) %v422_v11, 128  ;;  %2136 = vmatprep.subr.bf16.mxu1 %v2135_v16 }
  0x1a   : > { %536 = vxpose.xlu0.b32.cont [3/4] (short) %v423_v19, 128  ;;  %2138 = vmatpush1.bf16.msra.mxu1 %v2137_v21 }
  0x1b   : > { %568 = vxpose.xlu1.b32.cont [3/4] (short) %v424_v13, 128  ;;  %2141 = vmatprep.subr.msk.bf16.mxu1 %vm2287_vm1, %v2139_v22 }
  0x1d   : > { %1741 = vmatmul.mubr.msk.f32.vlgmr.msra.gmra.mrb[0].mxu1 %vm441_vm0, %v427_v23 }
  0x1e   : > { %537 = vxpose.xlu0.b32.end [4/4] (short) %v425_v20, 128  ;;  %518 = vmatprep.mubr.f32.mxu1 %v2209_v4 }
  0x1f   : > { %569 = vxpose.xlu1.b32.end [4/4] (short) %v426_v14, 128 }
  0x21   : > { %1742 = vmatmul.mubr.msk.f32.gmra.mrb[2].mxu1 %vm441_vm0, %v428_v24 }
  0x23   : > { %2144 = vmatpush3.bf16.xpose.msk.msra.mxu1 %vm2287_vm1, %v2139_v22 }
  0x3d   : > { %2184 = vset.pattern.permute.xlu1 %v2210_v26 }
  0x47   : > { %2183 = vset.pattern.permute.xlu0 %v2210_v26 }
  0x6d   : > { %438 = vperm.xlu1 %2184, %v430_v25  }
  0x77   : > { %433 = vperm.xlu0 %2183, %v429_v27  }
  0x92   : > { %v550_v28 = vpop.trf.xlu0 }
  0x93   : > { %2027 = vmatprep.mubr.msk.f32.mxu1 %vm441_vm0, %v550_v28  ;;  %2083 = vmatprep.mubr.msk.f32.mxu0 %vm441_vm0, %v550_v28  ;;  %v582_v29 = vpop.trf.xlu1 }
  0x96   : > { %v551_v30 = vpop.trf.xlu0 }
  0x97   : > { %2028 = vmatmul.mubr.msk.f32.vlgmr.msra.gmra.mrb[4].mxu1 %vm441_vm0, %v551_v30  ;;  %2084 = vmatmul.mubr.msk.f32.vlgmr.msra.gmra.mrb[0].mxu0 %vm441_vm0, %v551_v30  ;;  %v583_v31 = vpop.trf.xlu1 }
  0x9a   : > { %v552_v32 = vpop.trf.xlu0 }
  0x9b   : > { %2030 = vmatprep.mubr.msk.f32.mxu1 %vm441_vm0, %v552_v32  ;;  %2086 = vmatprep.mubr.msk.f32.mxu0 %vm441_vm0, %v552_v32  ;;  %v584_v34 = vpop.trf.xlu1 }
  0x9e   : > { %v553_v33 = vpop.trf.xlu0 }
  0x9f   : > { %2031 = vmatmul.mubr.msk.f32.gmra.mrb[6].mxu1 %vm441_vm0, %v553_v33  ;;  %2087 = vmatmul.mubr.msk.f32.gmra.mrb[2].mxu0 %vm441_vm0, %v553_v33  ;;  %v585_v36 = vpop.trf.xlu1 }
  0xa2   : > { %v554_v35 = vpop.trf.xlu0 }
  0xa3   : > { %2033 = vmatprep.mubr.msk.f32.mxu1 %vm441_vm0, %v554_v35  ;;  %2089 = vmatprep.mubr.msk.f32.mxu0 %vm441_vm0, %v554_v35  ;;  %v586_v39 = vpop.trf.xlu1 }
  0xa6   : > { %v555_v37 = vpop.trf.xlu0 }
  0xa7   : > { %2034 = vmatmul.mubr.msk.f32.gmra.mrb[8].mxu1 %vm441_vm0, %v555_v37  ;;  %2090 = vmatmul.mubr.msk.f32.gmra.mrb[4].mxu0 %vm441_vm0, %v555_v37  ;;  %v587_v41 = vpop.trf.xlu1 }
  0xaa   : > { %v556_v38 = vpop.trf.xlu0 }
  0xab   : > { %2036 = vmatprep.mubr.msk.f32.mxu1 %vm441_vm0, %v556_v38  ;;  %2092 = vmatprep.mubr.msk.f32.mxu0 %vm441_vm0, %v556_v38  ;;  %v588_v44 = vpop.trf.xlu1 }
  0xae   : > { %v557_v40 = vpop.trf.xlu0 }
  0xaf   : > { %2037 = vmatmul.mubr.msk.f32.gmra.mrb[10].mxu1 %vm441_vm0, %v557_v40  ;;  %2093 = vmatmul.mubr.msk.f32.gmra.mrb[6].mxu0 %vm441_vm0, %v557_v40  ;;  %v589_v46 = vpop.trf.xlu1 }
  0xb2   : > { %v558_v42 = vpop.trf.xlu0 }
  0xb3   : > { %2039 = vmatprep.mubr.msk.f32.mxu1 %vm441_vm0, %v558_v42  ;;  %2095 = vmatprep.mubr.msk.f32.mxu0 %vm441_vm0, %v558_v42  ;;  %v590_v49 = vpop.trf.xlu1 }
  0xb6   : > { %v559_v43 = vpop.trf.xlu0 }
  0xb7   : > { %2040 = vmatmul.mubr.msk.f32.gmra.mrb[12].mxu1 %vm441_vm0, %v559_v43  ;;  %2096 = vmatmul.mubr.msk.f32.gmra.mrb[8].mxu0 %vm441_vm0, %v559_v43  ;;  %v591_v51 = vpop.trf.xlu1 }
  0xba   : > { %v560_v45 = vpop.trf.xlu0 }
  0xbb   : > { %2042 = vmatprep.mubr.msk.f32.mxu1 %vm441_vm0, %v560_v45  ;;  %2098 = vmatprep.mubr.msk.f32.mxu0 %vm441_vm0, %v560_v45  ;;  %v592_v54 = vpop.trf.xlu1 }
  0xbe   : > { %v561_v47 = vpop.trf.xlu0 }
  0xbf   : > { %2043 = vmatmul.mubr.msk.f32.gmra.mrb[14].mxu1 %vm441_vm0, %v561_v47  ;;  %2099 = vmatmul.mubr.msk.f32.gmra.mrb[10].mxu0 %vm441_vm0, %v561_v47  ;;  %v593_v55 = vpop.trf.xlu1 }
  0xc2   : > { %v562_v48 = vpop.trf.xlu0 }
  0xc3   : > { %2045 = vmatprep.mubr.msk.f32.mxu1 %vm441_vm0, %v562_v48  ;;  %2101 = vmatprep.mubr.msk.f32.mxu0 %vm441_vm0, %v562_v48  ;;  %v594_v56 = vpop.trf.xlu1 }
  0xc6   : > { %v563_v50 = vpop.trf.xlu0 }
  0xc7   : > { %2046 = vmatmul.mubr.msk.f32.gmra.mrb[16].mxu1 %vm441_vm0, %v563_v50  ;;  %2102 = vmatmul.mubr.msk.f32.gmra.mrb[12].mxu0 %vm441_vm0, %v563_v50  ;;  %v595_v57 = vpop.trf.xlu1 }
  0xca   : > { %v564_v52 = vpop.trf.xlu0 }
  0xcb   : > { %2048 = vmatprep.mubr.msk.f32.mxu1 %vm441_vm0, %v564_v52  ;;  %2104 = vmatprep.mubr.msk.f32.mxu0 %vm441_vm0, %v564_v52  ;;  %v596_v58 = vpop.trf.xlu1 }
  0xce   : > { %v565_v53 = vpop.trf.xlu0 }
  0xcf   : > { %2049 = vmatmul.mubr.msk.f32.gmra.mrb[18].mxu1 %vm441_vm0, %v565_v53  ;;  %2105 = vmatmul.mubr.msk.f32.gmra.mrb[14].mxu0 %vm441_vm0, %v565_v53  ;;  %v597_v59 = vpop.trf.xlu1 }
  0xd0   : > { %2051 = vmatprep.mubr.msk.f32.mxu1 %vm441_vm0, %v582_v29  ;;  %2107 = vmatprep.mubr.msk.f32.mxu0 %vm441_vm0, %v582_v29 }
  0xd3   : > { %2052 = vmatmul.mubr.msk.f32.gmra.mrb[20].mxu1 %vm441_vm0, %v583_v31  ;;  %2108 = vmatmul.mubr.msk.f32.gmra.mrb[16].mxu0 %vm441_vm0, %v583_v31 }
  0xd4   : > { %2054 = vmatprep.mubr.msk.f32.mxu1 %vm441_vm0, %v584_v34  ;;  %2110 = vmatprep.mubr.msk.f32.mxu0 %vm441_vm0, %v584_v34 }
  0xd7   : > { %2055 = vmatmul.mubr.msk.f32.gmra.mrb[22].mxu1 %vm441_vm0, %v585_v36  ;;  %2111 = vmatmul.mubr.msk.f32.gmra.mrb[18].mxu0 %vm441_vm0, %v585_v36 }
  0xd8   : > { %2057 = vmatprep.mubr.msk.f32.mxu1 %vm441_vm0, %v586_v39  ;;  %2113 = vmatprep.mubr.msk.f32.mxu0 %vm441_vm0, %v586_v39 }
  0xdb   : > { %2058 = vmatmul.mubr.msk.f32.gmra.mrb[24].mxu1 %vm441_vm0, %v587_v41  ;;  %2114 = vmatmul.mubr.msk.f32.gmra.mrb[20].mxu0 %vm441_vm0, %v587_v41 }
  0xdc   : > { %2060 = vmatprep.mubr.msk.f32.mxu1 %vm441_vm0, %v588_v44  ;;  %2116 = vmatprep.mubr.msk.f32.mxu0 %vm441_vm0, %v588_v44 }
  0xdf   : > { %2061 = vmatmul.mubr.msk.f32.gmra.mrb[26].mxu1 %vm441_vm0, %v589_v46  ;;  %2117 = vmatmul.mubr.msk.f32.gmra.mrb[22].mxu0 %vm441_vm0, %v589_v46 }
  0xe0   : > { %2063 = vmatprep.mubr.msk.f32.mxu1 %vm441_vm0, %v590_v49  ;;  %2119 = vmatprep.mubr.msk.f32.mxu0 %vm441_vm0, %v590_v49 }
  0xe3   : > { %2064 = vmatmul.mubr.msk.f32.gmra.mrb[28].mxu1 %vm441_vm0, %v591_v51  ;;  %2120 = vmatmul.mubr.msk.f32.gmra.mrb[24].mxu0 %vm441_vm0, %v591_v51 }
  0xe4   : > { %2066 = vmatprep.mubr.msk.f32.mxu1 %vm441_vm0, %v592_v54  ;;  %2122 = vmatprep.mubr.msk.f32.mxu0 %vm441_vm0, %v592_v54 }
  0xe7   : > { %2067 = vmatmul.mubr.msk.f32.gmra.mrb[30].mxu1 %vm441_vm0, %v593_v55  ;;  %2123 = vmatmul.mubr.msk.f32.gmra.mrb[26].mxu0 %vm441_vm0, %v593_v55 }
  0xe8   : > { %2069 = vmatprep.mubr.msk.f32.mxu1 %vm441_vm0, %v594_v56  ;;  %2125 = vmatprep.mubr.msk.f32.mxu0 %vm441_vm0, %v594_v56 }
  0xeb   : > { %2070 = vmatmul.mubr.msk.f32.gmra.mrb[32].mxu1 %vm441_vm0, %v595_v57  ;;  %2126 = vmatmul.mubr.msk.f32.gmra.mrb[28].mxu0 %vm441_vm0, %v595_v57 }
  0xec   : > { %2072 = vmatprep.mubr.msk.f32.mxu1 %vm441_vm0, %v596_v58  ;;  %2128 = vmatprep.mubr.msk.f32.mxu0 %vm441_vm0, %v596_v58  ;;  %v439_v4 = vpop.permute.xlu1 %438 }
  0xef   : > { %2073 = vmatmul.mubr.msk.f32.gmra.mrb[34].mxu1 %vm441_vm0, %v597_v59  ;;  %2129 = vmatmul.mubr.msk.f32.gmra.mrb[30].mxu0 %vm441_vm0, %v597_v59 }
  0xf0   : > { %v514_v60 = vpop.f32.mrb[0].mxu1 }
  0xf1   : > { %v516_v61 = vpop.f32.mrb[1].mxu1 }
  0xf4   : > { %v520_v62 = vpop.f32.mrb[2].mxu1 }
  0xf5   : > { %v522_v63 = vpop.f32.mrb[3].mxu1  ;;  %v521_v5 = vadd.f32 %v520_v62, %v439_v4 }
  0xf6   : > { %v434_v0 = vpop.permute.xlu0 %433  ;;  %v523_v6 = vadd.f32 %v522_v63, %v439_v4 }
  0xf7   : > { %v515_v1 = vadd.f32 %v514_v60, %v434_v0  ;;  %v517_v2 = vadd.f32 %v516_v61, %v434_v0 }
  0xf8   : > { %v1920_v7 = vpack.c.bf16 %v523_v6, %v521_v5 }
  0xf9   : > { %v1919_v3 = vpack.c.bf16 %v517_v2, %v515_v1 }
  0xfa   : > { %1379 = vst [vmem:[%s407_s23 + $0x8] sm:$0xff] %v1920_v7 }
  0xfb   : > { %1378 = vst [vmem:[%s407_s23] sm:$0xff] %v1919_v3 }
 0x16a   : > { %v2029_v10 = vpop.f32.mrb[4].mxu1  ;;  %v2085_v11 = vpop.f32.mrb[0].mxu0 }
 0x16b   : > { %v772_v12 = vadd.f32 %v2029_v10, %v2406_v8  ;;  %v1020_v13 = vadd.f32 %v2085_v11, %v2411_v9  ;;  %v766_v14 = vpop.f32.mrb[5].mxu1  ;;  %v1014_v15 = vpop.f32.mrb[1].mxu0 }
 0x16c   : > { %v767_v16 = vadd.f32 %v2406_v8, %v766_v14  ;;  %v1015_v17 = vadd.f32 %v2411_v9, %v1014_v15 }
 0x16d   : > { %v1174_v18 = vmul.f32 0.5, %v772_v12  ;;  %v1922_v19 = vpack.c.bf16 %v1020_v13, %v1020_v13 }
 0x16e   : > { %v1173_v20 = vmul.f32 0.5, %v767_v16  ;;  %v1921_v21 = vpack.c.bf16 %v1015_v17, %v1015_v17 }
 0x16f   : > { %v1888_v22 = vpack.c.bf16 %v1174_v18, %v1174_v18  ;;  %1510 = vst.msk [vmem:[%s2419_s14 + $0x4] sm:$0xf] %vm1508_vm2, %v1922_v19 }
 0x170   : > { %v1887_v23 = vpack.c.bf16 %v1173_v20, %v1173_v20  ;;  %1509 = vst.msk [vmem:[%s2419_s14] sm:$0xf] %vm1508_vm2, %v1921_v21 }
 0x171   : > { %1335 = vst.msk [vmem:[%s2426_s16 + $0x4] sm:$0xf] %vm1333_vm3, %v1888_v22 }
 0x172   : > { %1334 = vst.msk [vmem:[%s2426_s16] sm:$0xf] %vm1333_vm3, %v1887_v23  ;;  %v2032_v24 = vpop.f32.mrb[6].mxu1  ;;  %v2088_v25 = vpop.f32.mrb[2].mxu0 }
 0x173   : > { %v782_v26 = vadd.f32 %v2032_v24, %v2406_v8  ;;  %v1030_v27 = vadd.f32 %v2088_v25, %v2411_v9  ;;  %v776_v28 = vpop.f32.mrb[7].mxu1  ;;  %v1024_v29 = vpop.f32.mrb[3].mxu0 }
 0x174   : > { %v777_v30 = vadd.f32 %v2406_v8, %v776_v28  ;;  %v1025_v31 = vadd.f32 %v2411_v9, %v1024_v29 }
 0x175   : > { %v1176_v32 = vmul.f32 0.5, %v782_v26  ;;  %v1924_v33 = vpack.c.bf16 %v1030_v27, %v1030_v27 }
 0x176   : > { %v1175_v34 = vmul.f32 0.5, %v777_v30  ;;  %v1923_v35 = vpack.c.bf16 %v1025_v31, %v1025_v31 }
 0x177   : > { %v1890_v36 = vpack.c.bf16 %v1176_v32, %v1176_v32  ;;  %1512 = vst.msk [vmem:[%s2419_s14 + $0xc] sm:$0xf] %vm1508_vm2, %v1924_v33 }
 0x178   : > { %v1889_v37 = vpack.c.bf16 %v1175_v34, %v1175_v34  ;;  %1511 = vst.msk [vmem:[%s2419_s14 + $0x8] sm:$0xf] %vm1508_vm2, %v1923_v35 }
 0x179   : > { %1337 = vst.msk [vmem:[%s2426_s16 + $0xc] sm:$0xf] %vm1333_vm3, %v1890_v36 }
 0x17a   : > { %1336 = vst.msk [vmem:[%s2426_s16 + $0x8] sm:$0xf] %vm1333_vm3, %v1889_v37  ;;  %v2035_v38 = vpop.f32.mrb[8].mxu1  ;;  %v2091_v39 = vpop.f32.mrb[4].mxu0 }
 0x17b   : > { %v792_v40 = vadd.f32 %v2035_v38, %v2406_v8  ;;  %v1040_v41 = vadd.f32 %v2091_v39, %v2411_v9  ;;  %v786_v42 = vpop.f32.mrb[9].mxu1  ;;  %v1034_v43 = vpop.f32.mrb[5].mxu0 }
 0x17c   : > { %v787_v44 = vadd.f32 %v2406_v8, %v786_v42  ;;  %v1035_v45 = vadd.f32 %v2411_v9, %v1034_v43 }
 0x17d   : > { %v1178_v46 = vmul.f32 0.5, %v792_v40  ;;  %v1926_v47 = vpack.c.bf16 %v1040_v41, %v1040_v41 }
 0x17e   : > { %v1177_v48 = vmul.f32 0.5, %v787_v44  ;;  %v1925_v49 = vpack.c.bf16 %v1035_v45, %v1035_v45 }
 0x17f   : > { %v1892_v50 = vpack.c.bf16 %v1178_v46, %v1178_v46  ;;  %1514 = vst.msk [vmem:[%s2419_s14 + $0x14] sm:$0xf] %vm1508_vm2, %v1926_v47 }
 0x180   : > { %v1891_v51 = vpack.c.bf16 %v1177_v48, %v1177_v48  ;;  %1513 = vst.msk [vmem:[%s2419_s14 + $0x10] sm:$0xf] %vm1508_vm2, %v1925_v49 }
 0x181   : > { %1339 = vst.msk [vmem:[%s2426_s16 + $0x14] sm:$0xf] %vm1333_vm3, %v1892_v50 }
 0x182   : > { %1338 = vst.msk [vmem:[%s2426_s16 + $0x10] sm:$0xf] %vm1333_vm3, %v1891_v51  ;;  %v2038_v52 = vpop.f32.mrb[10].mxu1  ;;  %v2094_v53 = vpop.f32.mrb[6].mxu0 }
 0x183   : > { %v802_v54 = vadd.f32 %v2038_v52, %v2406_v8  ;;  %v1050_v55 = vadd.f32 %v2094_v53, %v2411_v9  ;;  %v796_v56 = vpop.f32.mrb[11].mxu1  ;;  %v1044_v57 = vpop.f32.mrb[7].mxu0 }
 0x184   : > { %v797_v58 = vadd.f32 %v2406_v8, %v796_v56  ;;  %v1045_v59 = vadd.f32 %v2411_v9, %v1044_v57 }
 0x185   : > { %v1180_v60 = vmul.f32 0.5, %v802_v54  ;;  %v1928_v61 = vpack.c.bf16 %v1050_v55, %v1050_v55 }
 0x186   : > { %v1179_v62 = vmul.f32 0.5, %v797_v58  ;;  %v1927_v63 = vpack.c.bf16 %v1045_v59, %v1045_v59 }
 0x187   : > { %v1894_v0 = vpack.c.bf16 %v1180_v60, %v1180_v60  ;;  %1516 = vst.msk [vmem:[%s2419_s14 + $0x1c] sm:$0xf] %vm1508_vm2, %v1928_v61 }
 0x188   : > { %v1893_v1 = vpack.c.bf16 %v1179_v62, %v1179_v62  ;;  %1515 = vst.msk [vmem:[%s2419_s14 + $0x18] sm:$0xf] %vm1508_vm2, %v1927_v63 }
 0x189   : > { %1341 = vst.msk [vmem:[%s2426_s16 + $0x1c] sm:$0xf] %vm1333_vm3, %v1894_v0 }
 0x18a   : > { %1340 = vst.msk [vmem:[%s2426_s16 + $0x18] sm:$0xf] %vm1333_vm3, %v1893_v1  ;;  %v2041_v2 = vpop.f32.mrb[12].mxu1  ;;  %v2097_v3 = vpop.f32.mrb[8].mxu0 }
 0x18b   : > { %v812_v4 = vadd.f32 %v2041_v2, %v2406_v8  ;;  %v1060_v5 = vadd.f32 %v2097_v3, %v2411_v9  ;;  %v806_v6 = vpop.f32.mrb[13].mxu1  ;;  %v1054_v7 = vpop.f32.mrb[9].mxu0 }
 0x18c   : > { %v807_v10 = vadd.f32 %v2406_v8, %v806_v6  ;;  %v1055_v11 = vadd.f32 %v2411_v9, %v1054_v7 }
 0x18d   : > { %v1182_v12 = vmul.f32 0.5, %v812_v4  ;;  %v1930_v13 = vpack.c.bf16 %v1060_v5, %v1060_v5 }
 0x18e   : > { %v1181_v14 = vmul.f32 0.5, %v807_v10  ;;  %v1929_v15 = vpack.c.bf16 %v1055_v11, %v1055_v11 }
 0x18f   : > { %v1896_v16 = vpack.c.bf16 %v1182_v12, %v1182_v12  ;;  %1518 = vst.msk [vmem:[%s2419_s14 + $0x24] sm:$0xf] %vm1508_vm2, %v1930_v13 }
 0x190   : > { %v1895_v17 = vpack.c.bf16 %v1181_v14, %v1181_v14  ;;  %1517 = vst.msk [vmem:[%s2419_s14 + $0x20] sm:$0xf] %vm1508_vm2, %v1929_v15 }
 0x191   : > { %1343 = vst.msk [vmem:[%s2426_s16 + $0x24] sm:$0xf] %vm1333_vm3, %v1896_v16 }
 0x192   : > { %1342 = vst.msk [vmem:[%s2426_s16 + $0x20] sm:$0xf] %vm1333_vm3, %v1895_v17  ;;  %v2044_v18 = vpop.f32.mrb[14].mxu1  ;;  %v2100_v19 = vpop.f32.mrb[10].mxu0 }
 0x193   : > { %v822_v20 = vadd.f32 %v2044_v18, %v2406_v8  ;;  %v1070_v21 = vadd.f32 %v2100_v19, %v2411_v9  ;;  %v816_v22 = vpop.f32.mrb[15].mxu1  ;;  %v1064_v23 = vpop.f32.mrb[11].mxu0 }
 0x194   : > { %v817_v24 = vadd.f32 %v2406_v8, %v816_v22  ;;  %v1065_v25 = vadd.f32 %v2411_v9, %v1064_v23 }
 0x195   : > { %v1184_v26 = vmul.f32 0.5, %v822_v20  ;;  %v1932_v27 = vpack.c.bf16 %v1070_v21, %v1070_v21 }
 0x196   : > { %v1183_v28 = vmul.f32 0.5, %v817_v24  ;;  %v1931_v29 = vpack.c.bf16 %v1065_v25, %v1065_v25 }
 0x197   : > { %v1898_v30 = vpack.c.bf16 %v1184_v26, %v1184_v26  ;;  %1520 = vst.msk [vmem:[%s2419_s14 + $0x2c] sm:$0xf] %vm1508_vm2, %v1932_v27 }
 0x198   : > { %v1897_v31 = vpack.c.bf16 %v1183_v28, %v1183_v28  ;;  %1519 = vst.msk [vmem:[%s2419_s14 + $0x28] sm:$0xf] %vm1508_vm2, %v1931_v29 }
 0x199   : > { %1345 = vst.msk [vmem:[%s2426_s16 + $0x2c] sm:$0xf] %vm1333_vm3, %v1898_v30 }
 0x19a   : > { %1344 = vst.msk [vmem:[%s2426_s16 + $0x28] sm:$0xf] %vm1333_vm3, %v1897_v31  ;;  %v2047_v32 = vpop.f32.mrb[16].mxu1  ;;  %v2103_v33 = vpop.f32.mrb[12].mxu0 }
 0x19b   : > { %v832_v34 = vadd.f32 %v2047_v32, %v2406_v8  ;;  %v1080_v35 = vadd.f32 %v2103_v33, %v2411_v9  ;;  %v826_v36 = vpop.f32.mrb[17].mxu1  ;;  %v1074_v37 = vpop.f32.mrb[13].mxu0 }
 0x19c   : > { %v827_v38 = vadd.f32 %v2406_v8, %v826_v36  ;;  %v1075_v39 = vadd.f32 %v2411_v9, %v1074_v37 }
 0x19d   : > { %v1186_v40 = vmul.f32 0.5, %v832_v34  ;;  %v1934_v41 = vpack.c.bf16 %v1080_v35, %v1080_v35 }
 0x19e   : > { %v1185_v42 = vmul.f32 0.5, %v827_v38  ;;  %v1933_v43 = vpack.c.bf16 %v1075_v39, %v1075_v39 }
 0x19f   : > { %v1900_v44 = vpack.c.bf16 %v1186_v40, %v1186_v40  ;;  %1522 = vst.msk [vmem:[%s2419_s14 + $0x34] sm:$0xf] %vm1508_vm2, %v1934_v41 }
 0x1a0   : > { %v1899_v45 = vpack.c.bf16 %v1185_v42, %v1185_v42  ;;  %1521 = vst.msk [vmem:[%s2419_s14 + $0x30] sm:$0xf] %vm1508_vm2, %v1933_v43 }
 0x1a1   : > { %1347 = vst.msk [vmem:[%s2426_s16 + $0x34] sm:$0xf] %vm1333_vm3, %v1900_v44 }
 0x1a2   : > { %1346 = vst.msk [vmem:[%s2426_s16 + $0x30] sm:$0xf] %vm1333_vm3, %v1899_v45  ;;  %v2050_v46 = vpop.f32.mrb[18].mxu1  ;;  %v2106_v47 = vpop.f32.mrb[14].mxu0 }
 0x1a3   : > { %v842_v48 = vadd.f32 %v2050_v46, %v2406_v8  ;;  %v1090_v49 = vadd.f32 %v2106_v47, %v2411_v9  ;;  %v836_v50 = vpop.f32.mrb[19].mxu1  ;;  %v1084_v51 = vpop.f32.mrb[15].mxu0 }
 0x1a4   : > { %v837_v52 = vadd.f32 %v2406_v8, %v836_v50  ;;  %v1085_v53 = vadd.f32 %v2411_v9, %v1084_v51 }
 0x1a5   : > { %v1188_v54 = vmul.f32 0.5, %v842_v48  ;;  %v1936_v55 = vpack.c.bf16 %v1090_v49, %v1090_v49 }
 0x1a6   : > { %v1187_v56 = vmul.f32 0.5, %v837_v52  ;;  %v1935_v57 = vpack.c.bf16 %v1085_v53, %v1085_v53  ;;  %v2053_v58 = vpop.f32.mrb[20].mxu1  ;;  %v2109_v59 = vpop.f32.mrb[16].mxu0 }
 0x1a7   : > { %v1902_v60 = vpack.c.bf16 %v1188_v54, %v1188_v54  ;;  %1524 = vst.msk [vmem:[%s2419_s14 + $0x3c] sm:$0xf] %vm1508_vm2, %v1936_v55  ;;  %v852_v61 = vadd.f32 %v2053_v58, %v2406_v8  ;;  %v1100_v62 = vadd.f32 %v2109_v59, %v2411_v9  ;;  %v846_v63 = vpop.f32.mrb[21].mxu1  ;;  %v1094_v0 = vpop.f32.mrb[17].mxu0 }
 0x1a8   : > { %v1901_v1 = vpack.c.bf16 %v1187_v56, %v1187_v56  ;;  %1523 = vst.msk [vmem:[%s2419_s14 + $0x38] sm:$0xf] %vm1508_vm2, %v1935_v57  ;;  %v847_v2 = vadd.f32 %v2406_v8, %v846_v63  ;;  %v1095_v3 = vadd.f32 %v2411_v9, %v1094_v0 }
 0x1a9   : > { %1349 = vst.msk [vmem:[%s2426_s16 + $0x3c] sm:$0xf] %vm1333_vm3, %v1902_v60  ;;  %v1190_v4 = vmul.f32 0.5, %v852_v61  ;;  %v1938_v5 = vpack.c.bf16 %v1100_v62, %v1100_v62 }
 0x1aa   : > { %1348 = vst.msk [vmem:[%s2426_s16 + $0x38] sm:$0xf] %vm1333_vm3, %v1901_v1  ;;  %v1189_v6 = vmul.f32 0.5, %v847_v2  ;;  %v1937_v7 = vpack.c.bf16 %v1095_v3, %v1095_v3  ;;  %v2056_v10 = vpop.f32.mrb[22].mxu1  ;;  %v2112_v11 = vpop.f32.mrb[18].mxu0 }
 0x1ab   : > { %v1904_v12 = vpack.c.bf16 %v1190_v4, %v1190_v4  ;;  %1526 = vst.msk [vmem:[%s2419_s14 + $0x44] sm:$0xf] %vm1508_vm2, %v1938_v5  ;;  %v862_v13 = vadd.f32 %v2056_v10, %v2406_v8  ;;  %v1110_v14 = vadd.f32 %v2112_v11, %v2411_v9  ;;  %v856_v15 = vpop.f32.mrb[23].mxu1  ;;  %v1104_v16 = vpop.f32.mrb[19].mxu0 }
 0x1ac   : > { %v1903_v17 = vpack.c.bf16 %v1189_v6, %v1189_v6  ;;  %1525 = vst.msk [vmem:[%s2419_s14 + $0x40] sm:$0xf] %vm1508_vm2, %v1937_v7  ;;  %v857_v18 = vadd.f32 %v2406_v8, %v856_v15  ;;  %v1105_v19 = vadd.f32 %v2411_v9, %v1104_v16 }
 0x1ad   : > { %1351 = vst.msk [vmem:[%s2426_s16 + $0x44] sm:$0xf] %vm1333_vm3, %v1904_v12  ;;  %v1192_v20 = vmul.f32 0.5, %v862_v13  ;;  %v1940_v21 = vpack.c.bf16 %v1110_v14, %v1110_v14 }
 0x1ae   : > { %1350 = vst.msk [vmem:[%s2426_s16 + $0x40] sm:$0xf] %vm1333_vm3, %v1903_v17  ;;  %v1191_v22 = vmul.f32 0.5, %v857_v18  ;;  %v1939_v23 = vpack.c.bf16 %v1105_v19, %v1105_v19  ;;  %v2059_v24 = vpop.f32.mrb[24].mxu1  ;;  %v2115_v25 = vpop.f32.mrb[20].mxu0 }
 0x1af   : > { %v1906_v26 = vpack.c.bf16 %v1192_v20, %v1192_v20  ;;  %1528 = vst.msk [vmem:[%s2419_s14 + $0x4c] sm:$0xf] %vm1508_vm2, %v1940_v21  ;;  %v872_v27 = vadd.f32 %v2059_v24, %v2406_v8  ;;  %v1120_v28 = vadd.f32 %v2115_v25, %v2411_v9  ;;  %v866_v29 = vpop.f32.mrb[25].mxu1  ;;  %v1114_v30 = vpop.f32.mrb[21].mxu0 }
 0x1b0   : > { %v1905_v31 = vpack.c.bf16 %v1191_v22, %v1191_v22  ;;  %1527 = vst.msk [vmem:[%s2419_s14 + $0x48] sm:$0xf] %vm1508_vm2, %v1939_v23  ;;  %v867_v32 = vadd.f32 %v2406_v8, %v866_v29  ;;  %v1115_v33 = vadd.f32 %v2411_v9, %v1114_v30 }
 0x1b1   : > { %1353 = vst.msk [vmem:[%s2426_s16 + $0x4c] sm:$0xf] %vm1333_vm3, %v1906_v26  ;;  %v1194_v34 = vmul.f32 0.5, %v872_v27  ;;  %v1942_v35 = vpack.c.bf16 %v1120_v28, %v1120_v28 }
 0x1b2   : > { %1352 = vst.msk [vmem:[%s2426_s16 + $0x48] sm:$0xf] %vm1333_vm3, %v1905_v31  ;;  %v1193_v36 = vmul.f32 0.5, %v867_v32  ;;  %v1941_v37 = vpack.c.bf16 %v1115_v33, %v1115_v33  ;;  %v2062_v38 = vpop.f32.mrb[26].mxu1  ;;  %v2118_v39 = vpop.f32.mrb[22].mxu0 }
 0x1b3   : > { %v1908_v40 = vpack.c.bf16 %v1194_v34, %v1194_v34  ;;  %1530 = vst.msk [vmem:[%s2419_s14 + $0x54] sm:$0xf] %vm1508_vm2, %v1942_v35  ;;  %v882_v41 = vadd.f32 %v2062_v38, %v2406_v8  ;;  %v1130_v42 = vadd.f32 %v2118_v39, %v2411_v9  ;;  %v876_v43 = vpop.f32.mrb[27].mxu1  ;;  %v1124_v44 = vpop.f32.mrb[23].mxu0 }
 0x1b4   : > { %v1907_v45 = vpack.c.bf16 %v1193_v36, %v1193_v36  ;;  %1529 = vst.msk [vmem:[%s2419_s14 + $0x50] sm:$0xf] %vm1508_vm2, %v1941_v37  ;;  %v877_v46 = vadd.f32 %v2406_v8, %v876_v43  ;;  %v1125_v47 = vadd.f32 %v2411_v9, %v1124_v44 }
 0x1b5   : > { %1355 = vst.msk [vmem:[%s2426_s16 + $0x54] sm:$0xf] %vm1333_vm3, %v1908_v40  ;;  %v1196_v48 = vmul.f32 0.5, %v882_v41  ;;  %v1944_v49 = vpack.c.bf16 %v1130_v42, %v1130_v42 }
 0x1b6   : > { %1354 = vst.msk [vmem:[%s2426_s16 + $0x50] sm:$0xf] %vm1333_vm3, %v1907_v45  ;;  %v1195_v50 = vmul.f32 0.5, %v877_v46  ;;  %v1943_v51 = vpack.c.bf16 %v1125_v47, %v1125_v47  ;;  %v2065_v52 = vpop.f32.mrb[28].mxu1  ;;  %v2121_v53 = vpop.f32.mrb[24].mxu0 }
 0x1b7   : > { %v1910_v54 = vpack.c.bf16 %v1196_v48, %v1196_v48  ;;  %1532 = vst.msk [vmem:[%s2419_s14 + $0x5c] sm:$0xf] %vm1508_vm2, %v1944_v49  ;;  %v892_v55 = vadd.f32 %v2065_v52, %v2406_v8  ;;  %v1140_v56 = vadd.f32 %v2121_v53, %v2411_v9  ;;  %v886_v57 = vpop.f32.mrb[29].mxu1  ;;  %v1134_v58 = vpop.f32.mrb[25].mxu0 }
 0x1b8   : > { %v1909_v59 = vpack.c.bf16 %v1195_v50, %v1195_v50  ;;  %1531 = vst.msk [vmem:[%s2419_s14 + $0x58] sm:$0xf] %vm1508_vm2, %v1943_v51  ;;  %v887_v60 = vadd.f32 %v2406_v8, %v886_v57  ;;  %v1135_v61 = vadd.f32 %v2411_v9, %v1134_v58 }
 0x1b9   : > { %1357 = vst.msk [vmem:[%s2426_s16 + $0x5c] sm:$0xf] %vm1333_vm3, %v1910_v54  ;;  %v1198_v62 = vmul.f32 0.5, %v892_v55  ;;  %v1946_v63 = vpack.c.bf16 %v1140_v56, %v1140_v56 }
 0x1ba   : > { %1356 = vst.msk [vmem:[%s2426_s16 + $0x58] sm:$0xf] %vm1333_vm3, %v1909_v59  ;;  %v1197_v0 = vmul.f32 0.5, %v887_v60  ;;  %v1945_v1 = vpack.c.bf16 %v1135_v61, %v1135_v61  ;;  %v2068_v2 = vpop.f32.mrb[30].mxu1  ;;  %v2124_v3 = vpop.f32.mrb[26].mxu0 }
 0x1bb   : > { %v1912_v4 = vpack.c.bf16 %v1198_v62, %v1198_v62  ;;  %1534 = vst.msk [vmem:[%s2419_s14 + $0x64] sm:$0xf] %vm1508_vm2, %v1946_v63  ;;  %v902_v5 = vadd.f32 %v2068_v2, %v2406_v8  ;;  %v1150_v6 = vadd.f32 %v2124_v3, %v2411_v9  ;;  %v896_v7 = vpop.f32.mrb[31].mxu1  ;;  %v1144_v10 = vpop.f32.mrb[27].mxu0 }
 0x1bc   : > { %v1911_v11 = vpack.c.bf16 %v1197_v0, %v1197_v0  ;;  %1533 = vst.msk [vmem:[%s2419_s14 + $0x60] sm:$0xf] %vm1508_vm2, %v1945_v1  ;;  %v897_v12 = vadd.f32 %v2406_v8, %v896_v7  ;;  %v1145_v13 = vadd.f32 %v2411_v9, %v1144_v10 }
 0x1bd   : > { %1359 = vst.msk [vmem:[%s2426_s16 + $0x64] sm:$0xf] %vm1333_vm3, %v1912_v4  ;;  %v1200_v14 = vmul.f32 0.5, %v902_v5  ;;  %v1948_v15 = vpack.c.bf16 %v1150_v6, %v1150_v6 }
 0x1be   : > { %1358 = vst.msk [vmem:[%s2426_s16 + $0x60] sm:$0xf] %vm1333_vm3, %v1911_v11  ;;  %v1199_v16 = vmul.f32 0.5, %v897_v12  ;;  %v1947_v17 = vpack.c.bf16 %v1145_v13, %v1145_v13  ;;  %v2071_v18 = vpop.f32.mrb[32].mxu1  ;;  %v2127_v19 = vpop.f32.mrb[28].mxu0 }
 0x1bf   : > { %v1914_v20 = vpack.c.bf16 %v1200_v14, %v1200_v14  ;;  %1536 = vst.msk [vmem:[%s2419_s14 + $0x6c] sm:$0xf] %vm1508_vm2, %v1948_v15  ;;  %v912_v21 = vadd.f32 %v2071_v18, %v2406_v8  ;;  %v1160_v22 = vadd.f32 %v2127_v19, %v2411_v9  ;;  %v906_v23 = vpop.f32.mrb[33].mxu1  ;;  %v1154_v24 = vpop.f32.mrb[29].mxu0 }
 0x1c0   : > { %v1913_v25 = vpack.c.bf16 %v1199_v16, %v1199_v16  ;;  %1535 = vst.msk [vmem:[%s2419_s14 + $0x68] sm:$0xf] %vm1508_vm2, %v1947_v17  ;;  %v907_v26 = vadd.f32 %v2406_v8, %v906_v23  ;;  %v1155_v27 = vadd.f32 %v2411_v9, %v1154_v24 }
 0x1c1   : > { %1361 = vst.msk [vmem:[%s2426_s16 + $0x6c] sm:$0xf] %vm1333_vm3, %v1914_v20  ;;  %v1202_v28 = vmul.f32 0.5, %v912_v21  ;;  %v1950_v29 = vpack.c.bf16 %v1160_v22, %v1160_v22 }
 0x1c2   : > { %1360 = vst.msk [vmem:[%s2426_s16 + $0x68] sm:$0xf] %vm1333_vm3, %v1913_v25  ;;  %v1201_v30 = vmul.f32 0.5, %v907_v26  ;;  %v1949_v31 = vpack.c.bf16 %v1155_v27, %v1155_v27  ;;  %v2074_v32 = vpop.f32.mrb[34].mxu1  ;;  %v2130_v33 = vpop.f32.mrb[30].mxu0 }
 0x1c3   : > { %v1916_v34 = vpack.c.bf16 %v1202_v28, %v1202_v28  ;;  %1538 = vst.msk [vmem:[%s2419_s14 + $0x74] sm:$0xf] %vm1508_vm2, %v1950_v29  ;;  %v922_v35 = vadd.f32 %v2074_v32, %v2406_v8  ;;  %v1170_v36 = vadd.f32 %v2130_v33, %v2411_v9  ;;  %v916_v37 = vpop.f32.mrb[35].mxu1  ;;  %v1164_v38 = vpop.f32.mrb[31].mxu0 }
 0x1c4   : > { %v1915_v39 = vpack.c.bf16 %v1201_v30, %v1201_v30  ;;  %1537 = vst.msk [vmem:[%s2419_s14 + $0x70] sm:$0xf] %vm1508_vm2, %v1949_v31  ;;  %v917_v40 = vadd.f32 %v2406_v8, %v916_v37  ;;  %v1165_v41 = vadd.f32 %v2411_v9, %v1164_v38 }
 0x1c5   : > { %1363 = vst.msk [vmem:[%s2426_s16 + $0x74] sm:$0xf] %vm1333_vm3, %v1916_v34  ;;  %v1204_v42 = vmul.f32 0.5, %v922_v35  ;;  %v1952_v43 = vpack.c.bf16 %v1170_v36, %v1170_v36 }
 0x1c6   : > { %1362 = vst.msk [vmem:[%s2426_s16 + $0x70] sm:$0xf] %vm1333_vm3, %v1915_v39  ;;  %v1203_v44 = vmul.f32 0.5, %v917_v40  ;;  %v1951_v45 = vpack.c.bf16 %v1165_v41, %v1165_v41 }
 0x1c7   : > { %v1918_v46 = vpack.c.bf16 %v1204_v42, %v1204_v42  ;;  %1540 = vst.msk [vmem:[%s2419_s14 + $0x7c] sm:$0xf] %vm1508_vm2, %v1952_v43 }
 0x1c8   : > { %v1917_v47 = vpack.c.bf16 %v1203_v44, %v1203_v44  ;;  %1539 = vst.msk [vmem:[%s2419_s14 + $0x78] sm:$0xf] %vm1508_vm2, %v1951_v45 }
 0x1c9   : > { %1365 = vst.msk [vmem:[%s2426_s16 + $0x7c] sm:$0xf] %vm1333_vm3, %v1918_v46 }
 0x1ca   : > { %1364 = vst.msk [vmem:[%s2426_s16 + $0x78] sm:$0xf] %vm1333_vm3, %v1917_v47 }
 0x1cb PF: > { %s20_s11 = sadd.s32 1, %s2207_s11   ;;  %s2637_s30 = smov %s2203_s10 }
 0x1cc   : > { %p17_p5 = scmp.ge.s32.totalorder %s20_s11, 4   ;;  %s2638_s10 = smov %s2640_s12 }
 0x1ce   :  { %19 = sbr.rel (!%p17_p5) target bundleno = 2 (0x2), region = 102 }

// kernel: self_attention.3
= control target key start
LH: loop header
LB: loop body
LE: loop exit
PB: predicated region body
PF: predicated region fallthrough
CT: control target
= control target key end

     0   :  { %s3437_s20 = smov 0   ;;  %s3439_s21 = smov 0   ;;  %s4703_s0 = inlined_call_operand.vmem [shape: f32[2,32,256], index: 0, kind: input, shape index: {}]   ;;  %s4704_s1 = inlined_call_operand.vmem [shape: bf16[2,256,16], index: 1, kind: input, shape index: {}]   ;;  %s4705_s2 = inlined_call_operand.vmem [shape: bf16[2,16,256], index: 2, kind: input, shape index: {}]   ;;  %s4706_s3 = inlined_call_operand.vmem [shape: bf16[2,256,32], index: 3, kind: input, shape index: {}]   ;;  %s4707_s4 = inlined_call_operand.<no memory space> [shape: f32[1], index: 4, kind: input, shape index: {}]   ;;  %s4708_s5 = inlined_call_operand.vmem [shape: f32[2,32,256], index: 5, kind: output, shape index: {}]  }
   0x1   :  { %10 = sst [smem:[#allocation5]] %s4707_s4  ;;  %s3441_s22 = smov 0  }
   0x2 LB: > { %s35_s4 = sadd.s32 1, %s3395_s21  ;;  %p2861_p0 = scmp.ge.s32.totalorder %s3399_s22, 1  ;;  %s3399_s22 = sphi %s3441_s22, %s16_s22   ;;  %s3395_s21 = sphi %s3439_s21, %s4933_s21   ;;  %s3391_s20 = sphi %s3437_s20, %s4932_s20  }
   0x3   : > { %p37_p1 = scmp.ge.s32.totalorder %s35_s4, 2  ;;  %p267_p2 = scmp.lt.s32.totalorder %s3399_s22, 3 }
   0x5   : > { %s4935_s4 = smov (%p37_p1, %s35_s4), 0  ;;  %p268_p3 = pnand %p2861_p0, %p267_p2 }
   0x7   : > { %271 = sbr.rel (%p268_p3) target bundleno = 1062 (0x426), region = 40 }
   0xe   : > { %p331_p4 = scmp.lt.s32.totalorder %s3391_s20, 1  ;;  %v3401_v0 = vmov 0   ;;  %vm607_vm0 = vcmask 130048   ;;  %vm385_vm1 = vcmask 7168   ;;  %v3402_v19 = vmov -inf   ;;  %s2623_s9 = sld [smem:[#allocation5]] }
   0xf   : > { %688 = vmatprep.mubr.bf16.mxu0 %v3401_v0  ;;  %3084 = vset.pattern.permute.xlu0 %v3401_v0  ;;  %386 = vst.msk [vmem:[#allocation2] sm:$0xff] %vm385_vm1, %v3402_v19  ;;  %387 = vst.msk [vmem:[#allocation2 + $0x8] sm:$0xff] %vm385_vm1, %v3402_v19  ;;  %v4709_v44 = vmov 0.0   ;;  %vm450_vm2 = vcmask 261120  }
  0x10   : > { %s4937_s20 = smov (!%p331_p4, %s3391_s20), 1  ;;  %3085 = vset.pattern.permute.xlu1 %v3401_v0  ;;  %388 = vst.msk [vmem:[#allocation2 + $0x10] sm:$0xff] %vm385_vm1, %v3402_v19  ;;  %389 = vst.msk [vmem:[#allocation2 + $0x18] sm:$0xff] %vm385_vm1, %v3402_v19 }
  0x11   : > { %s2925_s23 = sshll.u32 %s4937_s20, 7  ;;  %s2926_s27 = sshll.u32 %s4937_s20, 4  ;;  %390 = vst.msk [vmem:[#allocation2 + $0x20] sm:$0xff] %vm385_vm1, %v3402_v19  ;;  %391 = vst.msk [vmem:[#allocation2 + $0x28] sm:$0xff] %vm385_vm1, %v3402_v19 }
  0x12   : > { %s3461_s26 = scalar_lea.vmem %s4704_s1, %s2925_s23  ;;  %s358_s30 = scalar_lea.vmem %s4705_s2, %s2926_s27  ;;  %392 = vst.msk [vmem:[#allocation2 + $0x30] sm:$0xff] %vm385_vm1, %v3402_v19  ;;  %393 = vst.msk [vmem:[#allocation2 + $0x38] sm:$0xff] %vm385_vm1, %v3402_v19 }
  0x13   : > { %v3086_v1 = vld [vmem:[%s358_s30 + $0x4] ss:$8 sps:$4 sm:$0xff]   ;;  %v3088_v2 = vld [vmem:[%s358_s30] ss:$8 sps:$4 sm:$0xff]   ;;  %s3473_s8 = scalar_lea.vmem %s4706_s3, %s2925_s23  ;;  %v3091_v5 = vld [vmem:[%s3461_s26 + $0x10] sm:$0xff]   ;;  %394 = vst.msk [vmem:[#allocation2 + $0x40] sm:$0xff] %vm385_vm1, %v3402_v19 }
  0x14   : > { %656 = vmatprep.subr.bf16.mxu0 %v3086_v1  ;;  %v3089_v3 = vld [vmem:[%s3461_s26] sm:$0xff]   ;;  %v3090_v4 = vld [vmem:[%s3461_s26 + $0x8] sm:$0xff]   ;;  %v3092_v6 = vld [vmem:[%s3461_s26 + $0x18] sm:$0xff]   ;;  %395 = vst.msk [vmem:[#allocation2 + $0x48] sm:$0xff] %vm385_vm1, %v3402_v19  ;;  %s2924_s10 = sshll.u32 %s4937_s20, 6 }
  0x15   : > { %657 = vmatpush1.bf16.msra.mxu0 %v3088_v2  ;;  %v3093_v7 = vld [vmem:[%s3461_s26 + $0x20] sm:$0xff]   ;;  %v3094_v8 = vld [vmem:[%s3461_s26 + $0x28] sm:$0xff]   ;;  %v3095_v9 = vld [vmem:[%s3461_s26 + $0x30] sm:$0xff]   ;;  %396 = vst.msk [vmem:[#allocation2 + $0x50] sm:$0xff] %vm385_vm1, %v3402_v19  ;;  %s4671_s13 = scalar_lea.vmem %s4703_s0, %s2924_s10  ;;  %s4677_s16 = scalar_lea.vmem %s4708_s5, %s2924_s10 }
  0x16   : > { %v3096_v10 = vld [vmem:[%s3461_s26 + $0x38] sm:$0xff]   ;;  %v3097_v11 = vld [vmem:[%s3461_s26 + $0x40] sm:$0xff]   ;;  %v3098_v12 = vld [vmem:[%s3461_s26 + $0x48] sm:$0xff]   ;;  %397 = vst.msk [vmem:[#allocation2 + $0x58] sm:$0xff] %vm385_vm1, %v3402_v19 }
  0x17   : > { %v3099_v13 = vld [vmem:[%s3461_s26 + $0x50] sm:$0xff]   ;;  %v3100_v14 = vld [vmem:[%s3461_s26 + $0x58] sm:$0xff]   ;;  %v3101_v15 = vld [vmem:[%s3461_s26 + $0x60] sm:$0xff]   ;;  %398 = vst.msk [vmem:[#allocation2 + $0x60] sm:$0xff] %vm385_vm1, %v3402_v19 }
  0x18   : > { %2890 = vmatmul.mubr.msk.bf16.vlgmr.msra.gmra.mrb[0].mxu0 %vm607_vm0, %v3089_v3  ;;  %v3102_v16 = vld [vmem:[%s3461_s26 + $0x68] sm:$0xff]   ;;  %v3103_v17 = vld [vmem:[%s3461_s26 + $0x70] sm:$0xff]   ;;  %v3104_v18 = vld [vmem:[%s3461_s26 + $0x78] sm:$0xff]   ;;  %399 = vst.msk [vmem:[#allocation2 + $0x68] sm:$0xff] %vm385_vm1, %v3402_v19 }
  0x19   : > { %698 = vmatprep.mubr.bf16.mxu0 %v3401_v0  ;;  %400 = vst.msk [vmem:[#allocation2 + $0x70] sm:$0xff] %vm385_vm1, %v3402_v19  ;;  %401 = vst.msk [vmem:[#allocation2 + $0x78] sm:$0xff] %vm385_vm1, %v3402_v19 }
  0x1a   : > { %402 = vst.msk [vmem:[#allocation2 + $0x80] sm:$0xff] %vm385_vm1, %v3402_v19  ;;  %403 = vst.msk [vmem:[#allocation2 + $0x88] sm:$0xff] %vm385_vm1, %v3402_v19 }
  0x1b   : > { %404 = vst.msk [vmem:[#allocation2 + $0x90] sm:$0xff] %vm385_vm1, %v3402_v19  ;;  %405 = vst.msk [vmem:[#allocation2 + $0x98] sm:$0xff] %vm385_vm1, %v3402_v19 }
  0x1c   : > { %406 = vst.msk [vmem:[#allocation2 + $0xa0] sm:$0xff] %vm385_vm1, %v3402_v19  ;;  %407 = vst.msk [vmem:[#allocation2 + $0xa8] sm:$0xff] %vm385_vm1, %v3402_v19 }
  0x1d   : > { %408 = vst.msk [vmem:[#allocation2 + $0xb0] sm:$0xff] %vm385_vm1, %v3402_v19  ;;  %409 = vst.msk [vmem:[#allocation2 + $0xb8] sm:$0xff] %vm385_vm1, %v3402_v19 }
  0x1e   : > { %410 = vst.msk [vmem:[#allocation2 + $0xc0] sm:$0xff] %vm385_vm1, %v3402_v19  ;;  %411 = vst.msk [vmem:[#allocation2 + $0xc8] sm:$0xff] %vm385_vm1, %v3402_v19 }
  0x1f   : > { %412 = vst.msk [vmem:[#allocation2 + $0xd0] sm:$0xff] %vm385_vm1, %v3402_v19  ;;  %413 = vst.msk [vmem:[#allocation2 + $0xd8] sm:$0xff] %vm385_vm1, %v3402_v19 }
  0x20   : > { %2891 = vmatmul.mubr.msk.bf16.gmra.mrb[4].mxu0 %vm607_vm0, %v3090_v4  ;;  %414 = vst.msk [vmem:[#allocation2 + $0xe0] sm:$0xff] %vm385_vm1, %v3402_v19  ;;  %415 = vst.msk [vmem:[#allocation2 + $0xe8] sm:$0xff] %vm385_vm1, %v3402_v19 }
  0x21   : > { %708 = vmatprep.mubr.bf16.mxu0 %v3401_v0  ;;  %416 = vst.msk [vmem:[#allocation2 + $0xf0] sm:$0xff] %vm385_vm1, %v3402_v19  ;;  %417 = vst.msk [vmem:[#allocation2 + $0xf8] sm:$0xff] %vm385_vm1, %v3402_v19 }
  0x22   : > { %418 = vst.msk [vmem:[#allocation3] sm:$0xff] %vm385_vm1, %v4709_v44  ;;  %419 = vst.msk [vmem:[#allocation3 + $0x8] sm:$0xff] %vm385_vm1, %v4709_v44 }
  0x23   : > { %420 = vst.msk [vmem:[#allocation3 + $0x10] sm:$0xff] %vm385_vm1, %v4709_v44  ;;  %421 = vst.msk [vmem:[#allocation3 + $0x18] sm:$0xff] %vm385_vm1, %v4709_v44 }
  0x24   : > { %422 = vst.msk [vmem:[#allocation3 + $0x20] sm:$0xff] %vm385_vm1, %v4709_v44  ;;  %423 = vst.msk [vmem:[#allocation3 + $0x28] sm:$0xff] %vm385_vm1, %v4709_v44 }
  0x25   : > { %424 = vst.msk [vmem:[#allocation3 + $0x30] sm:$0xff] %vm385_vm1, %v4709_v44  ;;  %425 = vst.msk [vmem:[#allocation3 + $0x38] sm:$0xff] %vm385_vm1, %v4709_v44 }
  0x26   : > { %426 = vst.msk [vmem:[#allocation3 + $0x40] sm:$0xff] %vm385_vm1, %v4709_v44  ;;  %427 = vst.msk [vmem:[#allocation3 + $0x48] sm:$0xff] %vm385_vm1, %v4709_v44 }
  0x27   : > { %428 = vst.msk [vmem:[#allocation3 + $0x50] sm:$0xff] %vm385_vm1, %v4709_v44  ;;  %429 = vst.msk [vmem:[#allocation3 + $0x58] sm:$0xff] %vm385_vm1, %v4709_v44 }
  0x28   : > { %2892 = vmatmul.mubr.msk.bf16.gmra.mrb[8].mxu0 %vm607_vm0, %v3091_v5  ;;  %430 = vst.msk [vmem:[#allocation3 + $0x60] sm:$0xff] %vm385_vm1, %v4709_v44  ;;  %431 = vst.msk [vmem:[#allocation3 + $0x68] sm:$0xff] %vm385_vm1, %v4709_v44 }
  0x29   : > { %718 = vmatprep.mubr.bf16.mxu0 %v3401_v0  ;;  %432 = vst.msk [vmem:[#allocation3 + $0x70] sm:$0xff] %vm385_vm1, %v4709_v44  ;;  %433 = vst.msk [vmem:[#allocation3 + $0x78] sm:$0xff] %vm385_vm1, %v4709_v44 }
  0x2a   : > { %434 = vst.msk [vmem:[#allocation3 + $0x80] sm:$0xff] %vm385_vm1, %v4709_v44  ;;  %435 = vst.msk [vmem:[#allocation3 + $0x88] sm:$0xff] %vm385_vm1, %v4709_v44 }
  0x2b   : > { %436 = vst.msk [vmem:[#allocation3 + $0x90] sm:$0xff] %vm385_vm1, %v4709_v44  ;;  %437 = vst.msk [vmem:[#allocation3 + $0x98] sm:$0xff] %vm385_vm1, %v4709_v44 }
  0x2c   : > { %438 = vst.msk [vmem:[#allocation3 + $0xa0] sm:$0xff] %vm385_vm1, %v4709_v44  ;;  %439 = vst.msk [vmem:[#allocation3 + $0xa8] sm:$0xff] %vm385_vm1, %v4709_v44 }
  0x2d   : > { %440 = vst.msk [vmem:[#allocation3 + $0xb0] sm:$0xff] %vm385_vm1, %v4709_v44  ;;  %441 = vst.msk [vmem:[#allocation3 + $0xb8] sm:$0xff] %vm385_vm1, %v4709_v44 }
  0x2e   : > { %442 = vst.msk [vmem:[#allocation3 + $0xc0] sm:$0xff] %vm385_vm1, %v4709_v44  ;;  %443 = vst.msk [vmem:[#allocation3 + $0xc8] sm:$0xff] %vm385_vm1, %v4709_v44 }
  0x2f   : > { %444 = vst.msk [vmem:[#allocation3 + $0xd0] sm:$0xff] %vm385_vm1, %v4709_v44  ;;  %445 = vst.msk [vmem:[#allocation3 + $0xd8] sm:$0xff] %vm385_vm1, %v4709_v44 }
  0x30   : > { %2893 = vmatmul.mubr.msk.bf16.gmra.mrb[12].mxu0 %vm607_vm0, %v3092_v6  ;;  %446 = vst.msk [vmem:[#allocation3 + $0xe0] sm:$0xff] %vm385_vm1, %v4709_v44  ;;  %447 = vst.msk [vmem:[#allocation3 + $0xe8] sm:$0xff] %vm385_vm1, %v4709_v44 }
  0x31   : > { %728 = vmatprep.mubr.bf16.mxu0 %v3401_v0  ;;  %448 = vst.msk [vmem:[#allocation3 + $0xf0] sm:$0xff] %vm385_vm1, %v4709_v44  ;;  %449 = vst.msk [vmem:[#allocation3 + $0xf8] sm:$0xff] %vm385_vm1, %v4709_v44 }
  0x38   : > { %2894 = vmatmul.mubr.msk.bf16.gmra.mrb[16].mxu0 %vm607_vm0, %v3093_v7 }
  0x39   : > { %738 = vmatprep.mubr.bf16.mxu0 %v3401_v0 }
  0x40   : > { %2895 = vmatmul.mubr.msk.bf16.gmra.mrb[20].mxu0 %vm607_vm0, %v3094_v8 }
  0x41   : > { %748 = vmatprep.mubr.bf16.mxu0 %v3401_v0 }
  0x48   : > { %2896 = vmatmul.mubr.msk.bf16.gmra.mrb[24].mxu0 %vm607_vm0, %v3095_v9 }
  0x49   : > { %758 = vmatprep.mubr.bf16.mxu0 %v3401_v0 }
  0x50   : > { %2897 = vmatmul.mubr.msk.bf16.gmra.mrb[28].mxu0 %vm607_vm0, %v3096_v10 }
  0x51   : > { %768 = vmatprep.mubr.bf16.mxu0 %v3401_v0 }
  0x58   : > { %2898 = vmatmul.mubr.msk.bf16.gmra.mrb[32].mxu0 %vm607_vm0, %v3097_v11 }
  0x59   : > { %778 = vmatprep.mubr.bf16.mxu0 %v3401_v0 }
  0x60   : > { %2899 = vmatmul.mubr.msk.bf16.gmra.mrb[36].mxu0 %vm607_vm0, %v3098_v12 }
  0x61   : > { %788 = vmatprep.mubr.bf16.mxu0 %v3401_v0 }
  0x68   : > { %2900 = vmatmul.mubr.msk.bf16.gmra.mrb[40].mxu0 %vm607_vm0, %v3099_v13 }
  0x69   : > { %798 = vmatprep.mubr.bf16.mxu0 %v3401_v0 }
  0x70   : > { %2901 = vmatmul.mubr.msk.bf16.gmra.mrb[44].mxu0 %vm607_vm0, %v3100_v14 }
  0x71   : > { %808 = vmatprep.mubr.bf16.mxu0 %v3401_v0 }
  0x78   : > { %2902 = vmatmul.mubr.msk.bf16.gmra.mrb[48].mxu0 %vm607_vm0, %v3101_v15 }
  0x79   : > { %818 = vmatprep.mubr.bf16.mxu0 %v3401_v0 }
  0x80   : > { %2903 = vmatmul.mubr.msk.bf16.gmra.mrb[52].mxu0 %vm607_vm0, %v3102_v16 }
  0x81   : > { %828 = vmatprep.mubr.bf16.mxu0 %v3401_v0 }
  0x88   : > { %2904 = vmatmul.mubr.msk.bf16.gmra.mrb[56].mxu0 %vm607_vm0, %v3103_v17 }
  0x89   : > { %838 = vmatprep.mubr.bf16.mxu0 %v3401_v0 }
  0x90   : > { %2905 = vmatmul.mubr.msk.bf16.gmra.mrb[60].mxu0 %vm607_vm0, %v3104_v18 }
  0xeb   : > { %v3536_v20 = vpop.f32.mrb[0].mxu0 }
  0xec   : > { %v3538_v21 = vpop.f32.mrb[1].mxu0 }
  0xed   : > { %v3540_v22 = vpop.f32.mrb[2].mxu0  ;;  %v881_v23 = vmax.f32 %v3536_v20, %v3538_v21 }
  0xee   : > { %v3544_v24 = vpop.f32.mrb[3].mxu0 }
  0xef   : > { %882 = vmax.xlane.f32.xlu0 %v881_v23  ;;  %v884_v25 = vmax.f32 %v3540_v22, %v3544_v24 }
  0xf3   : > { %885 = vmax.xlane.f32.xlu0 %v884_v25  ;;  %v3548_v26 = vpop.f32.mrb[4].mxu0 }
  0xf4   : > { %v3550_v27 = vpop.f32.mrb[5].mxu0 }
  0xf5   : > { %v3552_v28 = vpop.f32.mrb[6].mxu0  ;;  %v887_v29 = vmax.f32 %v3548_v26, %v3550_v27 }
  0xf6   : > { %v3556_v30 = vpop.f32.mrb[7].mxu0 }
  0xf7   : > { %888 = vmax.xlane.f32.xlu1 %v887_v29  ;;  %v890_v31 = vmax.f32 %v3552_v28, %v3556_v30 }
  0xfb   : > { %891 = vmax.xlane.f32.xlu1 %v890_v31  ;;  %v3560_v32 = vpop.f32.mrb[8].mxu0 }
  0xfc   : > { %v3562_v33 = vpop.f32.mrb[9].mxu0 }
  0xfd   : > { %v3564_v34 = vpop.f32.mrb[10].mxu0  ;;  %v893_v35 = vmax.f32 %v3560_v32, %v3562_v33 }
  0xfe   : > { %4769 = vst [vmem:[#allocation6_spill] sm:$0xff] %v3564_v34  ;;  %v3568_v36 = vpop.f32.mrb[11].mxu0 }
  0xff   : > { %4770 = vst [vmem:[#allocation7_spill] sm:$0xff] %v3568_v36  ;;  %894 = vmax.xlane.f32.xlu0 %v893_v35  ;;  %v896_v37 = vmax.f32 %v3564_v34, %v3568_v36 }
 0x101   : > { %897 = vmax.xlane.f32.xlu1 %v896_v37 }
 0x103   : > { %v3572_v38 = vpop.f32.mrb[12].mxu0 }
 0x104   : > { %4771 = vst [vmem:[#allocation8_spill] sm:$0xff] %v3572_v38  ;;  %v3574_v39 = vpop.f32.mrb[13].mxu0 }
 0x105   : > { %4772 = vst [vmem:[#allocation9_spill] sm:$0xff] %v3574_v39  ;;  %v3576_v40 = vpop.f32.mrb[14].mxu0  ;;  %v899_v41 = vmax.f32 %v3572_v38, %v3574_v39 }
 0x106   : > { %4773 = vst [vmem:[#allocation10_spill] sm:$0xff] %v3576_v40  ;;  %v3580_v42 = vpop.f32.mrb[15].mxu0 }
 0x107   : > { %4774 = vst [vmem:[#allocation11_spill] sm:$0xff] %v3580_v42  ;;  %900 = vmax.xlane.f32.xlu0 %v899_v41  ;;  %v902_v43 = vmax.f32 %v3576_v40, %v3580_v42  ;;  %v4025_v40 = vld [vmem:[#allocation2 + $0xb8] sm:$0xff] }
 0x109   : > { %903 = vmax.xlane.f32.xlu1 %v902_v43 }
 0x10b   : > { %v3648_v45 = vpop.f32.mrb[16].mxu0 }
 0x10c   : > { %4775 = vst [vmem:[#allocation12_spill] sm:$0xff] %v3648_v45  ;;  %v3650_v46 = vpop.f32.mrb[17].mxu0 }
 0x10d   : > { %4776 = vst [vmem:[#allocation13_spill] sm:$0xff] %v3650_v46  ;;  %v3652_v47 = vpop.f32.mrb[18].mxu0  ;;  %v905_v48 = vmax.f32 %v3648_v45, %v3650_v46  ;;  %v4020_v46 = vld [vmem:[#allocation2 + $0xb0] sm:$0xff] }
 0x10e   : > { %4777 = vst [vmem:[#allocation14_spill] sm:$0xff] %v3652_v47  ;;  %v3656_v49 = vpop.f32.mrb[19].mxu0 }
 0x10f   : > { %4778 = vst [vmem:[#allocation15_spill] sm:$0xff] %v3656_v49  ;;  %906 = vmax.xlane.f32.xlu0 %v905_v48  ;;  %v908_v50 = vmax.f32 %v3652_v47, %v3656_v49  ;;  %v4006_v49 = vld [vmem:[#allocation2 + $0xa8] sm:$0xff] }
 0x111   : > { %909 = vmax.xlane.f32.xlu1 %v908_v50 }
 0x113   : > { %v3660_v51 = vpop.f32.mrb[20].mxu0 }
 0x114   : > { %4779 = vst [vmem:[#allocation16_spill] sm:$0xff] %v3660_v51  ;;  %v3662_v52 = vpop.f32.mrb[21].mxu0 }
 0x115   : > { %4780 = vst [vmem:[#allocation17_spill] sm:$0xff] %v3662_v52  ;;  %v3664_v53 = vpop.f32.mrb[22].mxu0  ;;  %v911_v54 = vmax.f32 %v3660_v51, %v3662_v52 }
 0x116   : > { %4781 = vst [vmem:[#allocation18_spill] sm:$0xff] %v3664_v53  ;;  %v3668_v55 = vpop.f32.mrb[23].mxu0 }
 0x117   : > { %4782 = vst [vmem:[#allocation19_spill] sm:$0xff] %v3668_v55  ;;  %912 = vmax.xlane.f32.xlu0 %v911_v54  ;;  %v914_v56 = vmax.f32 %v3664_v53, %v3668_v55 }
 0x119   : > { %915 = vmax.xlane.f32.xlu1 %v914_v56 }
 0x11b   : > { %v3672_v57 = vpop.f32.mrb[24].mxu0 }
 0x11c   : > { %4783 = vst [vmem:[#allocation20_spill] sm:$0xff] %v3672_v57  ;;  %v3674_v58 = vpop.f32.mrb[25].mxu0 }
 0x11d   : > { %4784 = vst [vmem:[#allocation21_spill] sm:$0xff] %v3674_v58  ;;  %v3676_v59 = vpop.f32.mrb[26].mxu0  ;;  %v917_v60 = vmax.f32 %v3672_v57, %v3674_v58  ;;  %v3990_v58 = vld [vmem:[#allocation2 + $0x98] sm:$0xff]  ;;  %v4004_v57 = vld [vmem:[#allocation2 + $0xa0] sm:$0xff] }
 0x11e   : > { %4785 = vst [vmem:[#allocation22_spill] sm:$0xff] %v3676_v59  ;;  %v3680_v61 = vpop.f32.mrb[27].mxu0 }
 0x11f   : > { %4786 = vst [vmem:[#allocation23_spill] sm:$0xff] %v3680_v61  ;;  %918 = vmax.xlane.f32.xlu0 %v917_v60  ;;  %v920_v62 = vmax.f32 %v3676_v59, %v3680_v61 }
 0x121   : > { %921 = vmax.xlane.f32.xlu1 %v920_v62 }
 0x123   : > { %v3684_v63 = vpop.f32.mrb[28].mxu0 }
 0x124   : > { %4787 = vst [vmem:[#allocation24_spill] sm:$0xff] %v3684_v63  ;;  %v3686_v0 = vpop.f32.mrb[29].mxu0 }
 0x125   : > { %4788 = vst [vmem:[#allocation25_spill] sm:$0xff] %v3686_v0  ;;  %v3688_v1 = vpop.f32.mrb[30].mxu0  ;;  %v923_v2 = vmax.f32 %v3684_v63, %v3686_v0  ;;  %v3970_v0 = vld [vmem:[#allocation2 + $0x88] sm:$0xff] }
 0x126   : > { %4789 = vst [vmem:[#allocation26_spill] sm:$0xff] %v3688_v1  ;;  %v3692_v3 = vpop.f32.mrb[31].mxu0 }
 0x127   : > { %4790 = vst [vmem:[#allocation27_spill] sm:$0xff] %v3692_v3  ;;  %924 = vmax.xlane.f32.xlu0 %v923_v2  ;;  %v926_v4 = vmax.f32 %v3688_v1, %v3692_v3 }
 0x129   : > { %927 = vmax.xlane.f32.xlu1 %v926_v4 }
 0x12b   : > { %v3696_v5 = vpop.f32.mrb[32].mxu0 }
 0x12c   : > { %4791 = vst [vmem:[#allocation28_spill] sm:$0xff] %v3696_v5  ;;  %v3698_v6 = vpop.f32.mrb[33].mxu0 }
 0x12d   : > { %4792 = vst [vmem:[#allocation29_spill] sm:$0xff] %v3698_v6  ;;  %v3700_v7 = vpop.f32.mrb[34].mxu0  ;;  %v929_v8 = vmax.f32 %v3696_v5, %v3698_v6  ;;  %v3950_v6 = vld [vmem:[#allocation2 + $0x78] sm:$0xff] }
 0x12e   : > { %4793 = vst [vmem:[#allocation30_spill] sm:$0xff] %v3700_v7  ;;  %v3704_v9 = vpop.f32.mrb[35].mxu0 }
 0x12f   : > { %4794 = vst [vmem:[#allocation31_spill] sm:$0xff] %v3704_v9  ;;  %930 = vmax.xlane.f32.xlu0 %v929_v8  ;;  %v932_v10 = vmax.f32 %v3700_v7, %v3704_v9 }
 0x131   : > { %933 = vmax.xlane.f32.xlu1 %v932_v10 }
 0x133   : > { %v3708_v11 = vpop.f32.mrb[36].mxu0 }
 0x134   : > { %4795 = vst [vmem:[#allocation32_spill] sm:$0xff] %v3708_v11  ;;  %v3710_v12 = vpop.f32.mrb[37].mxu0 }
 0x135   : > { %4796 = vst [vmem:[#allocation33_spill] sm:$0xff] %v3710_v12  ;;  %v3712_v13 = vpop.f32.mrb[38].mxu0  ;;  %v935_v14 = vmax.f32 %v3708_v11, %v3710_v12  ;;  %v3930_v12 = vld [vmem:[#allocation2 + $0x68] sm:$0xff] }
 0x136   : > { %4797 = vst [vmem:[#allocation34_spill] sm:$0xff] %v3712_v13  ;;  %v3716_v15 = vpop.f32.mrb[39].mxu0 }
 0x137   : > { %4798 = vst [vmem:[#allocation35_spill] sm:$0xff] %v3716_v15  ;;  %936 = vmax.xlane.f32.xlu0 %v935_v14  ;;  %v938_v16 = vmax.f32 %v3712_v13, %v3716_v15 }
 0x139   : > { %939 = vmax.xlane.f32.xlu1 %v938_v16 }
 0x13b   : > { %v3720_v17 = vpop.f32.mrb[40].mxu0 }
 0x13c   : > { %4799 = vst [vmem:[#allocation36_spill] sm:$0xff] %v3720_v17  ;;  %v3722_v18 = vpop.f32.mrb[41].mxu0 }
 0x13d   : > { %4800 = vst [vmem:[#allocation37_spill] sm:$0xff] %v3722_v18  ;;  %v3724_v19 = vpop.f32.mrb[42].mxu0  ;;  %v941_v23 = vmax.f32 %v3720_v17, %v3722_v18  ;;  %v3910_v18 = vld [vmem:[#allocation2 + $0x58] sm:$0xff] }
 0x13e   : > { %4801 = vst [vmem:[#allocation38_spill] sm:$0xff] %v3724_v19  ;;  %v3728_v25 = vpop.f32.mrb[43].mxu0 }
 0x13f   : > { %4802 = vst [vmem:[#allocation39_spill] sm:$0xff] %v3728_v25  ;;  %942 = vmax.xlane.f32.xlu0 %v941_v23  ;;  %v944_v29 = vmax.f32 %v3724_v19, %v3728_v25 }
 0x141   : > { %945 = vmax.xlane.f32.xlu1 %v944_v29 }
 0x143   : > { %v3732_v31 = vpop.f32.mrb[44].mxu0 }
 0x144   : > { %4803 = vst [vmem:[#allocation40_spill] sm:$0xff] %v3732_v31  ;;  %v3734_v35 = vpop.f32.mrb[45].mxu0 }
 0x145   : > { %4804 = vst [vmem:[#allocation41_spill] sm:$0xff] %v3734_v35  ;;  %v3736_v37 = vpop.f32.mrb[46].mxu0  ;;  %v947_v41 = vmax.f32 %v3732_v31, %v3734_v35  ;;  %v3867_v35 = vld [vmem:[#allocation2 + $0x30] sm:$0xff] }
 0x146   : > { %4805 = vst [vmem:[#allocation42_spill] sm:$0xff] %v3736_v37  ;;  %v3740_v43 = vpop.f32.mrb[47].mxu0 }
 0x147   : > { %4806 = vst [vmem:[#allocation43_spill] sm:$0xff] %v3740_v43  ;;  %948 = vmax.xlane.f32.xlu0 %v947_v41  ;;  %v950_v48 = vmax.f32 %v3736_v37, %v3740_v43 }
 0x149   : > { %951 = vmax.xlane.f32.xlu1 %v950_v48 }
 0x14b   : > { %v3744_v50 = vpop.f32.mrb[48].mxu0 }
 0x14c   : > { %4807 = vst [vmem:[#allocation44_spill] sm:$0xff] %v3744_v50  ;;  %v3746_v54 = vpop.f32.mrb[49].mxu0 }
 0x14d   : > { %4808 = vst [vmem:[#allocation45_spill] sm:$0xff] %v3746_v54  ;;  %v3748_v56 = vpop.f32.mrb[50].mxu0  ;;  %v953_v60 = vmax.f32 %v3744_v50, %v3746_v54  ;;  %v3839_v54 = vld [vmem:[#allocation2 + $0x20] sm:$0xff] }
 0x14e   : > { %4809 = vst [vmem:[#allocation46_spill] sm:$0xff] %v3748_v56  ;;  %v3752_v62 = vpop.f32.mrb[51].mxu0 }
 0x14f   : > { %4810 = vst [vmem:[#allocation47_spill] sm:$0xff] %v3752_v62  ;;  %954 = vmax.xlane.f32.xlu0 %v953_v60  ;;  %v956_v2 = vmax.f32 %v3748_v56, %v3752_v62  ;;  %v3827_v62 = vld [vmem:[#allocation2 + $0x18] sm:$0xff]  ;;  %v3116_v56 = vld [vmem:[%s3473_s8 + $0x28] sm:$0xff]  }
 0x151   : > { %957 = vmax.xlane.f32.xlu1 %v956_v2 }
 0x153   : > { %v3756_v4 = vpop.f32.mrb[52].mxu0 }
 0x154   : > { %4811 = vst [vmem:[#allocation48_spill] sm:$0xff] %v3756_v4  ;;  %v3758_v8 = vpop.f32.mrb[53].mxu0 }
 0x155   : > { %4812 = vst [vmem:[#allocation49_spill] sm:$0xff] %v3758_v8  ;;  %v3760_v10 = vpop.f32.mrb[54].mxu0  ;;  %v959_v14 = vmax.f32 %v3756_v4, %v3758_v8 }
 0x156   : > { %4813 = vst [vmem:[#allocation50_spill] sm:$0xff] %v3760_v10  ;;  %v3764_v16 = vpop.f32.mrb[55].mxu0 }
 0x157   : > { %4814 = vst [vmem:[#allocation51_spill] sm:$0xff] %v3764_v16  ;;  %960 = vmax.xlane.f32.xlu0 %v959_v14  ;;  %v962_v23 = vmax.f32 %v3760_v10, %v3764_v16  ;;  %v3114_v10 = vld [vmem:[%s3473_s8 + $0x20] sm:$0xff]  }
 0x159   : > { %963 = vmax.xlane.f32.xlu1 %v962_v23 }
 0x15b   : > { %v3768_v29 = vpop.f32.mrb[56].mxu0 }
 0x15c   : > { %4815 = vst [vmem:[#allocation52_spill] sm:$0xff] %v3768_v29  ;;  %v3770_v41 = vpop.f32.mrb[57].mxu0 }
 0x15d   : > { %4816 = vst [vmem:[#allocation53_spill] sm:$0xff] %v3770_v41  ;;  %v3772_v48 = vpop.f32.mrb[58].mxu0  ;;  %v965_v60 = vmax.f32 %v3768_v29, %v3770_v41  ;;  %v3106_v41 = vld [vmem:[%s3473_s8] sm:$0xff]   ;;  %v3107_v29 = vld [vmem:[%s3473_s8 + $0x48] sm:$0xff]  }
 0x15e   : > { %4817 = vst [vmem:[#allocation54_spill] sm:$0xff] %v3772_v48  ;;  %v3776_v2 = vpop.f32.mrb[59].mxu0 }
 0x15f   : > { %4818 = vst [vmem:[#allocation55_spill] sm:$0xff] %v3776_v2  ;;  %966 = vmax.xlane.f32.xlu0 %v965_v60  ;;  %v968_v14 = vmax.f32 %v3772_v48, %v3776_v2  ;;  %v3108_v2 = vld [vmem:[%s3473_s8 + $0x8] sm:$0xff]   ;;  %v3113_v48 = vld [vmem:[%s3473_s8 + $0x60] sm:$0xff]  }
 0x161   : > { %969 = vmax.xlane.f32.xlu1 %v968_v14  ;;  %v3105_v14 = vld [vmem:[%s3473_s8 + $0x40] sm:$0xff]  }
 0x162   : > { %2929 = vmatprep.subr.bf16.mxu0 %v3105_v14  ;;  %3041 = vmatprep.subr.bf16.mxu1 %v3105_v14  ;;  %v3803_v14 = vld [vmem:[#allocation2 + $0x8] sm:$0xff] }
 0x163   : > { %v3780_v23 = vpop.f32.mrb[60].mxu0  ;;  %2930 = vmatpush3.bf16.msra.mxu0 %v3106_v41  ;;  %3049 = vmatpush3.bf16.msra.mxu1 %v3106_v41 }
 0x164   : > { %4819 = vst [vmem:[#allocation56_spill] sm:$0xff] %v3780_v23  ;;  %v3782_v44 = vpop.f32.mrb[61].mxu0  ;;  %2931 = vmatprep.subr.bf16.mxu0 %v3107_v29  ;;  %3042 = vmatprep.subr.bf16.mxu1 %v3107_v29 }
 0x165   : > { %4820 = vst [vmem:[#allocation57_spill] sm:$0xff] %v3782_v44  ;;  %v3784_v8 = vpop.f32.mrb[62].mxu0  ;;  %v971_v4 = vmax.f32 %v3780_v23, %v3782_v44  ;;  %v3796_v44 = vld [vmem:[#allocation2] sm:$0xff] }
 0x166   : > { %4821 = vst [vmem:[#allocation58_spill] sm:$0xff] %v3784_v8  ;;  %v3788_v16 = vpop.f32.mrb[63].mxu0 }
 0x167   : > { %4822 = vst [vmem:[#allocation59_spill] sm:$0xff] %v3788_v16  ;;  %972 = vmax.xlane.f32.xlu0 %v971_v4  ;;  %v974_v60 = vmax.f32 %v3784_v8, %v3788_v16  ;;  %2932 = vmatpush3.bf16.msra.mxu0 %v3108_v2  ;;  %v3109_v4 = vld [vmem:[%s3473_s8 + $0x50] sm:$0xff]  }
 0x168   : > { %3050 = vmatpush3.bf16.msra.mxu1 %v3108_v2  ;;  %2933 = vmatprep.subr.bf16.mxu0 %v3109_v4  ;;  %v3111_v2 = vld [vmem:[%s3473_s8 + $0x58] sm:$0xff]   ;;  %v3815_v8 = vld [vmem:[#allocation2 + $0x10] sm:$0xff] }
 0x169   : > { %975 = vmax.xlane.f32.xlu1 %v974_v60  ;;  %v3110_v60 = vld [vmem:[%s3473_s8 + $0x10] sm:$0xff]   ;;  %3043 = vmatprep.subr.bf16.mxu1 %v3109_v4  ;;  %v3112_v4 = vld [vmem:[%s3473_s8 + $0x18] sm:$0xff]  }
 0x16b   : > { %2934 = vmatpush3.bf16.msra.mxu0 %v3110_v60 }
 0x16c   : > { %3051 = vmatpush3.bf16.msra.mxu1 %v3110_v60  ;;  %2935 = vmatprep.subr.bf16.mxu0 %v3111_v2 }
 0x16d   : > { %3044 = vmatprep.subr.bf16.mxu1 %v3111_v2 }
 0x16f   : > { %2936 = vmatpush3.bf16.msra.mxu0 %v3112_v4 }
 0x170   : > { %3052 = vmatpush3.bf16.msra.mxu1 %v3112_v4  ;;  %2937 = vmatprep.subr.bf16.mxu0 %v3113_v48  ;;  %v3115_v4 = vld [vmem:[%s3473_s8 + $0x68] sm:$0xff]  }
 0x171   : > { %3045 = vmatprep.subr.bf16.mxu1 %v3113_v48  ;;  %v3870_v48 = vld [vmem:[#allocation2 + $0x38] sm:$0xff] }
 0x173   : > { %2938 = vmatpush3.bf16.msra.mxu0 %v3114_v10 }
 0x174   : > { %3053 = vmatpush3.bf16.msra.mxu1 %v3114_v10  ;;  %2939 = vmatprep.subr.bf16.mxu0 %v3115_v4  ;;  %v3846_v10 = vld [vmem:[#allocation2 + $0x28] sm:$0xff] }
 0x175   : > { %3046 = vmatprep.subr.bf16.mxu1 %v3115_v4  ;;  %v3118_v4 = vld [vmem:[%s3473_s8 + $0x30] sm:$0xff]  }
 0x177   : > { %2940 = vmatpush3.bf16.msra.mxu0 %v3116_v56 }
 0x178   : > { %3054 = vmatpush3.bf16.msra.mxu1 %v3116_v56  ;;  %v3119_v56 = vld [vmem:[%s3473_s8 + $0x78] sm:$0xff]  }
 0x17c   : > { %v883_v23 = vpop.xlane.xlu0 %882 }
 0x17d   : > { %v3801_v16 = vmax.f32 %v3796_v44, %v883_v23 }
 0x17f   : > { %2292 = vst.msk [vmem:[#allocation2] sm:$0xff] %vm385_vm1, %v3801_v16  ;;  %1107 = vperm.xlu0 %3084, %v3801_v16  }
 0x180   : > { %v886_v41 = vpop.xlane.xlu0 %885 }
 0x181   : > { %v3812_v23 = vmax.f32 %v3803_v14, %v886_v41 }
 0x183   : > { %2293 = vst.msk [vmem:[#allocation2 + $0x8] sm:$0xff] %vm385_vm1, %v3812_v23  ;;  %1112 = vperm.xlu1 %3085, %v3812_v23  }
 0x184   : > { %v889_v29 = vpop.xlane.xlu1 %888 }
 0x185   : > { %v3824_v41 = vmax.f32 %v3815_v8, %v889_v29 }
 0x187   : > { %2294 = vst.msk [vmem:[#allocation2 + $0x10] sm:$0xff] %vm385_vm1, %v3824_v41  ;;  %1117 = vperm.xlu1 %3085, %v3824_v41  }
 0x188   : > { %v892_v60 = vpop.xlane.xlu1 %891 }
 0x189   : > { %v3836_v29 = vmax.f32 %v3827_v62, %v892_v60  ;;  %v3117_v60 = vld [vmem:[%s3473_s8 + $0x70] sm:$0xff]  }
 0x18a   : > { %2941 = vmatprep.subr.bf16.mxu0 %v3117_v60  ;;  %3047 = vmatprep.subr.bf16.mxu1 %v3117_v60  ;;  %v3120_v60 = vld [vmem:[%s3473_s8 + $0x38] sm:$0xff]  }
 0x18b   : > { %2295 = vst.msk [vmem:[#allocation2 + $0x18] sm:$0xff] %vm385_vm1, %v3836_v29  ;;  %1122 = vperm.xlu1 %3085, %v3836_v29   ;;  %2942 = vmatpush3.bf16.msra.mxu0 %v3118_v4 }
 0x18c   : > { %v895_v2 = vpop.xlane.xlu0 %894  ;;  %3055 = vmatpush3.bf16.msra.mxu1 %v3118_v4  ;;  %2943 = vmatprep.subr.bf16.mxu0 %v3119_v56 }
 0x18d   : > { %v3850_v50 = vmax.f32 %v3839_v54, %v895_v2  ;;  %3048 = vmatprep.subr.bf16.mxu1 %v3119_v56  ;;  %v3890_v2 = vld [vmem:[#allocation2 + $0x48] sm:$0xff] }
 0x18e   : > { %v898_v43 = vpop.xlane.xlu1 %897 }
 0x18f   : > { %2296 = vst.msk [vmem:[#allocation2 + $0x20] sm:$0xff] %vm385_vm1, %v3850_v50  ;;  %v3858_v37 = vmax.f32 %v3846_v10, %v898_v43  ;;  %1127 = vperm.xlu1 %3085, %v3850_v50   ;;  %2944 = vmatpush3.bf16.msra.mxu0 %v3120_v60 }
 0x190   : > { %3056 = vmatpush3.bf16.msra.mxu1 %v3120_v60  ;;  %v3887_v60 = vld [vmem:[#allocation2 + $0x40] sm:$0xff] }
 0x191   : > { %2297 = vst.msk [vmem:[#allocation2 + $0x28] sm:$0xff] %vm385_vm1, %v3858_v37 }
 0x193   : > { %1132 = vperm.xlu1 %3085, %v3858_v37  }
 0x194   : > { %v901_v43 = vpop.xlane.xlu0 %900 }
 0x195   : > { %v3873_v4 = vmax.f32 %v3867_v35, %v901_v43 }
 0x196   : > { %v904_v31 = vpop.xlane.xlu1 %903 }
 0x197   : > { %2298 = vst.msk [vmem:[#allocation2 + $0x30] sm:$0xff] %vm385_vm1, %v3873_v4  ;;  %v3880_v25 = vmax.f32 %v3870_v48, %v904_v31  ;;  %1137 = vperm.xlu1 %3085, %v3873_v4  }
 0x199   : > { %2299 = vst.msk [vmem:[#allocation2 + $0x38] sm:$0xff] %vm385_vm1, %v3880_v25 }
 0x19b   : > { %1142 = vperm.xlu1 %3085, %v3880_v25  }
 0x19c   : > { %v907_v43 = vpop.xlane.xlu0 %906 }
 0x19d   : > { %v3893_v19 = vmax.f32 %v3887_v60, %v907_v43  ;;  %v3908_v43 = vld [vmem:[#allocation2 + $0x50] sm:$0xff] }
 0x19e   : > { %v910_v31 = vpop.xlane.xlu1 %909 }
 0x19f   : > { %2300 = vst.msk [vmem:[#allocation2 + $0x40] sm:$0xff] %vm385_vm1, %v3893_v19  ;;  %v3900_v56 = vmax.f32 %v3890_v2, %v910_v31  ;;  %1147 = vperm.xlu1 %3085, %v3893_v19  }
 0x1a1   : > { %2301 = vst.msk [vmem:[#allocation2 + $0x48] sm:$0xff] %vm385_vm1, %v3900_v56  ;;  %1152 = vperm.xlu0 %3084, %v3900_v56  }
 0x1a4   : > { %v913_v15 = vpop.xlane.xlu0 %912 }
 0x1a5   : > { %v3913_v13 = vmax.f32 %v3908_v43, %v913_v15  ;;  %v3928_v15 = vld [vmem:[#allocation2 + $0x60] sm:$0xff] }
 0x1a6   : > { %v916_v31 = vpop.xlane.xlu1 %915 }
 0x1a7   : > { %2302 = vst.msk [vmem:[#allocation2 + $0x50] sm:$0xff] %vm385_vm1, %v3913_v13  ;;  %v3920_v17 = vmax.f32 %v3910_v18, %v916_v31  ;;  %1157 = vperm.xlu1 %3085, %v3913_v13  }
 0x1a9   : > { %2303 = vst.msk [vmem:[#allocation2 + $0x58] sm:$0xff] %vm385_vm1, %v3920_v17  ;;  %1162 = vperm.xlu0 %3084, %v3920_v17  }
 0x1ac   : > { %v919_v9 = vpop.xlane.xlu0 %918 }
 0x1ad   : > { %v3933_v7 = vmax.f32 %v3928_v15, %v919_v9  ;;  %v3948_v9 = vld [vmem:[#allocation2 + $0x70] sm:$0xff] }
 0x1ae   : > { %v922_v31 = vpop.xlane.xlu1 %921 }
 0x1af   : > { %2304 = vst.msk [vmem:[#allocation2 + $0x60] sm:$0xff] %vm385_vm1, %v3933_v7  ;;  %v3940_v11 = vmax.f32 %v3930_v12, %v922_v31  ;;  %1167 = vperm.xlu1 %3085, %v3933_v7  }
 0x1b1   : > { %2305 = vst.msk [vmem:[#allocation2 + $0x68] sm:$0xff] %vm385_vm1, %v3940_v11  ;;  %1172 = vperm.xlu0 %3084, %v3940_v11  }
 0x1b4   : > { %v925_v3 = vpop.xlane.xlu0 %924 }
 0x1b5   : > { %v3953_v1 = vmax.f32 %v3948_v9, %v925_v3  ;;  %v3968_v3 = vld [vmem:[#allocation2 + $0x80] sm:$0xff] }
 0x1b6   : > { %v928_v31 = vpop.xlane.xlu1 %927 }
 0x1b7   : > { %2306 = vst.msk [vmem:[#allocation2 + $0x70] sm:$0xff] %vm385_vm1, %v3953_v1  ;;  %v3960_v5 = vmax.f32 %v3950_v6, %v928_v31  ;;  %1177 = vperm.xlu1 %3085, %v3953_v1  }
 0x1b9   : > { %2307 = vst.msk [vmem:[#allocation2 + $0x78] sm:$0xff] %vm385_vm1, %v3960_v5  ;;  %1182 = vperm.xlu0 %3084, %v3960_v5  }
 0x1bc   : > { %v931_v61 = vpop.xlane.xlu0 %930 }
 0x1bd   : > { %v3973_v59 = vmax.f32 %v3968_v3, %v931_v61  ;;  %v3988_v61 = vld [vmem:[#allocation2 + $0x90] sm:$0xff] }
 0x1be   : > { %v934_v31 = vpop.xlane.xlu1 %933 }
 0x1bf   : > { %2308 = vst.msk [vmem:[#allocation2 + $0x80] sm:$0xff] %vm385_vm1, %v3973_v59  ;;  %v3980_v63 = vmax.f32 %v3970_v0, %v934_v31  ;;  %1187 = vperm.xlu1 %3085, %v3973_v59  }
 0x1c1   : > { %2309 = vst.msk [vmem:[#allocation2 + $0x88] sm:$0xff] %vm385_vm1, %v3980_v63  ;;  %1192 = vperm.xlu0 %3084, %v3980_v63  }
 0x1c4   : > { %v937_v55 = vpop.xlane.xlu0 %936 }
 0x1c5   : > { %v3993_v53 = vmax.f32 %v3988_v61, %v937_v55 }
 0x1c6   : > { %v940_v31 = vpop.xlane.xlu1 %939 }
 0x1c7   : > { %2310 = vst.msk [vmem:[#allocation2 + $0x90] sm:$0xff] %vm385_vm1, %v3993_v53  ;;  %v3998_v52 = vmax.f32 %v3990_v58, %v940_v31  ;;  %1197 = vperm.xlu1 %3085, %v3993_v53  }
 0x1c9   : > { %2311 = vst.msk [vmem:[#allocation2 + $0x98] sm:$0xff] %vm385_vm1, %v3998_v52  ;;  %1202 = vperm.xlu0 %3084, %v3998_v52  }
 0x1cc   : > { %v943_v51 = vpop.xlane.xlu0 %942 }
 0x1cd   : > { %v4009_v55 = vmax.f32 %v4004_v57, %v943_v51  ;;  %v4823_v51 = vsub.f32 %v3803_v14, %v3812_v23  ;;  %v4825_v14 = vsub.f32 %v3815_v8, %v3824_v41 }
 0x1ce   : > { %v946_v47 = vpop.xlane.xlu1 %945 }
 0x1cf   : > { %2312 = vst.msk [vmem:[#allocation2 + $0xa0] sm:$0xff] %vm385_vm1, %v4009_v55  ;;  %v4014_v31 = vmax.f32 %v4006_v49, %v946_v47  ;;  %1207 = vperm.xlu1 %3085, %v4009_v55   ;;  %v1043_v45 = vmul.f32 1.442695, %v4823_v51  ;;  %v4824_v47 = vsub.f32 %v3796_v44, %v3801_v16  ;;  %v1045_v23 = vmul.f32 1.442695, %v4825_v14  ;;  %v4047_v16 = vld [vmem:[#allocation2 + $0xc8] sm:$0xff] }
 0x1d1   : > { %2313 = vst.msk [vmem:[#allocation2 + $0xa8] sm:$0xff] %vm385_vm1, %v4014_v31  ;;  %1212 = vperm.xlu0 %3084, %v4014_v31   ;;  %v1041_v38 = vmul.f32 1.442695, %v4824_v47  ;;  %3121 = vpow2.f32 %v1043_v45  ;;  %v4826_v45 = vmov 0.0   ;;  %v4828_v47 = vsub.f32 %v3839_v54, %v3850_v50 }
 0x1d2   : > { %452 = vst.msk [vmem:[#allocation4 + $0x8] sm:$0xff] %vm450_vm2, %v4826_v45  ;;  %451 = vst.msk [vmem:[#allocation4] sm:$0xff] %vm450_vm2, %v4826_v45 }
 0x1d3   : > { %3123 = vpow2.f32 %v1041_v38  ;;  %453 = vst.msk [vmem:[#allocation4 + $0x10] sm:$0xff] %vm450_vm2, %v4826_v45  ;;  %454 = vst.msk [vmem:[#allocation4 + $0x18] sm:$0xff] %vm450_vm2, %v4826_v45  ;;  %v4827_v38 = vsub.f32 %v3827_v62, %v3836_v29  ;;  %v1049_v14 = vmul.f32 1.442695, %v4828_v47  ;;  %v4133_v29 = vld [vmem:[#allocation2 + $0xd0] sm:$0xff] }
 0x1d4   : > { %v949_v42 = vpop.xlane.xlu0 %948  ;;  %3125 = vpow2.f32 %v1045_v23  ;;  %455 = vst.msk [vmem:[#allocation4 + $0x20] sm:$0xff] %vm450_vm2, %v4826_v45  ;;  %456 = vst.msk [vmem:[#allocation4 + $0x28] sm:$0xff] %vm450_vm2, %v4826_v45 }
 0x1d5   : > { %v4028_v39 = vmax.f32 %v4020_v46, %v949_v42  ;;  %v4045_v42 = vld [vmem:[#allocation2 + $0xc0] sm:$0xff]  ;;  %457 = vst.msk [vmem:[#allocation4 + $0x30] sm:$0xff] %vm450_vm2, %v4826_v45  ;;  %458 = vst.msk [vmem:[#allocation4 + $0x38] sm:$0xff] %vm450_vm2, %v4826_v45  ;;  %v1047_v8 = vmul.f32 1.442695, %v4827_v38  ;;  %v4830_v38 = vsub.f32 %v3846_v10, %v3858_v37 }
 0x1d6   : > { %v952_v36 = vpop.xlane.xlu1 %951  ;;  %459 = vst.msk [vmem:[#allocation4 + $0x40] sm:$0xff] %vm450_vm2, %v4826_v45  ;;  %460 = vst.msk [vmem:[#allocation4 + $0x48] sm:$0xff] %vm450_vm2, %v4826_v45  ;;  %v4161_v37 = vld [vmem:[#allocation2 + $0xe0] sm:$0xff] }
 0x1d7   : > { %2314 = vst.msk [vmem:[#allocation2 + $0xb0] sm:$0xff] %vm385_vm1, %v4028_v39  ;;  %v4036_v34 = vmax.f32 %v4025_v40, %v952_v36  ;;  %1217 = vperm.xlu1 %3085, %v4028_v39   ;;  %3127 = vpow2.f32 %v1047_v8  ;;  %v1051_v8 = vmul.f32 1.442695, %v4830_v38 }
 0x1d8   : > { %461 = vst.msk [vmem:[#allocation4 + $0x50] sm:$0xff] %vm450_vm2, %v4826_v45  ;;  %462 = vst.msk [vmem:[#allocation4 + $0x58] sm:$0xff] %vm450_vm2, %v4826_v45  ;;  %3129 = vpow2.f32 %v1049_v14  ;;  %v4831_v14 = vsub.f32 %v3867_v35, %v3873_v4 }
 0x1d9   : > { %2315 = vst.msk [vmem:[#allocation2 + $0xb8] sm:$0xff] %vm385_vm1, %v4036_v34  ;;  %1222 = vperm.xlu0 %3084, %v4036_v34   ;;  %3131 = vpow2.f32 %v1051_v8  ;;  %v4834_v8 = vsub.f32 %v3870_v48, %v3880_v25  ;;  %v4836_v25 = vsub.f32 %v3890_v2, %v3900_v56  ;;  %v4838_v56 = vsub.f32 %v3910_v18, %v3920_v17 }
 0x1da   : > { %463 = vst.msk [vmem:[#allocation4 + $0x60] sm:$0xff] %vm450_vm2, %v4826_v45  ;;  %464 = vst.msk [vmem:[#allocation4 + $0x68] sm:$0xff] %vm450_vm2, %v4826_v45  ;;  %v4841_v17 = vsub.f32 %v3948_v9, %v3953_v1  ;;  %v4844_v1 = vsub.f32 %v3970_v0, %v3980_v63 }
 0x1db   : > { %465 = vst.msk [vmem:[#allocation4 + $0x70] sm:$0xff] %vm450_vm2, %v4826_v45  ;;  %466 = vst.msk [vmem:[#allocation4 + $0x78] sm:$0xff] %vm450_vm2, %v4826_v45  ;;  %v4131_v62 = vpop.eup %3121  ;;  %v1059_v48 = vmul.f32 1.442695, %v4836_v25  ;;  %v1063_v25 = vmul.f32 1.442695, %v4838_v56 }
 0x1dc   : > { %v955_v44 = vpop.xlane.xlu0 %954  ;;  %467 = vst.msk [vmem:[#allocation4 + $0x80] sm:$0xff] %vm450_vm2, %v4826_v45  ;;  %468 = vst.msk [vmem:[#allocation4 + $0x88] sm:$0xff] %vm450_vm2, %v4826_v45  ;;  %v1069_v18 = vmul.f32 1.442695, %v4841_v17  ;;  %v1075_v9 = vmul.f32 1.442695, %v4844_v1 }
 0x1dd   : > { %v4050_v36 = vmax.f32 %v4045_v42, %v955_v44  ;;  %469 = vst.msk [vmem:[#allocation4 + $0x90] sm:$0xff] %vm450_vm2, %v4826_v45  ;;  %470 = vst.msk [vmem:[#allocation4 + $0x98] sm:$0xff] %vm450_vm2, %v4826_v45  ;;  %v4136_v23 = vpop.eup %3123 }
 0x1de   : > { %471 = vst.msk [vmem:[#allocation4 + $0xa0] sm:$0xff] %vm450_vm2, %v4826_v45  ;;  %472 = vst.msk [vmem:[#allocation4 + $0xa8] sm:$0xff] %vm450_vm2, %v4826_v45  ;;  %v958_v41 = vpop.xlane.xlu1 %957  ;;  %v4144_v54 = vpop.eup %3125 }
 0x1df   : > { %473 = vst.msk [vmem:[#allocation4 + $0xb0] sm:$0xff] %vm450_vm2, %v4826_v45  ;;  %474 = vst.msk [vmem:[#allocation4 + $0xb8] sm:$0xff] %vm450_vm2, %v4826_v45  ;;  %v4122_v51 = vmax.f32 %v4047_v16, %v958_v41  ;;  %1227 = vperm.xlu1 %3085, %v4050_v36  }
 0x1e0   : > { %475 = vst.msk [vmem:[#allocation4 + $0xc0] sm:$0xff] %vm450_vm2, %v4826_v45  ;;  %476 = vst.msk [vmem:[#allocation4 + $0xc8] sm:$0xff] %vm450_vm2, %v4826_v45 }
 0x1e1   : > { %477 = vst.msk [vmem:[#allocation4 + $0xd0] sm:$0xff] %vm450_vm2, %v4826_v45  ;;  %478 = vst.msk [vmem:[#allocation4 + $0xd8] sm:$0xff] %vm450_vm2, %v4826_v45  ;;  %1232 = vperm.xlu0 %3084, %v4122_v51   ;;  %v4164_v10 = vpop.eup %3127 }
 0x1e2   : > { %479 = vst.msk [vmem:[#allocation4 + $0xe0] sm:$0xff] %vm450_vm2, %v4826_v45  ;;  %480 = vst.msk [vmem:[#allocation4 + $0xe8] sm:$0xff] %vm450_vm2, %v4826_v45  ;;  %v4172_v4 = vpop.eup %3129 }
 0x1e3   : > { %481 = vst.msk [vmem:[#allocation4 + $0xf0] sm:$0xff] %vm450_vm2, %v4826_v45  ;;  %482 = vst.msk [vmem:[#allocation4 + $0xf8] sm:$0xff] %vm450_vm2, %v4826_v45  ;;  %1753 = vperm.xlu1 %3085, %v4131_v62   ;;  %v4138_v45 = vld [vmem:[#allocation2 + $0xd8] sm:$0xff] }
 0x1e4   : > { %2316 = vst.msk [vmem:[#allocation2 + $0xc0] sm:$0xff] %vm385_vm1, %v4050_v36  ;;  %2317 = vst.msk [vmem:[#allocation2 + $0xc8] sm:$0xff] %vm385_vm1, %v4122_v51  ;;  %v961_v44 = vpop.xlane.xlu0 %960 }
 0x1e5   : > { %1748 = vperm.xlu0 %3084, %v4136_v23   ;;  %v4142_v50 = vmax.f32 %v4133_v29, %v961_v44  ;;  %4829 = vst [vmem:[#allocation60_spill] sm:$0xff] %v4144_v54  ;;  %v1053_v44 = vmul.f32 1.442695, %v4831_v14  ;;  %4832 = vst [vmem:[#allocation61_spill] sm:$0xff] %v4164_v10  ;;  %v1055_v14 = vmul.f32 1.442695, %v4834_v8 }
 0x1e6   : > { %v964_v41 = vpop.xlane.xlu1 %963  ;;  %4833 = vst [vmem:[#allocation62_spill] sm:$0xff] %v4172_v4  ;;  %v4192_v8 = vld [vmem:[#allocation2 + $0xf0] sm:$0xff] }
 0x1e7   : > { %2318 = vst.msk [vmem:[#allocation2 + $0xd0] sm:$0xff] %vm385_vm1, %v4142_v50  ;;  %v4152_v47 = vmax.f32 %v4138_v45, %v964_v41  ;;  %1758 = vperm.xlu1 %3085, %v4144_v54   ;;  %3133 = vpow2.f32 %v1053_v44  ;;  %v4166_v41 = vld [vmem:[#allocation2 + $0xe8] sm:$0xff] }
 0x1e8   : > { %3135 = vpow2.f32 %v1055_v14 }
 0x1e9   : > { %2319 = vst.msk [vmem:[#allocation2 + $0xd8] sm:$0xff] %vm385_vm1, %v4152_v47  ;;  %1242 = vperm.xlu0 %3084, %v4152_v47  }
 0x1eb   : > { %1237 = vperm.xlu1 %3085, %v4142_v50  }
 0x1ec   : > { %v967_v38 = vpop.xlane.xlu0 %966 }
 0x1ed   : > { %1763 = vperm.xlu0 %3084, %v4164_v10   ;;  %v4170_v35 = vmax.f32 %v4161_v37, %v967_v38  ;;  %v4835_v10 = vsub.f32 %v3887_v60, %v3893_v19  ;;  %v4837_v19 = vsub.f32 %v3908_v43, %v3913_v13  ;;  %v4839_v43 = vsub.f32 %v3928_v15, %v3933_v7 }
 0x1ee   : > { %v970_v54 = vpop.xlane.xlu1 %969  ;;  %v4842_v7 = vsub.f32 %v3950_v6, %v3960_v5 }
 0x1ef   : > { %2320 = vst.msk [vmem:[#allocation2 + $0xe0] sm:$0xff] %vm385_vm1, %v4170_v35  ;;  %v4180_v44 = vmax.f32 %v4166_v41, %v970_v54  ;;  %1768 = vperm.xlu1 %3085, %v4172_v4   ;;  %v1057_v38 = vmul.f32 1.442695, %v4835_v10  ;;  %v4195_v54 = vpop.eup %3131  ;;  %v1061_v60 = vmul.f32 1.442695, %v4837_v19  ;;  %v4200_v4 = vld [vmem:[#allocation2 + $0xf8] sm:$0xff] }
 0x1f0   : > { %v1065_v19 = vmul.f32 1.442695, %v4839_v43  ;;  %v1071_v15 = vmul.f32 1.442695, %v4842_v7 }
 0x1f1   : > { %2321 = vst.msk [vmem:[#allocation2 + $0xe8] sm:$0xff] %vm385_vm1, %v4180_v44  ;;  %1252 = vperm.xlu0 %3084, %v4180_v44   ;;  %3137 = vpow2.f32 %v1057_v38  ;;  %v4206_v2 = vpop.eup %3133 }
 0x1f2   : > { %3139 = vpow2.f32 %v1059_v48  ;;  %v4840_v48 = vsub.f32 %v3930_v12, %v3940_v11  ;;  %v4235_v11 = vpop.eup %3135  ;;  %v4843_v12 = vsub.f32 %v3968_v3, %v3973_v59 }
 0x1f3   : > { %1247 = vperm.xlu1 %3085, %v4170_v35   ;;  %3141 = vpow2.f32 %v1061_v60  ;;  %v1027_v60 = vsub.f32 %v3988_v61, %v3993_v53  ;;  %v1028_v53 = vsub.f32 %v3990_v58, %v3998_v52  ;;  %v1029_v61 = vsub.f32 %v4004_v57, %v4009_v55 }
 0x1f4   : > { %v973_v10 = vpop.xlane.xlu0 %972  ;;  %3143 = vpow2.f32 %v1063_v25  ;;  %v1073_v56 = vmul.f32 1.442695, %v4843_v12  ;;  %v1033_v12 = vsub.f32 %v4045_v42, %v4050_v36 }
 0x1f5   : > { %1773 = vperm.xlu0 %3084, %v4195_v54   ;;  %v4204_v14 = vmax.f32 %v4192_v8, %v973_v10  ;;  %v1067_v10 = vmul.f32 1.442695, %v4840_v48  ;;  %3145 = vpow2.f32 %v1065_v19  ;;  %v1077_v6 = vmul.f32 1.442695, %v1027_v60 }
 0x1f6   : > { %v976_v38 = vpop.xlane.xlu1 %975  ;;  %v1079_v52 = vmul.f32 1.442695, %v1028_v53  ;;  %v1081_v57 = vmul.f32 1.442695, %v1029_v61  ;;  %v1031_v48 = vsub.f32 %v4020_v46, %v4028_v39  ;;  %v1089_v61 = vmul.f32 1.442695, %v1033_v12 }
 0x1f7   : > { %2322 = vst.msk [vmem:[#allocation2 + $0xf0] sm:$0xff] %vm385_vm1, %v4204_v14  ;;  %v4214_v13 = vmax.f32 %v4200_v4, %v976_v38  ;;  %1778 = vperm.xlu1 %3085, %v4206_v2   ;;  %3147 = vpow2.f32 %v1067_v10 }
 0x1f8   : > { %3149 = vpow2.f32 %v1069_v18 }
 0x1f9   : > { %2323 = vst.msk [vmem:[#allocation2 + $0xf8] sm:$0xff] %vm385_vm1, %v4214_v13  ;;  %1262 = vperm.xlu0 %3084, %v4214_v13   ;;  %3151 = vpow2.f32 %v1071_v15  ;;  %v1085_v15 = vmul.f32 1.442695, %v1031_v48 }
 0x1fa   : > { %3153 = vpow2.f32 %v1073_v56 }
 0x1fb   : > { %1257 = vperm.xlu1 %3085, %v4204_v14   ;;  %v4246_v5 = vpop.eup %3137  ;;  %3155 = vpow2.f32 %v1075_v9 }
 0x1fc   : > { %v4253_v63 = vpop.eup %3139  ;;  %3157 = vpow2.f32 %v1077_v6 }
 0x1fd   : > { %1783 = vperm.xlu0 %3084, %v4235_v11   ;;  %v4256_v38 = vpop.eup %3141 }
 0x1fe   : > { %v1108_v25 = vpop.permute.xlu0 %1107  ;;  %v4263_v19 = vpop.eup %3143 }
 0x1ff   : > { %v1265_v59 = vsub.f32 %v3536_v20, %v1108_v25  ;;  %v1266_v3 = vsub.f32 %v3538_v21, %v1108_v25  ;;  %1788 = vperm.xlu1 %3085, %v4246_v5   ;;  %v1030_v20 = vsub.f32 %v4006_v49, %v4014_v31  ;;  %v4268_v49 = vpop.eup %3145 }
 0x201   : > { %v1329_v58 = vmul.f32 1.442695, %v1265_v59  ;;  %v1331_v0 = vmul.f32 1.442695, %v1266_v3  ;;  %1793 = vperm.xlu0 %3084, %v4253_v63   ;;  %v1083_v31 = vmul.f32 1.442695, %v1030_v20  ;;  %v4272_v18 = vpop.eup %3147 }
 0x202   : > { %v1113_v55 = vpop.permute.xlu1 %1112  ;;  %v4277_v39 = vpop.eup %3149 }
 0x203   : > { %3159 = vpow2.f32 %v1329_v58  ;;  %v1267_v21 = vsub.f32 %v3540_v22, %v1113_v55  ;;  %v1268_v43 = vsub.f32 %v3544_v24, %v1113_v55  ;;  %1798 = vperm.xlu1 %3085, %v4256_v38   ;;  %v1032_v22 = vsub.f32 %v4025_v40, %v4036_v34  ;;  %v4279_v46 = vpop.eup %3151 }
 0x204   : > { %3161 = vpow2.f32 %v1331_v0  ;;  %v4284_v56 = vpop.eup %3153 }
 0x205   : > { %3163 = vpow2.f32 %v1079_v52  ;;  %v1333_v10 = vmul.f32 1.442695, %v1267_v21  ;;  %v1335_v17 = vmul.f32 1.442695, %v1268_v43  ;;  %1803 = vperm.xlu0 %3084, %v4263_v19   ;;  %v4288_v9 = vpop.eup %3155 }
 0x206   : > { %3165 = vpow2.f32 %v1081_v57  ;;  %v1118_v24 = vpop.permute.xlu1 %1117  ;;  %v4293_v42 = vpop.eup %3157 }
 0x207   : > { %3167 = vpow2.f32 %v1333_v10  ;;  %v1269_v60 = vsub.f32 %v3548_v26, %v1118_v24  ;;  %v1270_v7 = vsub.f32 %v3550_v27, %v1118_v24  ;;  %1808 = vperm.xlu1 %3085, %v4268_v49   ;;  %v1087_v26 = vmul.f32 1.442695, %v1032_v22  ;;  %v4845_v10 = vld [vmem:[#allocation6_spill] sm:$0xff] }
 0x208   : > { %3169 = vpow2.f32 %v1335_v17  ;;  %v1034_v27 = vsub.f32 %v4047_v16, %v4122_v51 }
 0x209   : > { %v1337_v34 = vmul.f32 1.442695, %v1269_v60  ;;  %v1339_v40 = vmul.f32 1.442695, %v1270_v7  ;;  %1813 = vperm.xlu0 %3084, %v4272_v18   ;;  %3171 = vpow2.f32 %v1083_v31  ;;  %v4846_v31 = vld [vmem:[#allocation7_spill] sm:$0xff] }
 0x20a   : > { %v1123_v1 = vpop.permute.xlu1 %1122  ;;  %v1091_v51 = vmul.f32 1.442695, %v1034_v27 }
 0x20b   : > { %3173 = vpow2.f32 %v1337_v34  ;;  %v1271_v53 = vsub.f32 %v3552_v28, %v1123_v1  ;;  %v1272_v6 = vsub.f32 %v3556_v30, %v1123_v1  ;;  %1818 = vperm.xlu1 %3085, %v4277_v39   ;;  %v1035_v28 = vsub.f32 %v4133_v29, %v4142_v50  ;;  %v4847_v1 = vld [vmem:[#allocation8_spill] sm:$0xff] }
 0x20c   : > { %3175 = vpow2.f32 %v1339_v40  ;;  %v1036_v29 = vsub.f32 %v4138_v45, %v4152_v47  ;;  %v1039_v40 = vsub.f32 %v4192_v8, %v4204_v14 }
 0x20d   : > { %v3160_v36 = vpop.eup %3159  ;;  %3177 = vpow2.f32 %v1085_v15  ;;  %v1341_v25 = vmul.f32 1.442695, %v1271_v53  ;;  %v1343_v59 = vmul.f32 1.442695, %v1272_v6  ;;  %1823 = vperm.xlu0 %3084, %v4279_v46   ;;  %v4848_v6 = vld [vmem:[#allocation9_spill] sm:$0xff] }
 0x20e   : > { %v3162_v16 = vpop.eup %3161  ;;  %3179 = vpow2.f32 %v1087_v26  ;;  %v1128_v3 = vpop.permute.xlu1 %1127  ;;  %v1095_v7 = vmul.f32 1.442695, %v1036_v29  ;;  %v4850_v29 = vld [vmem:[#allocation11_spill] sm:$0xff] }
 0x20f   : > { %v4298_v30 = vpop.eup %3163  ;;  %3181 = vpow2.f32 %v1341_v25  ;;  %v1273_v52 = vsub.f32 %v3560_v32, %v1128_v3  ;;  %v1274_v58 = vsub.f32 %v3562_v33, %v1128_v3  ;;  %1828 = vperm.xlu1 %3085, %v4284_v56   ;;  %v4303_v0 = vadd.f32 %v3162_v16, %v3160_v36 }
 0x210   : > { %v4305_v57 = vpop.eup %3165  ;;  %3183 = vpow2.f32 %v1343_v59  ;;  %v1093_v32 = vmul.f32 1.442695, %v1035_v28  ;;  %v1037_v33 = vsub.f32 %v4161_v37, %v4170_v35  ;;  %v1038_v37 = vsub.f32 %v4166_v41, %v4180_v44 }
 0x211   : > { %v3168_v20 = vpop.eup %3167  ;;  %3185 = vpow2.f32 %v1089_v61  ;;  %v1345_v50 = vmul.f32 1.442695, %v1273_v52  ;;  %v1347_v55 = vmul.f32 1.442695, %v1274_v58  ;;  %1833 = vperm.xlu0 %3084, %v4288_v9   ;;  %v4849_v58 = vld [vmem:[#allocation10_spill] sm:$0xff] }
 0x212   : > { %v3170_v21 = vpop.eup %3169  ;;  %3187 = vpow2.f32 %v1091_v51  ;;  %v1133_v43 = vpop.permute.xlu1 %1132  ;;  %v1938_v48 = vpack.c.bf16 %v3168_v20, %v3160_v36  ;;  %v1097_v34 = vmul.f32 1.442695, %v1037_v33  ;;  %v1099_v25 = vmul.f32 1.442695, %v1038_v37 }
 0x213   : > { %3189 = vpow2.f32 %v1345_v50  ;;  %v1275_v17 = vsub.f32 %v4845_v10, %v1133_v43  ;;  %v1276_v22 = vsub.f32 %v4846_v31, %v1133_v43  ;;  %1838 = vperm.xlu1 %3085, %v4293_v42   ;;  %v1939_v45 = vpack.c.bf16 %v3170_v21, %v3162_v16  ;;  %v4315_v47 = vpop.eup %3171 }
 0x214   : > { %3191 = vpow2.f32 %v1347_v55  ;;  %v4317_v24 = vadd.f32 %v3170_v21, %v3168_v20  ;;  %v1101_v16 = vmul.f32 1.442695, %v1039_v40  ;;  %v1040_v51 = vsub.f32 %v4200_v4, %v4214_v13 }
 0x215   : > { %v3174_v60 = vpop.eup %3173  ;;  %v1349_v35 = vmul.f32 1.442695, %v1275_v17  ;;  %v1351_v15 = vmul.f32 1.442695, %v1276_v22  ;;  %2098 = vmatprep.mubr.bf16.mxu0 %v1939_v45  ;;  %1843 = vperm.xlu0 %3084, %v4298_v30   ;;  %3193 = vpow2.f32 %v1093_v32  ;;  %v4851_v17 = vld [vmem:[#allocation12_spill] sm:$0xff]  ;;  %v4852_v22 = vld [vmem:[#allocation13_spill] sm:$0xff] }
 0x216   : > { %v3176_v12 = vpop.eup %3175  ;;  %2099 = vmatmul.mubr.bf16.vlgmr.msra.gmra.mrb[64].mxu0 %v1938_v48  ;;  %v1138_v26 = vpop.permute.xlu1 %1137  ;;  %v1103_v48 = vmul.f32 1.442695, %v1040_v51 }
 0x217   : > { %v4324_v27 = vpop.eup %3177  ;;  %3195 = vpow2.f32 %v1349_v35  ;;  %v1277_v53 = vsub.f32 %v4847_v1, %v1138_v26  ;;  %v1278_v41 = vsub.f32 %v4848_v6, %v1138_v26  ;;  %1848 = vperm.xlu1 %3085, %v4305_v57   ;;  %v4329_v44 = vadd.f32 %v3176_v12, %v3174_v60  ;;  %v4854_v26 = vld [vmem:[#allocation15_spill] sm:$0xff] }
 0x218   : > { %v4331_v36 = vpop.eup %3179  ;;  %3197 = vpow2.f32 %v1351_v15 }
 0x219   : > { %v3182_v61 = vpop.eup %3181  ;;  %3199 = vpow2.f32 %v1095_v7  ;;  %v1353_v8 = vmul.f32 1.442695, %v1277_v53  ;;  %v1355_v14 = vmul.f32 1.442695, %v1278_v41  ;;  %1853 = vperm.xlu0 %3084, %v4315_v47  }
 0x21a   : > { %v3184_v59 = vpop.eup %3183  ;;  %3201 = vpow2.f32 %v1097_v34  ;;  %v1143_v28 = vpop.permute.xlu1 %1142  ;;  %v1940_v3 = vpack.c.bf16 %v3182_v61, %v3174_v60  ;;  %v4853_v34 = vld [vmem:[#allocation14_spill] sm:$0xff] }
 0x21b   : > { %v4336_v52 = vpop.eup %3185  ;;  %3203 = vpow2.f32 %v1353_v8  ;;  %v1279_v20 = vsub.f32 %v4849_v58, %v1143_v28  ;;  %v1280_v50 = vsub.f32 %v4850_v29, %v1143_v28  ;;  %1858 = vperm.xlu1 %3085, %v4324_v27   ;;  %v1941_v55 = vpack.c.bf16 %v3184_v59, %v3176_v12  ;;  %v4855_v58 = vld [vmem:[#allocation16_spill] sm:$0xff]  ;;  %v4856_v29 = vld [vmem:[#allocation17_spill] sm:$0xff] }
 0x21c   : > { %v4341_v21 = vpop.eup %3187  ;;  %3205 = vpow2.f32 %v1355_v14  ;;  %v4343_v32 = vadd.f32 %v3184_v59, %v3182_v61 }
 0x21d   : > { %v3190_v33 = vpop.eup %3189  ;;  %3207 = vpow2.f32 %v1099_v25  ;;  %v1357_v4 = vmul.f32 1.442695, %v1279_v20  ;;  %v1359_v13 = vmul.f32 1.442695, %v1280_v50  ;;  %2106 = vmatprep.mubr.bf16.mxu1 %v1941_v55  ;;  %1863 = vperm.xlu0 %3084, %v4331_v36  }
 0x21e   : > { %v3192_v43 = vpop.eup %3191  ;;  %3209 = vpow2.f32 %v1101_v16  ;;  %2107 = vmatmul.mubr.bf16.vlgmr.msra.gmra.mrb[0].mxu1 %v1940_v3  ;;  %v1148_v10 = vpop.permute.xlu1 %1147 }
 0x21f   : > { %3211 = vpow2.f32 %v1357_v4  ;;  %v1281_v31 = vsub.f32 %v4851_v17, %v1148_v10  ;;  %v1282_v45 = vsub.f32 %v4852_v22, %v1148_v10  ;;  %1868 = vperm.xlu1 %3085, %v4336_v52   ;;  %v4349_v60 = vadd.f32 %v3192_v43, %v3190_v33  ;;  %v4351_v7 = vpop.eup %3193  ;;  %v4858_v10 = vld [vmem:[#allocation18_spill] sm:$0xff] }
 0x220   : > { %3213 = vpow2.f32 %v1359_v13  ;;  %v1153_v37 = vpop.permute.xlu0 %1152 }
 0x221   : > { %v3196_v35 = vpop.eup %3195  ;;  %v1361_v15 = vmul.f32 1.442695, %v1281_v31  ;;  %v1363_v12 = vmul.f32 1.442695, %v1282_v45  ;;  %v1283_v40 = vsub.f32 %v4853_v34, %v1153_v37  ;;  %v1284_v1 = vsub.f32 %v4854_v26, %v1153_v37  ;;  %1873 = vperm.xlu0 %3084, %v4341_v21   ;;  %v4859_v31 = vld [vmem:[#allocation19_spill] sm:$0xff] }
 0x222   : > { %v3198_v53 = vpop.eup %3197  ;;  %3215 = vpow2.f32 %v1103_v48  ;;  %v1942_v6 = vpack.c.bf16 %v3196_v35, %v3190_v33 }
 0x223   : > { %v4356_v41 = vpop.eup %3199  ;;  %3217 = vpow2.f32 %v1361_v15  ;;  %v1365_v61 = vmul.f32 1.442695, %v1283_v40  ;;  %v1367_v25 = vmul.f32 1.442695, %v1284_v1  ;;  %1878 = vperm.xlu1 %3085, %v4351_v7   ;;  %v1943_v8 = vpack.c.bf16 %v3198_v53, %v3192_v43 }
 0x224   : > { %v4359_v14 = vpop.eup %3201  ;;  %3219 = vpow2.f32 %v1363_v12  ;;  %v4361_v59 = vadd.f32 %v3198_v53, %v3196_v35 }
 0x225   : > { %v3204_v16 = vpop.eup %3203  ;;  %3221 = vpow2.f32 %v1365_v61  ;;  %2114 = vmatprep.mubr.bf16.mxu1 %v1943_v8  ;;  %1883 = vperm.xlu0 %3084, %v4356_v41   ;;  %v4860_v61 = vld [vmem:[#allocation20_spill] sm:$0xff]  ;;  %v4861_v8 = vld [vmem:[#allocation21_spill] sm:$0xff] }
 0x226   : > { %v3206_v51 = vpop.eup %3205  ;;  %3223 = vpow2.f32 %v1367_v25  ;;  %2115 = vmatmul.mubr.bf16.gmra.mrb[4].mxu1 %v1942_v6  ;;  %v1158_v28 = vpop.permute.xlu1 %1157 }
 0x227   : > { %v4364_v3 = vpop.eup %3207  ;;  %v1285_v20 = vsub.f32 %v4855_v58, %v1158_v28  ;;  %v1286_v50 = vsub.f32 %v4856_v29, %v1158_v28  ;;  %1888 = vperm.xlu1 %3085, %v4359_v14   ;;  %v4369_v55 = vadd.f32 %v3206_v51, %v3204_v16 }
 0x228   : > { %v4371_v33 = vpop.eup %3209  ;;  %v1163_v4 = vpop.permute.xlu0 %1162 }
 0x229   : > { %4857 = vst [vmem:[#allocation6_spill] sm:$0xff] %v4371_v33  ;;  %v3212_v13 = vpop.eup %3211  ;;  %v1369_v43 = vmul.f32 1.442695, %v1285_v20  ;;  %v1371_v48 = vmul.f32 1.442695, %v1286_v50  ;;  %v1287_v17 = vsub.f32 %v4858_v10, %v1163_v4  ;;  %v1288_v22 = vsub.f32 %v4859_v31, %v1163_v4  ;;  %1893 = vperm.xlu0 %3084, %v4364_v3   ;;  %v4862_v4 = vld [vmem:[#allocation22_spill] sm:$0xff] }
 0x22a   : > { %v3214_v45 = vpop.eup %3213  ;;  %v1944_v37 = vpack.c.bf16 %v3212_v13, %v3204_v16 }
 0x22b   : > { %3225 = vpow2.f32 %v1369_v43  ;;  %v1373_v35 = vmul.f32 1.442695, %v1287_v17  ;;  %v1375_v15 = vmul.f32 1.442695, %v1288_v22  ;;  %1898 = vperm.xlu1 %3085, %v4371_v33   ;;  %v1945_v12 = vpack.c.bf16 %v3214_v45, %v3206_v51  ;;  %v4863_v43 = vld [vmem:[#allocation23_spill] sm:$0xff] }
 0x22c   : > { %v4377_v34 = vpop.eup %3215  ;;  %3227 = vpow2.f32 %v1371_v48  ;;  %v4379_v40 = vadd.f32 %v3214_v45, %v3212_v13 }
 0x22d   : > { %v3218_v26 = vpop.eup %3217  ;;  %3229 = vpow2.f32 %v1373_v35  ;;  %2122 = vmatprep.mubr.bf16.mxu1 %v1945_v12  ;;  %1903 = vperm.xlu0 %3084, %v4377_v34   ;;  %v4864_v12 = vld [vmem:[#allocation24_spill] sm:$0xff] }
 0x22e   : > { %v3220_v1 = vpop.eup %3219  ;;  %3231 = vpow2.f32 %v1375_v15  ;;  %2123 = vmatmul.mubr.bf16.gmra.mrb[8].mxu1 %v1944_v37  ;;  %v1168_v53 = vpop.permute.xlu1 %1167 }
 0x22f   : > { %v3222_v6 = vpop.eup %3221  ;;  %v1289_v25 = vsub.f32 %v4860_v61, %v1168_v53  ;;  %v1290_v16 = vsub.f32 %v4861_v8, %v1168_v53  ;;  %v4384_v51 = vadd.f32 %v3220_v1, %v3218_v26  ;;  %v4865_v53 = vld [vmem:[#allocation25_spill] sm:$0xff] }
 0x230   : > { %v3224_v28 = vpop.eup %3223  ;;  %v1173_v58 = vpop.permute.xlu0 %1172  ;;  %v1946_v20 = vpack.c.bf16 %v3222_v6, %v3218_v26 }
 0x231   : > { %v1377_v29 = vmul.f32 1.442695, %v1289_v25  ;;  %v1379_v50 = vmul.f32 1.442695, %v1290_v16  ;;  %v1291_v13 = vsub.f32 %v4862_v4, %v1173_v58  ;;  %v1292_v48 = vsub.f32 %v4863_v43, %v1173_v58  ;;  %v4866_v58 = vld [vmem:[#allocation26_spill] sm:$0xff] }
 0x232   : > { %v1947_v10 = vpack.c.bf16 %v3224_v28, %v3220_v1  ;;  %v4388_v17 = vadd.f32 %v3224_v28, %v3222_v6 }
 0x233   : > { %3233 = vpow2.f32 %v1377_v29  ;;  %v1381_v31 = vmul.f32 1.442695, %v1291_v13  ;;  %v1383_v22 = vmul.f32 1.442695, %v1292_v48 }
 0x234   : > { %3235 = vpow2.f32 %v1379_v50  ;;  %2130 = vmatprep.mubr.bf16.mxu1 %v1947_v10  ;;  %v4867_v50 = vld [vmem:[#allocation27_spill] sm:$0xff] }
 0x235   : > { %v3226_v45 = vpop.eup %3225  ;;  %3237 = vpow2.f32 %v1381_v31 }
 0x236   : > { %v3228_v37 = vpop.eup %3227  ;;  %3239 = vpow2.f32 %v1383_v22  ;;  %2131 = vmatmul.mubr.bf16.gmra.mrb[12].mxu1 %v1946_v20  ;;  %v1178_v35 = vpop.permute.xlu1 %1177 }
 0x237   : > { %v3230_v15 = vpop.eup %3229  ;;  %v1293_v26 = vsub.f32 %v4864_v12, %v1178_v35  ;;  %v1294_v61 = vsub.f32 %v4865_v53, %v1178_v35  ;;  %v4392_v25 = vadd.f32 %v3228_v37, %v3226_v45  ;;  %v4868_v35 = vld [vmem:[#allocation28_spill] sm:$0xff] }
 0x238   : > { %v3232_v1 = vpop.eup %3231  ;;  %v1183_v6 = vpop.permute.xlu0 %1182  ;;  %v1948_v8 = vpack.c.bf16 %v3230_v15, %v3226_v45 }
 0x239   : > { %v1385_v16 = vmul.f32 1.442695, %v1293_v26  ;;  %v1387_v28 = vmul.f32 1.442695, %v1294_v61  ;;  %v1295_v29 = vsub.f32 %v4866_v58, %v1183_v6  ;;  %v1296_v4 = vsub.f32 %v4867_v50, %v1183_v6  ;;  %v4869_v26 = vld [vmem:[#allocation29_spill] sm:$0xff] }
 0x23a   : > { %v1949_v13 = vpack.c.bf16 %v3232_v1, %v3228_v37  ;;  %v4396_v43 = vadd.f32 %v3232_v1, %v3230_v15 }
 0x23b   : > { %3241 = vpow2.f32 %v1385_v16  ;;  %v1389_v20 = vmul.f32 1.442695, %v1295_v29  ;;  %v1391_v48 = vmul.f32 1.442695, %v1296_v4  ;;  %v4871_v29 = vld [vmem:[#allocation31_spill] sm:$0xff] }
 0x23c   : > { %3243 = vpow2.f32 %v1387_v28  ;;  %2138 = vmatprep.mubr.bf16.mxu1 %v1949_v13  ;;  %v4870_v28 = vld [vmem:[#allocation30_spill] sm:$0xff] }
 0x23d   : > { %v3234_v10 = vpop.eup %3233  ;;  %3245 = vpow2.f32 %v1389_v20 }
 0x23e   : > { %v3236_v31 = vpop.eup %3235  ;;  %3247 = vpow2.f32 %v1391_v48  ;;  %2139 = vmatmul.mubr.bf16.gmra.mrb[16].mxu1 %v1948_v8  ;;  %v1188_v22 = vpop.permute.xlu1 %1187 }
 0x23f   : > { %v3238_v45 = vpop.eup %3237  ;;  %v1297_v12 = vsub.f32 %v4868_v35, %v1188_v22  ;;  %v1298_v53 = vsub.f32 %v4869_v26, %v1188_v22  ;;  %v4400_v61 = vadd.f32 %v3236_v31, %v3234_v10 }
 0x240   : > { %v3240_v37 = vpop.eup %3239  ;;  %v1193_v15 = vpop.permute.xlu0 %1192  ;;  %v1950_v1 = vpack.c.bf16 %v3238_v45, %v3234_v10 }
 0x241   : > { %v1393_v6 = vmul.f32 1.442695, %v1297_v12  ;;  %v1395_v16 = vmul.f32 1.442695, %v1298_v53  ;;  %v1299_v58 = vsub.f32 %v4870_v28, %v1193_v15  ;;  %v1300_v50 = vsub.f32 %v4871_v29, %v1193_v15  ;;  %v4872_v12 = vld [vmem:[#allocation32_spill] sm:$0xff]  ;;  %v4873_v53 = vld [vmem:[#allocation33_spill] sm:$0xff] }
 0x242   : > { %v1951_v4 = vpack.c.bf16 %v3240_v37, %v3236_v31  ;;  %v4404_v13 = vadd.f32 %v3240_v37, %v3238_v45 }
 0x243   : > { %3249 = vpow2.f32 %v1393_v6  ;;  %v1397_v8 = vmul.f32 1.442695, %v1299_v58  ;;  %v1399_v20 = vmul.f32 1.442695, %v1300_v50  ;;  %v4875_v50 = vld [vmem:[#allocation35_spill] sm:$0xff] }
 0x244   : > { %3251 = vpow2.f32 %v1395_v16  ;;  %2146 = vmatprep.mubr.bf16.mxu1 %v1951_v4  ;;  %v4874_v16 = vld [vmem:[#allocation34_spill] sm:$0xff] }
 0x245   : > { %v3242_v48 = vpop.eup %3241  ;;  %3253 = vpow2.f32 %v1397_v8 }
 0x246   : > { %v3244_v22 = vpop.eup %3243  ;;  %3255 = vpow2.f32 %v1399_v20  ;;  %2147 = vmatmul.mubr.bf16.gmra.mrb[20].mxu1 %v1950_v1  ;;  %v1198_v10 = vpop.permute.xlu1 %1197 }
 0x247   : > { %v3246_v35 = vpop.eup %3245  ;;  %v1301_v26 = vsub.f32 %v4872_v12, %v1198_v10  ;;  %v1302_v28 = vsub.f32 %v4873_v53, %v1198_v10  ;;  %v4408_v15 = vadd.f32 %v3244_v22, %v3242_v48  ;;  %v4876_v53 = vld [vmem:[#allocation36_spill] sm:$0xff] }
 0x248   : > { %v3248_v31 = vpop.eup %3247  ;;  %v1203_v45 = vpop.permute.xlu0 %1202  ;;  %v1952_v37 = vpack.c.bf16 %v3246_v35, %v3242_v48 }
 0x249   : > { %v1401_v6 = vmul.f32 1.442695, %v1301_v26  ;;  %v1403_v58 = vmul.f32 1.442695, %v1302_v28  ;;  %v1303_v29 = vsub.f32 %v4874_v16, %v1203_v45  ;;  %v1304_v4 = vsub.f32 %v4875_v50, %v1203_v45  ;;  %v4877_v45 = vld [vmem:[#allocation37_spill] sm:$0xff] }
 0x24a   : > { %v1953_v8 = vpack.c.bf16 %v3248_v31, %v3244_v22  ;;  %v4412_v20 = vadd.f32 %v3248_v31, %v3246_v35 }
 0x24b   : > { %3257 = vpow2.f32 %v1401_v6  ;;  %v1405_v1 = vmul.f32 1.442695, %v1303_v29  ;;  %v1407_v33 = vmul.f32 1.442695, %v1304_v4  ;;  %v4878_v29 = vld [vmem:[#allocation38_spill] sm:$0xff] }
 0x24c   : > { %3259 = vpow2.f32 %v1403_v58  ;;  %2154 = vmatprep.mubr.bf16.mxu1 %v1953_v8  ;;  %1525 = vadd.xlane.f32.xlu0 %v4317_v24 }
 0x24d   : > { %v3250_v10 = vpop.eup %3249  ;;  %3261 = vpow2.f32 %v1405_v1 }
 0x24e   : > { %v3252_v12 = vpop.eup %3251  ;;  %3263 = vpow2.f32 %v1407_v33  ;;  %2155 = vmatmul.mubr.bf16.gmra.mrb[24].mxu1 %v1952_v37  ;;  %v1208_v48 = vpop.permute.xlu1 %1207  ;;  %v4879_v37 = vld [vmem:[#allocation39_spill] sm:$0xff] }
 0x24f   : > { %v3254_v26 = vpop.eup %3253  ;;  %v1305_v28 = vsub.f32 %v4876_v53, %v1208_v48  ;;  %v1306_v22 = vsub.f32 %v4877_v45, %v1208_v48  ;;  %1522 = vadd.xlane.f32.xlu1 %v4303_v0  ;;  %v4418_v35 = vadd.f32 %v3252_v12, %v3250_v10 }
 0x250   : > { %v3256_v31 = vpop.eup %3255  ;;  %v1213_v6 = vpop.permute.xlu0 %1212  ;;  %1528 = vadd.xlane.f32.xlu0 %v4329_v44  ;;  %v1954_v24 = vpack.c.bf16 %v3254_v26, %v3250_v10 }
 0x251   : > { %v1409_v58 = vmul.f32 1.442695, %v1305_v28  ;;  %v1411_v16 = vmul.f32 1.442695, %v1306_v22  ;;  %v1307_v33 = vsub.f32 %v4878_v29, %v1213_v6  ;;  %v1308_v50 = vsub.f32 %v4879_v37, %v1213_v6  ;;  %v4880_v28 = vld [vmem:[#allocation40_spill] sm:$0xff] }
 0x252   : > { %v1955_v4 = vpack.c.bf16 %v3256_v31, %v3252_v12  ;;  %v4423_v8 = vadd.f32 %v3256_v31, %v3254_v26  ;;  %v4881_v26 = vld [vmem:[#allocation41_spill] sm:$0xff] }
 0x253   : > { %3265 = vpow2.f32 %v1409_v58  ;;  %v1413_v1 = vmul.f32 1.442695, %v1307_v33  ;;  %v1415_v48 = vmul.f32 1.442695, %v1308_v50  ;;  %1531 = vadd.xlane.f32.xlu1 %v4343_v32 }
 0x254   : > { %3267 = vpow2.f32 %v1411_v16  ;;  %2162 = vmatprep.mubr.bf16.mxu1 %v1955_v4  ;;  %1534 = vadd.xlane.f32.xlu0 %v4349_v60  ;;  %v4882_v16 = vld [vmem:[#allocation42_spill] sm:$0xff] }
 0x255   : > { %v3258_v0 = vpop.eup %3257  ;;  %3269 = vpow2.f32 %v1413_v1 }
 0x256   : > { %v3260_v44 = vpop.eup %3259  ;;  %3271 = vpow2.f32 %v1415_v48  ;;  %2163 = vmatmul.mubr.bf16.gmra.mrb[28].mxu1 %v1954_v24  ;;  %v1218_v10 = vpop.permute.xlu1 %1217  ;;  %v4883_v24 = vld [vmem:[#allocation43_spill] sm:$0xff] }
 0x257   : > { %v3262_v53 = vpop.eup %3261  ;;  %v1309_v12 = vsub.f32 %v4880_v28, %v1218_v10  ;;  %v1310_v45 = vsub.f32 %v4881_v26, %v1218_v10  ;;  %1537 = vadd.xlane.f32.xlu1 %v4361_v59  ;;  %v4430_v22 = vadd.f32 %v3260_v44, %v3258_v0  ;;  %v4884_v10 = vld [vmem:[#allocation44_spill] sm:$0xff] }
 0x258   : > { %v3264_v32 = vpop.eup %3263  ;;  %v1223_v31 = vpop.permute.xlu0 %1222  ;;  %1540 = vadd.xlane.f32.xlu0 %v4369_v55  ;;  %v1956_v60 = vpack.c.bf16 %v3262_v53, %v3258_v0 }
 0x259   : > { %v1417_v6 = vmul.f32 1.442695, %v1309_v12  ;;  %v1419_v58 = vmul.f32 1.442695, %v1310_v45  ;;  %v1311_v29 = vsub.f32 %v4882_v16, %v1223_v31  ;;  %v1312_v33 = vsub.f32 %v4883_v24, %v1223_v31  ;;  %v4886_v31 = vld [vmem:[#allocation46_spill] sm:$0xff] }
 0x25a   : > { %v1957_v37 = vpack.c.bf16 %v3264_v32, %v3260_v44  ;;  %v4435_v50 = vadd.f32 %v3264_v32, %v3262_v53  ;;  %v4885_v53 = vld [vmem:[#allocation45_spill] sm:$0xff] }
 0x25b   : > { %3273 = vpow2.f32 %v1417_v6  ;;  %v1421_v4 = vmul.f32 1.442695, %v1311_v29  ;;  %v1423_v1 = vmul.f32 1.442695, %v1312_v33  ;;  %1543 = vadd.xlane.f32.xlu1 %v4379_v40 }
 0x25c   : > { %3275 = vpow2.f32 %v1419_v58  ;;  %2170 = vmatprep.mubr.bf16.mxu1 %v1957_v37  ;;  %1546 = vadd.xlane.f32.xlu0 %v4384_v51 }
 0x25d   : > { %v3266_v59 = vpop.eup %3265  ;;  %3277 = vpow2.f32 %v1421_v4 }
 0x25e   : > { %v3268_v55 = vpop.eup %3267  ;;  %3279 = vpow2.f32 %v1423_v1  ;;  %2171 = vmatmul.mubr.bf16.gmra.mrb[32].mxu1 %v1956_v60  ;;  %v1228_v48 = vpop.permute.xlu1 %1227  ;;  %v4887_v60 = vld [vmem:[#allocation47_spill] sm:$0xff] }
 0x25f   : > { %v3270_v0 = vpop.eup %3269  ;;  %v1313_v44 = vsub.f32 %v4884_v10, %v1228_v48  ;;  %v1314_v28 = vsub.f32 %v4885_v53, %v1228_v48  ;;  %1549 = vadd.xlane.f32.xlu1 %v4388_v17  ;;  %v4442_v12 = vadd.f32 %v3268_v55, %v3266_v59  ;;  %v4888_v10 = vld [vmem:[#allocation50_spill] sm:$0xff]  ;;  %v4889_v53 = vld [vmem:[#allocation51_spill] sm:$0xff] }
 0x260   : > { %v3272_v40 = vpop.eup %3271  ;;  %v1233_v26 = vpop.permute.xlu0 %1232  ;;  %1552 = vadd.xlane.f32.xlu0 %v4392_v25  ;;  %v1958_v51 = vpack.c.bf16 %v3270_v0, %v3266_v59 }
 0x261   : > { %v1425_v45 = vmul.f32 1.442695, %v1313_v44  ;;  %v1427_v32 = vmul.f32 1.442695, %v1314_v28  ;;  %v1315_v6 = vsub.f32 %v4886_v31, %v1233_v26  ;;  %v1316_v58 = vsub.f32 %v4887_v60, %v1233_v26 }
 0x262   : > { %v1959_v16 = vpack.c.bf16 %v3272_v40, %v3268_v55  ;;  %v4447_v29 = vpop.permute.xlu1 %1753  ;;  %v4449_v24 = vadd.f32 %v3272_v40, %v3270_v0 }
 0x263   : > { %3281 = vpow2.f32 %v1425_v45  ;;  %v1429_v17 = vmul.f32 1.442695, %v1315_v6  ;;  %v1431_v33 = vmul.f32 1.442695, %v1316_v58  ;;  %1555 = vadd.xlane.f32.xlu1 %v4396_v43 }
 0x264   : > { %3283 = vpow2.f32 %v1427_v32  ;;  %2178 = vmatprep.mubr.bf16.mxu1 %v1959_v16  ;;  %v4452_v25 = vpop.permute.xlu0 %1748  ;;  %1558 = vadd.xlane.f32.xlu0 %v4400_v61  ;;  %v4890_v32 = vld [vmem:[#allocation48_spill] sm:$0xff] }
 0x265   : > { %v3274_v37 = vpop.eup %3273  ;;  %3285 = vpow2.f32 %v1429_v17 }
 0x266   : > { %v3276_v4 = vpop.eup %3275  ;;  %3287 = vpow2.f32 %v1431_v33  ;;  %2179 = vmatmul.mubr.bf16.gmra.mrb[36].mxu1 %v1958_v51  ;;  %v4455_v1 = vpop.permute.xlu1 %1758 }
 0x267   : > { %v3278_v59 = vpop.eup %3277  ;;  %1561 = vadd.xlane.f32.xlu1 %v4404_v13  ;;  %v1587_v55 = vadd.f32 %v3276_v4, %v3274_v37  ;;  %v4891_v13 = vld [vmem:[#allocation49_spill] sm:$0xff] }
 0x268   : > { %v3280_v48 = vpop.eup %3279  ;;  %v1243_v0 = vpop.permute.xlu0 %1242  ;;  %1564 = vadd.xlane.f32.xlu0 %v4408_v15  ;;  %v1960_v43 = vpack.c.bf16 %v3278_v59, %v3274_v37 }
 0x269   : > { %v1319_v44 = vsub.f32 %v4888_v10, %v1243_v0  ;;  %v1320_v61 = vsub.f32 %v4889_v53, %v1243_v0  ;;  %v1961_v28 = vpack.c.bf16 %v3280_v48, %v3276_v4  ;;  %v4461_v40 = vadd.f32 %v3280_v48, %v3278_v59  ;;  %v4892_v48 = vld [vmem:[#allocation54_spill] sm:$0xff]  ;;  %v4893_v10 = vld [vmem:[#allocation55_spill] sm:$0xff] }
 0x26a   : > { %v1238_v26 = vpop.permute.xlu1 %1237 }
 0x26b   : > { %v1437_v51 = vmul.f32 1.442695, %v1319_v44  ;;  %v1439_v45 = vmul.f32 1.442695, %v1320_v61  ;;  %2186 = vmatprep.mubr.bf16.mxu1 %v1961_v28  ;;  %v1317_v31 = vsub.f32 %v4890_v32, %v1238_v26  ;;  %v1318_v6 = vsub.f32 %v4891_v13, %v1238_v26  ;;  %1567 = vadd.xlane.f32.xlu1 %v4412_v20 }
 0x26c   : > { %v4466_v60 = vpop.permute.xlu0 %1763  ;;  %1570 = vadd.xlane.f32.xlu0 %v4418_v35 }
 0x26d   : > { %v3282_v15 = vpop.eup %3281  ;;  %3289 = vpow2.f32 %v1437_v51  ;;  %v1433_v58 = vmul.f32 1.442695, %v1317_v31  ;;  %v1435_v16 = vmul.f32 1.442695, %v1318_v6  ;;  %v4894_v51 = vld [vmem:[#allocation52_spill] sm:$0xff] }
 0x26e   : > { %v3284_v17 = vpop.eup %3283  ;;  %3291 = vpow2.f32 %v1439_v45  ;;  %2187 = vmatmul.mubr.bf16.gmra.mrb[40].mxu1 %v1960_v43  ;;  %v4469_v33 = vpop.permute.xlu1 %1768 }
 0x26f   : > { %v3286_v37 = vpop.eup %3285  ;;  %3293 = vpow2.f32 %v1433_v58  ;;  %1573 = vadd.xlane.f32.xlu1 %v4423_v8  ;;  %v1593_v4 = vadd.f32 %v3284_v17, %v3282_v15  ;;  %v4895_v8 = vld [vmem:[#allocation53_spill] sm:$0xff] }
 0x270   : > { %v3288_v59 = vpop.eup %3287  ;;  %3295 = vpow2.f32 %v1435_v16  ;;  %v1253_v20 = vpop.permute.xlu0 %1252  ;;  %1576 = vadd.xlane.f32.xlu0 %v4430_v22  ;;  %v1962_v35 = vpack.c.bf16 %v3286_v37, %v3282_v15 }
 0x271   : > { %v1323_v0 = vsub.f32 %v4892_v48, %v1253_v20  ;;  %v1324_v44 = vsub.f32 %v4893_v10, %v1253_v20  ;;  %v1963_v53 = vpack.c.bf16 %v3288_v59, %v3284_v17  ;;  %v1596_v61 = vadd.f32 %v3288_v59, %v3286_v37  ;;  %v4896_v17 = vld [vmem:[#allocation58_spill] sm:$0xff]  ;;  %v4897_v59 = vld [vmem:[#allocation59_spill] sm:$0xff] }
 0x272   : > { %v1248_v43 = vpop.permute.xlu1 %1247 }
 0x273   : > { %v1445_v28 = vmul.f32 1.442695, %v1323_v0  ;;  %v1447_v26 = vmul.f32 1.442695, %v1324_v44  ;;  %2194 = vmatprep.mubr.bf16.mxu1 %v1963_v53  ;;  %v1321_v45 = vsub.f32 %v4894_v51, %v1248_v43  ;;  %v1322_v32 = vsub.f32 %v4895_v8, %v1248_v43  ;;  %1579 = vadd.xlane.f32.xlu1 %v4435_v50  ;;  %v4898_v53 = vld [vmem:[#allocation56_spill] sm:$0xff] }
 0x274   : > { %v4478_v31 = vpop.permute.xlu0 %1773  ;;  %1582 = vadd.xlane.f32.xlu0 %v4442_v12 }
 0x275   : > { %3297 = vpow2.f32 %v1445_v28  ;;  %v1441_v22 = vmul.f32 1.442695, %v1321_v45  ;;  %v1443_v13 = vmul.f32 1.442695, %v1322_v32  ;;  %v4899_v28 = vld [vmem:[#allocation57_spill] sm:$0xff] }
 0x276   : > { %3299 = vpow2.f32 %v1447_v26  ;;  %2195 = vmatmul.mubr.bf16.gmra.mrb[44].mxu1 %v1962_v35  ;;  %v4481_v6 = vpop.permute.xlu1 %1778 }
 0x277   : > { %v3290_v15 = vpop.eup %3289  ;;  %3301 = vpow2.f32 %v1441_v22  ;;  %1585 = vadd.xlane.f32.xlu1 %v4449_v24 }
 0x278   : > { %v3292_v58 = vpop.eup %3291  ;;  %3303 = vpow2.f32 %v1443_v13  ;;  %v1263_v16 = vpop.permute.xlu0 %1262  ;;  %1588 = vadd.xlane.f32.xlu0 %v1587_v55 }
 0x279   : > { %v3294_v50 = vpop.eup %3293  ;;  %v1327_v37 = vsub.f32 %v4896_v17, %v1263_v16  ;;  %v1328_v12 = vsub.f32 %v4897_v59, %v1263_v16  ;;  %v1602_v20 = vadd.f32 %v3292_v58, %v3290_v15 }
 0x27a   : > { %v3296_v48 = vpop.eup %3295  ;;  %v1258_v0 = vpop.permute.xlu1 %1257  ;;  %v1964_v10 = vpack.c.bf16 %v3290_v15, %v3294_v50 }
 0x27b   : > { %v1453_v35 = vmul.f32 1.442695, %v1327_v37  ;;  %v1455_v44 = vmul.f32 1.442695, %v1328_v12  ;;  %v1325_v43 = vsub.f32 %v4898_v53, %v1258_v0  ;;  %v1326_v26 = vsub.f32 %v4899_v28, %v1258_v0  ;;  %1591 = vadd.xlane.f32.xlu1 %v4461_v40 }
 0x27c   : > { %1594 = vadd.xlane.f32.xlu0 %v1593_v4  ;;  %v1965_v24 = vpack.c.bf16 %v3292_v58, %v3296_v48  ;;  %v1599_v55 = vadd.f32 %v3296_v48, %v3294_v50  ;;  %v4489_v0 = vpop.permute.xlu0 %1783 }
 0x27d   : > { %3305 = vpow2.f32 %v1453_v35  ;;  %v1449_v51 = vmul.f32 1.442695, %v1325_v43  ;;  %v1451_v45 = vmul.f32 1.442695, %v1326_v26 }
 0x27e   : > { %3307 = vpow2.f32 %v1455_v44  ;;  %2202 = vmatprep.mubr.bf16.mxu1 %v1965_v24 }
 0x27f   : > { %v3298_v8 = vpop.eup %3297  ;;  %3309 = vpow2.f32 %v1449_v51  ;;  %2203 = vmatmul.mubr.bf16.gmra.mrb[48].mxu1 %v1964_v10  ;;  %1597 = vadd.xlane.f32.xlu1 %v1596_v61  ;;  %v4493_v10 = vpop.permute.xlu1 %1788 }
 0x280   : > { %v3300_v32 = vpop.eup %3299  ;;  %3311 = vpow2.f32 %v1451_v45  ;;  %1600 = vadd.xlane.f32.xlu0 %v1599_v55 }
 0x281   : > { %v3302_v22 = vpop.eup %3301  ;;  %v1608_v13 = vadd.f32 %v3300_v32, %v3298_v8 }
 0x282   : > { %v3304_v15 = vpop.eup %3303  ;;  %v1966_v16 = vpack.c.bf16 %v3298_v8, %v3302_v22 }
 0x283   : > { %1603 = vadd.xlane.f32.xlu1 %v1602_v20  ;;  %v1967_v40 = vpack.c.bf16 %v3300_v32, %v3304_v15  ;;  %v1605_v4 = vadd.f32 %v3304_v15, %v3302_v22  ;;  %v4491_v20 = vpop.permute.xlu0 %1793  ;;  %v4497_v44 = vpop.permute.xlu1 %1798 }
 0x285   : > { %2210 = vmatprep.mubr.bf16.mxu1 %v1967_v40  ;;  %1606 = vadd.xlane.f32.xlu0 %v1605_v4 }
 0x287   : > { %v3306_v58 = vpop.eup %3305  ;;  %2211 = vmatmul.mubr.bf16.gmra.mrb[52].mxu1 %v1966_v16  ;;  %1609 = vadd.xlane.f32.xlu1 %v1608_v13  ;;  %v4495_v35 = vpop.permute.xlu0 %1803 }
 0x288   : > { %v3308_v50 = vpop.eup %3307  ;;  %v4501_v43 = vpop.permute.xlu1 %1808 }
 0x289   : > { %v3310_v17 = vpop.eup %3309  ;;  %v1614_v37 = vadd.f32 %v3308_v50, %v3306_v58 }
 0x28a   : > { %v3312_v59 = vpop.eup %3311  ;;  %v1968_v61 = vpack.c.bf16 %v3306_v58, %v3310_v17 }
 0x28b   : > { %1615 = vadd.xlane.f32.xlu1 %v1614_v37  ;;  %v1969_v12 = vpack.c.bf16 %v3308_v50, %v3312_v59  ;;  %v1611_v48 = vadd.f32 %v3312_v59, %v3310_v17  ;;  %v4499_v53 = vpop.permute.xlu0 %1813  ;;  %v1458_v37 = vld [vmem:[#allocation3 + $0x8] sm:$0xff] }
 0x28c   : > { %v4505_v26 = vpop.permute.xlu1 %1818 }
 0x28d   : > { %2218 = vmatprep.mubr.bf16.mxu1 %v1969_v12  ;;  %1612 = vadd.xlane.f32.xlu0 %v1611_v48  ;;  %v1457_v12 = vld [vmem:[#allocation3] sm:$0xff] }
 0x28f   : > { %2219 = vmatmul.mubr.bf16.gmra.mrb[56].mxu1 %v1968_v61  ;;  %v4503_v28 = vpop.permute.xlu0 %1823  ;;  %v1490_v61 = vmul.f32 %v4131_v62, %v1458_v37 }
 0x290   : > { %v4509_v55 = vpop.permute.xlu1 %1828 }
 0x293   : > { %v4507_v24 = vpop.permute.xlu0 %1833 }
 0x294   : > { %v4513_v45 = vpop.permute.xlu1 %1838 }
 0x295   : > { %4901 = vst [vmem:[#allocation8_spill] sm:$0xff] %v4513_v45 }
 0x297   : > { %v4511_v51 = vpop.permute.xlu0 %1843 }
 0x298   : > { %4900 = vst [vmem:[#allocation7_spill] sm:$0xff] %v4511_v51  ;;  %v4517_v32 = vpop.permute.xlu1 %1848  ;;  %v1463_v51 = vld [vmem:[#allocation3 + $0x30] sm:$0xff] }
 0x299   : > { %4903 = vst [vmem:[#allocation10_spill] sm:$0xff] %v4517_v32 }
 0x29b   : > { %v4515_v8 = vpop.permute.xlu0 %1853 }
 0x29c   : > { %4902 = vst [vmem:[#allocation9_spill] sm:$0xff] %v4515_v8  ;;  %v4521_v13 = vpop.permute.xlu1 %1858 }
 0x29d   : > { %4905 = vst [vmem:[#allocation12_spill] sm:$0xff] %v4521_v13  ;;  %v1460_v13 = vld [vmem:[#allocation3 + $0x18] sm:$0xff] }
 0x29f   : > { %v4519_v22 = vpop.permute.xlu0 %1863 }
 0x2a0   : > { %4904 = vst [vmem:[#allocation11_spill] sm:$0xff] %v4519_v22  ;;  %v4525_v16 = vpop.permute.xlu1 %1868 }
 0x2a1   : > { %4907 = vst [vmem:[#allocation14_spill] sm:$0xff] %v4525_v16  ;;  %v1489_v16 = vmul.f32 %v4136_v23, %v1457_v12  ;;  %v1462_v23 = vld [vmem:[#allocation3 + $0x28] sm:$0xff] }
 0x2a3   : > { %v4523_v15 = vpop.permute.xlu0 %1873 }
 0x2a4   : > { %4906 = vst [vmem:[#allocation13_spill] sm:$0xff] %v4523_v15  ;;  %v4529_v4 = vpop.permute.xlu1 %1878  ;;  %v1459_v15 = vld [vmem:[#allocation3 + $0x10] sm:$0xff] }
 0x2a5   : > { %4909 = vst [vmem:[#allocation16_spill] sm:$0xff] %v4529_v4  ;;  %v4914_v4 = vld [vmem:[#allocation60_spill] sm:$0xff] }
 0x2a7   : > { %v4527_v40 = vpop.permute.xlu0 %1883 }
 0x2a8   : > { %4908 = vst [vmem:[#allocation15_spill] sm:$0xff] %v4527_v40  ;;  %v4533_v50 = vpop.permute.xlu1 %1888 }
 0x2a9   : > { %4911 = vst [vmem:[#allocation18_spill] sm:$0xff] %v4533_v50 }
 0x2ab   : > { %v4531_v58 = vpop.permute.xlu0 %1893 }
 0x2ac   : > { %4910 = vst [vmem:[#allocation17_spill] sm:$0xff] %v4531_v58  ;;  %v4537_v59 = vpop.permute.xlu1 %1898  ;;  %v1491_v58 = vmul.f32 %v4914_v4, %v1459_v15 }
 0x2ad   : > { %4913 = vst [vmem:[#allocation20_spill] sm:$0xff] %v4537_v59  ;;  %v4915_v59 = vld [vmem:[#allocation61_spill] sm:$0xff] }
 0x2ae   : > { %v1492_v62 = vmul.f32 %v4915_v59, %v1460_v13  ;;  %v1495_v13 = vmul.f32 %v4206_v2, %v1463_v51 }
 0x2af   : > { %v4535_v17 = vpop.permute.xlu0 %1903 }
 0x2b0   : > { %4912 = vst [vmem:[#allocation19_spill] sm:$0xff] %v4535_v17  ;;  %v1461_v17 = vld [vmem:[#allocation3 + $0x20] sm:$0xff] }
 0x2d9   : > { %v1526_v48 = vpop.xlane.xlu0 %1525 }
 0x2da   : > { %v1618_v22 = vadd.f32 %v1526_v48, %v1490_v61  ;;  %v4916_v61 = vld [vmem:[#allocation62_spill] sm:$0xff] }
 0x2db   : > { %v1493_v48 = vmul.f32 %v4916_v61, %v1461_v17  ;;  %v1466_v61 = vld [vmem:[#allocation3 + $0x48] sm:$0xff] }
 0x2dc   : > { %1651 = vst.msk [vmem:[#allocation3 + $0x8] sm:$0xff] %vm385_vm1, %v1618_v22  ;;  %v1523_v40 = vpop.xlane.xlu1 %1522 }
 0x2dd   : > { %v1617_v50 = vadd.f32 %v1523_v40, %v1489_v16  ;;  %v1529_v8 = vpop.xlane.xlu0 %1528  ;;  %v1494_v16 = vmul.f32 %v4195_v54, %v1462_v23  ;;  %v1467_v23 = vld [vmem:[#allocation3 + $0x50] sm:$0xff] }
 0x2de   : > { %v1619_v32 = vadd.f32 %v1529_v8, %v1491_v58  ;;  %v1465_v58 = vld [vmem:[#allocation3 + $0x40] sm:$0xff] }
 0x2df   : > { %1650 = vst.msk [vmem:[#allocation3] sm:$0xff] %vm385_vm1, %v1617_v50 }
 0x2e0   : > { %1652 = vst.msk [vmem:[#allocation3 + $0x10] sm:$0xff] %vm385_vm1, %v1619_v32  ;;  %v1532_v37 = vpop.xlane.xlu1 %1531  ;;  %v1464_v32 = vld [vmem:[#allocation3 + $0x38] sm:$0xff] }
 0x2e1   : > { %v1620_v12 = vadd.f32 %v1532_v37, %v1492_v62  ;;  %v1535_v22 = vpop.xlane.xlu0 %1534  ;;  %v1496_v62 = vmul.f32 %v4235_v11, %v1464_v32  ;;  %v1714_v37 = vld [vmem:[#allocation4] sm:$0xff] }
 0x2e2   : > { %v1621_v45 = vadd.f32 %v1535_v22, %v1493_v48 }
 0x2e3   : > { %v2328_v15 = vld [vmem:[#allocation3 + $0x8] sm:$0xff]  ;;  %1653 = vst.msk [vmem:[#allocation3 + $0x18] sm:$0xff] %vm385_vm1, %v1620_v12 }
 0x2e4   : > { %3313 = vrcp.f32 %v2328_v15  ;;  %1654 = vst.msk [vmem:[#allocation3 + $0x20] sm:$0xff] %vm385_vm1, %v1621_v45  ;;  %v1538_v8 = vpop.xlane.xlu1 %1537  ;;  %v1497_v45 = vmul.f32 %v4246_v5, %v1465_v58  ;;  %v1715_v12 = vld [vmem:[#allocation4 + $0x8] sm:$0xff]  ;;  %v1498_v5 = vmul.f32 %v4253_v63, %v1466_v61  ;;  %v1499_v58 = vmul.f32 %v4256_v38, %v1467_v23 }
 0x2e5   : > { %v1622_v40 = vadd.f32 %v1538_v8, %v1494_v16  ;;  %v1541_v4 = vpop.xlane.xlu0 %1540  ;;  %v1906_v8 = vmul.f32 %v4452_v25, %v1714_v37 }
 0x2e6   : > { %v2327_v50 = vld [vmem:[#allocation3] sm:$0xff]  ;;  %v1623_v17 = vadd.f32 %v1541_v4, %v1495_v13 }
 0x2e7   : > { %3315 = vrcp.f32 %v2327_v50  ;;  %v2329_v59 = vld [vmem:[#allocation3 + $0x10] sm:$0xff]  ;;  %1655 = vst.msk [vmem:[#allocation3 + $0x28] sm:$0xff] %vm385_vm1, %v1622_v40  ;;  %v1468_v50 = vld [vmem:[#allocation3 + $0x58] sm:$0xff] }
 0x2e8   : > { %1656 = vst.msk [vmem:[#allocation3 + $0x30] sm:$0xff] %vm385_vm1, %v1623_v17  ;;  %v1544_v54 = vpop.xlane.xlu1 %1543  ;;  %3317 = vrcp.f32 %v2329_v59  ;;  %v1907_v17 = vmul.f32 %v4447_v29, %v1715_v12  ;;  %v1500_v38 = vmul.f32 %v4263_v19, %v1468_v50  ;;  %v1716_v29 = vld [vmem:[#allocation4 + $0x10] sm:$0xff]  ;;  %v1470_v12 = vld [vmem:[#allocation3 + $0x68] sm:$0xff] }
 0x2e9   : > { %v2945_v2 = vpop.f32.mrb[64].mxu0  ;;  %v1624_v51 = vadd.f32 %v1544_v54, %v1496_v62  ;;  %v1547_v48 = vpop.xlane.xlu0 %1546  ;;  %v1469_v54 = vld [vmem:[#allocation3 + $0x60] sm:$0xff]  ;;  %v1908_v19 = vmul.f32 %v4455_v1, %v1716_v29  ;;  %v1502_v50 = vmul.f32 %v4272_v18, %v1470_v12 }
 0x2ea   : > { %v2330_v22 = vld [vmem:[#allocation3 + $0x18] sm:$0xff]  ;;  %v2946_v15 = vpop.f32.mrb[65].mxu0  ;;  %v1625_v16 = vadd.f32 %v1547_v48, %v1497_v45  ;;  %v1501_v23 = vmul.f32 %v4268_v49, %v1469_v54 }
 0x2eb   : > { %3319 = vrcp.f32 %v2330_v22  ;;  %v2331_v11 = vld [vmem:[#allocation3 + $0x20] sm:$0xff]  ;;  %1657 = vst.msk [vmem:[#allocation3 + $0x38] sm:$0xff] %vm385_vm1, %v1624_v51  ;;  %v2947_v13 = vadd.f32 %v2946_v15, %v2945_v2  ;;  %v2948_v32 = vpop.f32.mrb[66].mxu0 }
 0x2ec   : > { %1658 = vst.msk [vmem:[#allocation3 + $0x40] sm:$0xff] %vm385_vm1, %v1625_v16  ;;  %v2949_v40 = vpop.f32.mrb[67].mxu0  ;;  %v1550_v4 = vpop.xlane.xlu1 %1549  ;;  %3321 = vrcp.f32 %v2331_v11  ;;  %v1471_v11 = vld [vmem:[#allocation3 + $0x70] sm:$0xff] }
 0x2ed   : > { %v2227_v59 = vadd.f32 %v2947_v13, %v1906_v8  ;;  %v2950_v62 = vadd.f32 %v2949_v40, %v2948_v32  ;;  %v1626_v25 = vadd.f32 %v1550_v4, %v1498_v5  ;;  %v1553_v37 = vpop.xlane.xlu0 %1552  ;;  %v1717_v13 = vld [vmem:[#allocation4 + $0x18] sm:$0xff] }
 0x2ee   : > { %v3314_v45 = vpop.eup %3313  ;;  %v2332_v2 = vld [vmem:[#allocation3 + $0x28] sm:$0xff]  ;;  %v1627_v51 = vadd.f32 %v1553_v37, %v1499_v58  ;;  %v1472_v37 = vld [vmem:[#allocation3 + $0x78] sm:$0xff] }
 0x2ef   : > { %3323 = vrcp.f32 %v2332_v2  ;;  %v2333_v63 = vld [vmem:[#allocation3 + $0x30] sm:$0xff]  ;;  %2260 = vst.msk [vmem:[#allocation4] sm:$0xff] %vm450_vm2, %v2227_v59  ;;  %v2228_v61 = vadd.f32 %v2950_v62, %v1907_v17  ;;  %2430 = vperm.xlu0 %3084, %v3314_v45   ;;  %v1909_v45 = vmul.f32 %v4466_v60, %v1717_v13 }
 0x2f0   : > { %1659 = vst.msk [vmem:[#allocation3 + $0x48] sm:$0xff] %vm385_vm1, %v1626_v25  ;;  %1660 = vst.msk [vmem:[#allocation3 + $0x50] sm:$0xff] %vm385_vm1, %v1627_v51  ;;  %v1556_v48 = vpop.xlane.xlu1 %1555  ;;  %3325 = vrcp.f32 %v2333_v63  ;;  %v1503_v25 = vmul.f32 %v4277_v39, %v1471_v11  ;;  %v1504_v39 = vmul.f32 %v4279_v46, %v1472_v37  ;;  %v1476_v37 = vld [vmem:[#allocation3 + $0x98] sm:$0xff] }
 0x2f1   : > { %v3316_v22 = vpop.eup %3315  ;;  %2261 = vst.msk [vmem:[#allocation4 + $0x8] sm:$0xff] %vm450_vm2, %v2228_v61  ;;  %v2951_v15 = vpop.f32.mrb[0].mxu1  ;;  %v1628_v16 = vadd.f32 %v1556_v48, %v1500_v38  ;;  %v1473_v61 = vld [vmem:[#allocation3 + $0x80] sm:$0xff] }
 0x2f2   : > { %v1559_v8 = vpop.xlane.xlu0 %1558  ;;  %v2334_v32 = vld [vmem:[#allocation3 + $0x38] sm:$0xff]  ;;  %v2952_v5 = vpop.f32.mrb[1].mxu1  ;;  %2425 = vperm.xlu1 %3085, %v3316_v22   ;;  %v1505_v22 = vmul.f32 %v4284_v56, %v1473_v61 }
 0x2f3   : > { %v1629_v40 = vadd.f32 %v1559_v8, %v1501_v23  ;;  %3327 = vrcp.f32 %v2334_v32  ;;  %v2335_v4 = vld [vmem:[#allocation3 + $0x40] sm:$0xff]  ;;  %1661 = vst.msk [vmem:[#allocation3 + $0x58] sm:$0xff] %vm385_vm1, %v1628_v16  ;;  %v2953_v49 = vadd.f32 %v2952_v5, %v2951_v15  ;;  %v2954_v58 = vpop.f32.mrb[2].mxu1  ;;  %v3318_v17 = vpop.eup %3317  ;;  %v1474_v15 = vld [vmem:[#allocation3 + $0x88] sm:$0xff]  ;;  %v1475_v32 = vld [vmem:[#allocation3 + $0x90] sm:$0xff] }
 0x2f4   : > { %v2955_v59 = vpop.f32.mrb[3].mxu1  ;;  %v1562_v62 = vpop.xlane.xlu1 %1561  ;;  %3329 = vrcp.f32 %v2335_v4  ;;  %v1718_v23 = vld [vmem:[#allocation4 + $0x20] sm:$0xff]  ;;  %v1719_v5 = vld [vmem:[#allocation4 + $0x28] sm:$0xff] }
 0x2f5   : > { %1662 = vst.msk [vmem:[#allocation3 + $0x60] sm:$0xff] %vm385_vm1, %v1629_v40  ;;  %v3320_v54 = vpop.eup %3319  ;;  %v2229_v1 = vadd.f32 %v2953_v49, %v1908_v19  ;;  %v2956_v2 = vadd.f32 %v2955_v59, %v2954_v58  ;;  %v1630_v51 = vadd.f32 %v1562_v62, %v1502_v50  ;;  %v1910_v4 = vmul.f32 %v4469_v33, %v1718_v23 }
 0x2f6   : > { %v1565_v63 = vpop.xlane.xlu0 %1564  ;;  %2435 = vperm.xlu1 %3085, %v3318_v17   ;;  %2440 = vperm.xlu0 %3084, %v3320_v54   ;;  %v3322_v60 = vpop.eup %3321  ;;  %v1506_v50 = vmul.f32 %v4288_v9, %v1474_v15 }
 0x2f7   : > { %v2336_v38 = vld [vmem:[#allocation3 + $0x48] sm:$0xff]  ;;  %v1631_v29 = vadd.f32 %v1565_v63, %v1503_v25  ;;  %v2337_v18 = vld [vmem:[#allocation3 + $0x50] sm:$0xff]  ;;  %2262 = vst.msk [vmem:[#allocation4 + $0x10] sm:$0xff] %vm450_vm2, %v2229_v1  ;;  %v2230_v48 = vadd.f32 %v2956_v2, %v1909_v45  ;;  %v1507_v25 = vmul.f32 %v4293_v42, %v1475_v32  ;;  %v1911_v45 = vmul.f32 %v4478_v31, %v1719_v5  ;;  %v1477_v63 = vld [vmem:[#allocation3 + $0xa0] sm:$0xff] }
 0x2f8   : > { %3331 = vrcp.f32 %v2336_v38  ;;  %1663 = vst.msk [vmem:[#allocation3 + $0x68] sm:$0xff] %vm385_vm1, %v1630_v51  ;;  %v1568_v12 = vpop.xlane.xlu1 %1567  ;;  %v1508_v42 = vmul.f32 %v4298_v30, %v1476_v37  ;;  %v1481_v37 = vld [vmem:[#allocation3 + $0xc0] sm:$0xff] }
 0x2f9   : > { %1664 = vst.msk [vmem:[#allocation3 + $0x70] sm:$0xff] %vm385_vm1, %v1631_v29  ;;  %v3324_v16 = vpop.eup %3323  ;;  %v2957_v8 = vpop.f32.mrb[4].mxu1  ;;  %v1632_v11 = vadd.f32 %v1568_v12, %v1504_v39  ;;  %3333 = vrcp.f32 %v2337_v18  ;;  %v1720_v18 = vld [vmem:[#allocation4 + $0x30] sm:$0xff]  ;;  %v1509_v39 = vmul.f32 %v4305_v57, %v1477_v63  ;;  %v1482_v63 = vld [vmem:[#allocation3 + $0xc8] sm:$0xff] }
 0x2fa   : > { %2263 = vst.msk [vmem:[#allocation4 + $0x18] sm:$0xff] %vm450_vm2, %v2230_v48  ;;  %v1571_v13 = vpop.xlane.xlu0 %1570  ;;  %v2338_v40 = vld [vmem:[#allocation3 + $0x58] sm:$0xff]  ;;  %v2958_v19 = vpop.f32.mrb[5].mxu1  ;;  %2445 = vperm.xlu1 %3085, %v3322_v60   ;;  %2450 = vperm.xlu0 %3084, %v3324_v16   ;;  %v1478_v60 = vld [vmem:[#allocation3 + $0xa8] sm:$0xff]  ;;  %v1479_v16 = vld [vmem:[#allocation3 + $0xb0] sm:$0xff]  ;;  %v1912_v32 = vmul.f32 %v4481_v6, %v1720_v18 }
 0x2fb   : > { %v1633_v46 = vadd.f32 %v1571_v13, %v1505_v22  ;;  %3335 = vrcp.f32 %v2338_v40  ;;  %1665 = vst.msk [vmem:[#allocation3 + $0x78] sm:$0xff] %vm385_vm1, %v1632_v11  ;;  %v2959_v56 = vadd.f32 %v2958_v19, %v2957_v8  ;;  %v2960_v58 = vpop.f32.mrb[6].mxu1  ;;  %v3326_v17 = vpop.eup %3325  ;;  %v1721_v8 = vld [vmem:[#allocation4 + $0x38] sm:$0xff]  ;;  %v1510_v19 = vmul.f32 %v4315_v47, %v1478_v60 }
 0x2fc   : > { %v2339_v49 = vld [vmem:[#allocation3 + $0x60] sm:$0xff]  ;;  %v2961_v59 = vpop.f32.mrb[7].mxu1  ;;  %v1574_v62 = vpop.xlane.xlu1 %1573 }
 0x2fd   : > { %1666 = vst.msk [vmem:[#allocation3 + $0x80] sm:$0xff] %vm385_vm1, %v1633_v46  ;;  %v3328_v54 = vpop.eup %3327  ;;  %v2231_v33 = vadd.f32 %v2959_v56, %v1910_v4  ;;  %v2962_v1 = vadd.f32 %v2961_v59, %v2960_v58  ;;  %v1634_v2 = vadd.f32 %v1574_v62, %v1506_v50  ;;  %3337 = vrcp.f32 %v2339_v49  ;;  %v1480_v58 = vld [vmem:[#allocation3 + $0xb8] sm:$0xff] }
 0x2fe   : > { %v1577_v51 = vpop.xlane.xlu0 %1576  ;;  %2455 = vperm.xlu1 %3085, %v3326_v17   ;;  %2460 = vperm.xlu0 %3084, %v3328_v54   ;;  %v3330_v31 = vpop.eup %3329  ;;  %v1511_v56 = vmul.f32 %v4324_v27, %v1479_v16  ;;  %v1913_v17 = vmul.f32 %v4489_v0, %v1721_v8  ;;  %v1512_v27 = vmul.f32 %v4331_v36, %v1480_v58 }
 0x2ff   : > { %v2340_v61 = vld [vmem:[#allocation3 + $0x68] sm:$0xff]  ;;  %v1635_v38 = vadd.f32 %v1577_v51, %v1507_v25  ;;  %2264 = vst.msk [vmem:[#allocation4 + $0x20] sm:$0xff] %vm450_vm2, %v2231_v33  ;;  %v2232_v29 = vadd.f32 %v2962_v1, %v1911_v45  ;;  %v1722_v1 = vld [vmem:[#allocation4 + $0x40] sm:$0xff]  ;;  %v1513_v51 = vmul.f32 %v4336_v52, %v1481_v37 }
 0x300   : > { %3339 = vrcp.f32 %v2340_v61  ;;  %v2341_v9 = vld [vmem:[#allocation3 + $0x70] sm:$0xff]  ;;  %1667 = vst.msk [vmem:[#allocation3 + $0x88] sm:$0xff] %vm385_vm1, %v1634_v2  ;;  %v1580_v48 = vpop.xlane.xlu1 %1579 }
 0x301   : > { %1668 = vst.msk [vmem:[#allocation3 + $0x90] sm:$0xff] %vm385_vm1, %v1635_v38  ;;  %v2963_v12 = vpop.f32.mrb[8].mxu1  ;;  %v1636_v22 = vadd.f32 %v1580_v48, %v1508_v42  ;;  %3341 = vrcp.f32 %v2341_v9  ;;  %v1483_v42 = vld [vmem:[#allocation3 + $0xd0] sm:$0xff] }
 0x302   : > { %v3332_v23 = vpop.eup %3331  ;;  %2265 = vst.msk [vmem:[#allocation4 + $0x28] sm:$0xff] %vm450_vm2, %v2232_v29  ;;  %v1583_v15 = vpop.xlane.xlu0 %1582  ;;  %v2342_v11 = vld [vmem:[#allocation3 + $0x78] sm:$0xff]  ;;  %2465 = vperm.xlu1 %3085, %v3330_v31   ;;  %v1723_v31 = vld [vmem:[#allocation4 + $0x48] sm:$0xff]  ;;  %v1515_v8 = vmul.f32 %v4351_v7, %v1483_v42 }
 0x303   : > { %v2964_v13 = vpop.f32.mrb[9].mxu1  ;;  %v1637_v30 = vadd.f32 %v1583_v15, %v1509_v39  ;;  %2470 = vperm.xlu0 %3084, %v3332_v23   ;;  %3343 = vrcp.f32 %v2342_v11  ;;  %1669 = vst.msk [vmem:[#allocation3 + $0x98] sm:$0xff] %vm385_vm1, %v1636_v22  ;;  %v3334_v46 = vpop.eup %3333  ;;  %v1914_v39 = vmul.f32 %v4493_v10, %v1722_v1  ;;  %v1484_v11 = vld [vmem:[#allocation3 + $0xd8] sm:$0xff] }
 0x304   : > { %v2343_v5 = vld [vmem:[#allocation3 + $0x80] sm:$0xff]  ;;  %v2965_v57 = vadd.f32 %v2964_v13, %v2963_v12  ;;  %v2966_v40 = vpop.f32.mrb[10].mxu1  ;;  %v1586_v49 = vpop.xlane.xlu1 %1585  ;;  %v1514_v12 = vmul.f32 %v4341_v21, %v1482_v63  ;;  %v1516_v7 = vmul.f32 %v4356_v41, %v1484_v11 }
 0x305   : > { %1670 = vst.msk [vmem:[#allocation3 + $0xa0] sm:$0xff] %vm385_vm1, %v1637_v30  ;;  %v2967_v4 = vpop.f32.mrb[11].mxu1  ;;  %v3336_v50 = vpop.eup %3335  ;;  %v1638_v62 = vadd.f32 %v1586_v49, %v1510_v19  ;;  %3345 = vrcp.f32 %v2343_v5  ;;  %v1915_v30 = vmul.f32 %v4491_v20, %v1723_v31  ;;  %v1485_v21 = vld [vmem:[#allocation3 + $0xe0] sm:$0xff]  ;;  %v1486_v20 = vld [vmem:[#allocation3 + $0xe8] sm:$0xff] }
 0x306   : > { %v2233_v6 = vadd.f32 %v2965_v57, %v1912_v32  ;;  %v2968_v59 = vadd.f32 %v2967_v4, %v2966_v40  ;;  %v1589_v25 = vpop.xlane.xlu0 %1588  ;;  %2475 = vperm.xlu1 %3085, %v3334_v46   ;;  %v1518_v41 = vmul.f32 %v4364_v3, %v1486_v20 }
 0x307   : > { %v2344_v54 = vld [vmem:[#allocation3 + $0x88] sm:$0xff]  ;;  %v1639_v45 = vadd.f32 %v1589_v25, %v1511_v56  ;;  %2480 = vperm.xlu0 %3084, %v3336_v50   ;;  %1671 = vst.msk [vmem:[#allocation3 + $0xa8] sm:$0xff] %vm385_vm1, %v1638_v62  ;;  %v3338_v0 = vpop.eup %3337  ;;  %v1724_v56 = vld [vmem:[#allocation4 + $0x50] sm:$0xff]  ;;  %v1725_v62 = vld [vmem:[#allocation4 + $0x58] sm:$0xff] }
 0x308   : > { %3347 = vrcp.f32 %v2344_v54  ;;  %v2345_v47 = vld [vmem:[#allocation3 + $0x90] sm:$0xff]  ;;  %2266 = vst.msk [vmem:[#allocation4 + $0x30] sm:$0xff] %vm450_vm2, %v2233_v6  ;;  %v2234_v33 = vadd.f32 %v2968_v59, %v1913_v17  ;;  %v1592_v2 = vpop.xlane.xlu1 %1591  ;;  %v1517_v59 = vmul.f32 %v4359_v14, %v1485_v21 }
 0x309   : > { %1672 = vst.msk [vmem:[#allocation3 + $0xb0] sm:$0xff] %vm385_vm1, %v1639_v45  ;;  %v2969_v38 = vpop.f32.mrb[12].mxu1  ;;  %v1640_v9 = vadd.f32 %v1592_v2, %v1512_v27  ;;  %3349 = vrcp.f32 %v2345_v47  ;;  %v1916_v45 = vmul.f32 %v4497_v44, %v1724_v56  ;;  %v1729_v56 = vld [vmem:[#allocation4 + $0x78] sm:$0xff] }
 0x30a   : > { %v3340_v61 = vpop.eup %3339  ;;  %2267 = vst.msk [vmem:[#allocation4 + $0x38] sm:$0xff] %vm450_vm2, %v2234_v33  ;;  %v1595_v29 = vpop.xlane.xlu0 %1594  ;;  %v2346_v18 = vld [vmem:[#allocation3 + $0x98] sm:$0xff]  ;;  %2485 = vperm.xlu1 %3085, %v3338_v0  }
 0x30b   : > { %v2970_v48 = vpop.f32.mrb[13].mxu1  ;;  %v1641_v36 = vadd.f32 %v1595_v29, %v1513_v51  ;;  %2490 = vperm.xlu0 %3084, %v3340_v61   ;;  %3351 = vrcp.f32 %v2346_v18  ;;  %1673 = vst.msk [vmem:[#allocation3 + $0xb8] sm:$0xff] %vm385_vm1, %v1640_v9  ;;  %v3342_v22 = vpop.eup %3341  ;;  %v1488_v51 = vld [vmem:[#allocation3 + $0xf8] sm:$0xff]  ;;  %v1917_v61 = vmul.f32 %v4495_v35, %v1725_v62  ;;  %v1487_v29 = vld [vmem:[#allocation3 + $0xf0] sm:$0xff] }
 0x30c   : > { %v2347_v60 = vld [vmem:[#allocation3 + $0xa0] sm:$0xff]  ;;  %v2971_v52 = vadd.f32 %v2970_v48, %v2969_v38  ;;  %v2972_v23 = vpop.f32.mrb[14].mxu1  ;;  %v1598_v16 = vpop.xlane.xlu1 %1597  ;;  %v1520_v18 = vmul.f32 %v4377_v34, %v1488_v51 }
 0x30d   : > { %1674 = vst.msk [vmem:[#allocation3 + $0xc0] sm:$0xff] %vm385_vm1, %v1641_v36  ;;  %v2973_v15 = vpop.f32.mrb[15].mxu1  ;;  %v3344_v13 = vpop.eup %3343  ;;  %v1642_v5 = vadd.f32 %v1598_v16, %v1514_v12  ;;  %3353 = vrcp.f32 %v2347_v60  ;;  %v1726_v48 = vld [vmem:[#allocation4 + $0x60] sm:$0xff] }
 0x30e   : > { %v2235_v10 = vadd.f32 %v2971_v52, %v1914_v39  ;;  %v2974_v32 = vadd.f32 %v2973_v15, %v2972_v23  ;;  %v1601_v57 = vpop.xlane.xlu0 %1600  ;;  %v2348_v40 = vld [vmem:[#allocation3 + $0xa8] sm:$0xff]  ;;  %2495 = vperm.xlu1 %3085, %v3342_v22   ;;  %v4917_v23 = vld [vmem:[#allocation6_spill] sm:$0xff]  ;;  %v1918_v11 = vmul.f32 %v4501_v43, %v1726_v48 }
 0x30f   : > { %v1643_v19 = vadd.f32 %v1601_v57, %v1515_v8  ;;  %2500 = vperm.xlu0 %3084, %v3344_v13   ;;  %3355 = vrcp.f32 %v2348_v40  ;;  %1675 = vst.msk [vmem:[#allocation3 + $0xc8] sm:$0xff] %vm385_vm1, %v1642_v5  ;;  %v3346_v49 = vpop.eup %3345  ;;  %v1519_v12 = vmul.f32 %v4917_v23, %v1487_v29  ;;  %v1727_v22 = vld [vmem:[#allocation4 + $0x68] sm:$0xff] }
 0x310   : > { %v2349_v46 = vld [vmem:[#allocation3 + $0xb0] sm:$0xff]  ;;  %2268 = vst.msk [vmem:[#allocation4 + $0x40] sm:$0xff] %vm450_vm2, %v2235_v10  ;;  %v2236_v4 = vadd.f32 %v2974_v32, %v1915_v30  ;;  %v1604_v58 = vpop.xlane.xlu1 %1603  ;;  %v1919_v40 = vmul.f32 %v4499_v53, %v1727_v22 }
 0x311   : > { %1676 = vst.msk [vmem:[#allocation3 + $0xd0] sm:$0xff] %vm385_vm1, %v1643_v19  ;;  %v2975_v17 = vpop.f32.mrb[16].mxu1  ;;  %v1644_v6 = vadd.f32 %v1604_v58, %v1516_v7  ;;  %3357 = vrcp.f32 %v2349_v46  ;;  %v1728_v7 = vld [vmem:[#allocation4 + $0x70] sm:$0xff] }
 0x312   : > { %v3348_v50 = vpop.eup %3347  ;;  %2269 = vst.msk [vmem:[#allocation4 + $0x48] sm:$0xff] %vm450_vm2, %v2236_v4  ;;  %v2350_v25 = vld [vmem:[#allocation3 + $0xb8] sm:$0xff]  ;;  %v2976_v37 = vpop.f32.mrb[17].mxu1  ;;  %2505 = vperm.xlu1 %3085, %v3346_v49  }
 0x313   : > { %v1607_v54 = vpop.xlane.xlu0 %1606  ;;  %2510 = vperm.xlu0 %3084, %v3348_v50   ;;  %3359 = vrcp.f32 %v2350_v25  ;;  %1677 = vst.msk [vmem:[#allocation3 + $0xd8] sm:$0xff] %vm385_vm1, %v1644_v6  ;;  %v2977_v33 = vadd.f32 %v2976_v37, %v2975_v17  ;;  %v2978_v0 = vpop.f32.mrb[18].mxu1  ;;  %v1920_v50 = vmul.f32 %v4505_v26, %v1728_v7 }
 0x314   : > { %v2351_v47 = vld [vmem:[#allocation3 + $0xc0] sm:$0xff]  ;;  %v1645_v27 = vadd.f32 %v1607_v54, %v1517_v59  ;;  %v3350_v1 = vpop.eup %3349  ;;  %v2979_v14 = vpop.f32.mrb[19].mxu1  ;;  %v1921_v54 = vmul.f32 %v4503_v28, %v1729_v56 }
 0x315   : > { %v1610_v2 = vpop.xlane.xlu1 %1609  ;;  %v3352_v63 = vpop.eup %3351  ;;  %v2237_v38 = vadd.f32 %v2977_v33, %v1916_v45  ;;  %v2980_v3 = vadd.f32 %v2979_v14, %v2978_v0  ;;  %3361 = vrcp.f32 %v2351_v47 }
 0x316   : > { %1678 = vst.msk [vmem:[#allocation3 + $0xe0] sm:$0xff] %vm385_vm1, %v1645_v27  ;;  %v1646_v9 = vadd.f32 %v1610_v2, %v1518_v41  ;;  %v2352_v44 = vld [vmem:[#allocation3 + $0xc8] sm:$0xff]  ;;  %2515 = vperm.xlu1 %3085, %v3350_v1   ;;  %v1730_v27 = vld [vmem:[#allocation4 + $0x80] sm:$0xff] }
 0x317   : > { %2520 = vperm.xlu0 %3084, %v3352_v63   ;;  %3363 = vrcp.f32 %v2352_v44  ;;  %2270 = vst.msk [vmem:[#allocation4 + $0x50] sm:$0xff] %vm450_vm2, %v2237_v38  ;;  %v2238_v31 = vadd.f32 %v2980_v3, %v1917_v61  ;;  %v3354_v35 = vpop.eup %3353  ;;  %v1731_v1 = vld [vmem:[#allocation4 + $0x88] sm:$0xff]  ;;  %v1922_v28 = vmul.f32 %v4509_v55, %v1730_v27 }
 0x318   : > { %v2353_v42 = vld [vmem:[#allocation3 + $0xd0] sm:$0xff]  ;;  %1679 = vst.msk [vmem:[#allocation3 + $0xe8] sm:$0xff] %vm385_vm1, %v1646_v9  ;;  %v1923_v38 = vmul.f32 %v4507_v24, %v1731_v1  ;;  %v4919_v24 = vld [vmem:[#allocation7_spill] sm:$0xff] }
 0x319   : > { %v1616_v36 = vpop.xlane.xlu1 %1615  ;;  %v3356_v39 = vpop.eup %3355  ;;  %2271 = vst.msk [vmem:[#allocation4 + $0x58] sm:$0xff] %vm450_vm2, %v2238_v31  ;;  %3365 = vrcp.f32 %v2353_v42  ;;  %v1732_v42 = vld [vmem:[#allocation4 + $0x90] sm:$0xff] }
 0x31a   : > { %v2981_v60 = vpop.f32.mrb[20].mxu1  ;;  %v1648_v52 = vadd.f32 %v1616_v36, %v1520_v18  ;;  %v2354_v15 = vld [vmem:[#allocation3 + $0xd8] sm:$0xff]  ;;  %v1613_v8 = vpop.xlane.xlu0 %1612  ;;  %2525 = vperm.xlu1 %3085, %v3354_v35   ;;  %v4918_v35 = vld [vmem:[#allocation8_spill] sm:$0xff] }
 0x31b   : > { %v2982_v16 = vpop.f32.mrb[21].mxu1  ;;  %2530 = vperm.xlu0 %3084, %v3356_v39   ;;  %3367 = vrcp.f32 %v2354_v15  ;;  %v1647_v13 = vadd.f32 %v1613_v8, %v1519_v12  ;;  %v3358_v10 = vpop.eup %3357  ;;  %v1733_v18 = vld [vmem:[#allocation4 + $0x98] sm:$0xff]  ;;  %v1924_v48 = vmul.f32 %v4918_v35, %v1732_v42  ;;  %v1734_v15 = vld [vmem:[#allocation4 + $0xa0] sm:$0xff]  ;;  %v1735_v8 = vld [vmem:[#allocation4 + $0xa8] sm:$0xff] }
 0x31c   : > { %1681 = vst.msk [vmem:[#allocation3 + $0xf8] sm:$0xff] %vm385_vm1, %v1648_v52  ;;  %v2983_v34 = vadd.f32 %v2982_v16, %v2981_v60  ;;  %v2984_v30 = vpop.f32.mrb[22].mxu1  ;;  %v1925_v52 = vmul.f32 %v4919_v24, %v1733_v18 }
 0x31d   : > { %v2355_v32 = vld [vmem:[#allocation3 + $0xe0] sm:$0xff]  ;;  %v2985_v5 = vpop.f32.mrb[23].mxu1  ;;  %v3360_v57 = vpop.eup %3359  ;;  %1680 = vst.msk [vmem:[#allocation3 + $0xf0] sm:$0xff] %vm385_vm1, %v1647_v13 }
 0x31e   : > { %v2239_v19 = vadd.f32 %v2983_v34, %v1918_v11  ;;  %v2986_v21 = vadd.f32 %v2985_v5, %v2984_v30  ;;  %3369 = vrcp.f32 %v2355_v32  ;;  %2535 = vperm.xlu1 %3085, %v3358_v10   ;;  %v4920_v34 = vld [vmem:[#allocation10_spill] sm:$0xff]  ;;  %v4921_v5 = vld [vmem:[#allocation9_spill] sm:$0xff] }
 0x31f   : > { %v2356_v46 = vld [vmem:[#allocation3 + $0xe8] sm:$0xff]  ;;  %2540 = vperm.xlu0 %3084, %v3360_v57   ;;  %v3362_v4 = vpop.eup %3361  ;;  %v1926_v13 = vmul.f32 %v4920_v34, %v1734_v15  ;;  %v1927_v57 = vmul.f32 %v4921_v5, %v1735_v8 }
 0x320   : > { %3371 = vrcp.f32 %v2356_v46  ;;  %2272 = vst.msk [vmem:[#allocation4 + $0x60] sm:$0xff] %vm450_vm2, %v2239_v19  ;;  %v2240_v43 = vadd.f32 %v2986_v21, %v1919_v40  ;;  %v1736_v46 = vld [vmem:[#allocation4 + $0xb0] sm:$0xff] }
 0x321   : > { %v3364_v20 = vpop.eup %3363  ;;  %v2987_v49 = vpop.f32.mrb[24].mxu1 }
 0x322   : > { %2273 = vst.msk [vmem:[#allocation4 + $0x68] sm:$0xff] %vm450_vm2, %v2240_v43  ;;  %v2988_v58 = vpop.f32.mrb[25].mxu1  ;;  %2545 = vperm.xlu1 %3085, %v3362_v4   ;;  %v1737_v4 = vld [vmem:[#allocation4 + $0xb8] sm:$0xff] }
 0x323   : > { %v2358_v53 = vld [vmem:[#allocation3 + $0xf8] sm:$0xff]  ;;  %2550 = vperm.xlu0 %3084, %v3364_v20   ;;  %v2989_v17 = vadd.f32 %v2988_v58, %v2987_v49  ;;  %v2990_v6 = vpop.f32.mrb[26].mxu1  ;;  %v3366_v59 = vpop.eup %3365  ;;  %v4922_v20 = vld [vmem:[#allocation12_spill] sm:$0xff] }
 0x324   : > { %3373 = vrcp.f32 %v2358_v53  ;;  %v2357_v62 = vld [vmem:[#allocation3 + $0xf0] sm:$0xff]  ;;  %v2991_v25 = vpop.f32.mrb[27].mxu1  ;;  %v1928_v49 = vmul.f32 %v4922_v20, %v1736_v46 }
 0x325   : > { %v3368_v37 = vpop.eup %3367  ;;  %3375 = vrcp.f32 %v2357_v62  ;;  %v2241_v41 = vadd.f32 %v2989_v17, %v1920_v50  ;;  %v2992_v45 = vadd.f32 %v2991_v25, %v2990_v6  ;;  %v4923_v50 = vld [vmem:[#allocation11_spill] sm:$0xff]  ;;  %v1738_v25 = vld [vmem:[#allocation4 + $0xc0] sm:$0xff] }
 0x326   : > { %2555 = vperm.xlu1 %3085, %v3366_v59   ;;  %v1929_v17 = vmul.f32 %v4923_v50, %v1737_v4 }
 0x327   : > { %2560 = vperm.xlu0 %3084, %v3368_v37   ;;  %2274 = vst.msk [vmem:[#allocation4 + $0x70] sm:$0xff] %vm450_vm2, %v2241_v41  ;;  %v2242_v47 = vadd.f32 %v2992_v45, %v1921_v54  ;;  %v1739_v54 = vld [vmem:[#allocation4 + $0xc8] sm:$0xff]  ;;  %v4924_v45 = vld [vmem:[#allocation14_spill] sm:$0xff] }
 0x328   : > { %v3370_v33 = vpop.eup %3369 }
 0x329   : > { %2275 = vst.msk [vmem:[#allocation4 + $0x78] sm:$0xff] %vm450_vm2, %v2242_v47  ;;  %v2993_v0 = vpop.f32.mrb[28].mxu1  ;;  %v1930_v47 = vmul.f32 %v4924_v45, %v1738_v25  ;;  %v2393_v25 = vld [vmem:[#allocation4 + $0x10] sm:$0xff]  ;;  %v2394_v45 = vld [vmem:[#allocation4 + $0x18] sm:$0xff] }
 0x32a   : > { %v3372_v26 = vpop.eup %3371  ;;  %v2994_v14 = vpop.f32.mrb[29].mxu1  ;;  %2565 = vperm.xlu1 %3085, %v3370_v33  }
 0x32b   : > { %2570 = vperm.xlu0 %3084, %v3372_v26   ;;  %v2995_v2 = vadd.f32 %v2994_v14, %v2993_v0  ;;  %v2996_v51 = vpop.f32.mrb[30].mxu1  ;;  %v4925_v0 = vld [vmem:[#allocation13_spill] sm:$0xff] }
 0x32c   : > { %v2997_v63 = vpop.f32.mrb[31].mxu1  ;;  %v1931_v1 = vmul.f32 %v4925_v0, %v1739_v54 }
 0x32d   : > { %v2243_v3 = vadd.f32 %v2995_v2, %v1922_v28  ;;  %v2998_v9 = vadd.f32 %v2997_v63, %v2996_v51  ;;  %v1740_v51 = vld [vmem:[#allocation4 + $0xd0] sm:$0xff] }
 0x32e   : > { %v3374_v61 = vpop.eup %3373 }
 0x32f   : > { %2580 = vperm.xlu0 %3084, %v3374_v61   ;;  %v3376_v44 = vpop.eup %3375  ;;  %2276 = vst.msk [vmem:[#allocation4 + $0x80] sm:$0xff] %vm450_vm2, %v2243_v3  ;;  %v2244_v29 = vadd.f32 %v2998_v9, %v1923_v38  ;;  %v1741_v61 = vld [vmem:[#allocation4 + $0xd8] sm:$0xff]  ;;  %v4926_v3 = vld [vmem:[#allocation16_spill] sm:$0xff] }
 0x330   : > { %2575 = vperm.xlu1 %3085, %v3376_v44   ;;  %v1932_v9 = vmul.f32 %v4926_v3, %v1740_v51 }
 0x331   : > { %2277 = vst.msk [vmem:[#allocation4 + $0x88] sm:$0xff] %vm450_vm2, %v2244_v29  ;;  %v2999_v31 = vpop.f32.mrb[32].mxu1 }
 0x332   : > { %v3000_v55 = vpop.f32.mrb[33].mxu1 }
 0x333   : > { %v3001_v36 = vadd.f32 %v3000_v55, %v2999_v31  ;;  %v3002_v39 = vpop.f32.mrb[34].mxu1  ;;  %v4927_v31 = vld [vmem:[#allocation15_spill] sm:$0xff] }
 0x334   : > { %v3003_v60 = vpop.f32.mrb[35].mxu1  ;;  %v1933_v18 = vmul.f32 %v4927_v31, %v1741_v61  ;;  %v2397_v61 = vld [vmem:[#allocation4 + $0x30] sm:$0xff] }
 0x335   : > { %v2245_v23 = vadd.f32 %v3001_v36, %v1924_v48  ;;  %v3004_v12 = vadd.f32 %v3003_v60, %v3002_v39  ;;  %v1742_v36 = vld [vmem:[#allocation4 + $0xe0] sm:$0xff]  ;;  %v1743_v60 = vld [vmem:[#allocation4 + $0xe8] sm:$0xff] }
 0x337   : > { %2278 = vst.msk [vmem:[#allocation4 + $0x90] sm:$0xff] %vm450_vm2, %v2245_v23  ;;  %v2246_v22 = vadd.f32 %v3004_v12, %v1925_v52  ;;  %v4928_v52 = vld [vmem:[#allocation18_spill] sm:$0xff] }
 0x338   : > { %v1934_v23 = vmul.f32 %v4928_v52, %v1742_v36 }
 0x339   : > { %2279 = vst.msk [vmem:[#allocation4 + $0x98] sm:$0xff] %vm450_vm2, %v2246_v22  ;;  %v3005_v16 = vpop.f32.mrb[36].mxu1 }
 0x33a   : > { %v3006_v11 = vpop.f32.mrb[37].mxu1 }
 0x33b   : > { %v3007_v30 = vadd.f32 %v3006_v11, %v3005_v16  ;;  %v3008_v10 = vpop.f32.mrb[38].mxu1  ;;  %v4929_v16 = vld [vmem:[#allocation17_spill] sm:$0xff] }
 0x33c   : > { %v3009_v32 = vpop.f32.mrb[39].mxu1  ;;  %v1935_v8 = vmul.f32 %v4929_v16, %v1743_v60  ;;  %v2400_v60 = vld [vmem:[#allocation4 + $0x48] sm:$0xff] }
 0x33d   : > { %v2247_v40 = vadd.f32 %v3007_v30, %v1926_v13  ;;  %v3010_v19 = vadd.f32 %v3009_v32, %v3008_v10  ;;  %v1744_v30 = vld [vmem:[#allocation4 + $0xf0] sm:$0xff]  ;;  %v1745_v32 = vld [vmem:[#allocation4 + $0xf8] sm:$0xff] }
 0x33f   : > { %2280 = vst.msk [vmem:[#allocation4 + $0xa0] sm:$0xff] %vm450_vm2, %v2247_v40  ;;  %v2248_v21 = vadd.f32 %v3010_v19, %v1927_v57  ;;  %v4930_v57 = vld [vmem:[#allocation20_spill] sm:$0xff] }
 0x340   : > { %v1936_v40 = vmul.f32 %v4930_v57, %v1744_v30 }
 0x341   : > { %2281 = vst.msk [vmem:[#allocation4 + $0xa8] sm:$0xff] %vm450_vm2, %v2248_v21  ;;  %v3011_v43 = vpop.f32.mrb[40].mxu1 }
 0x342   : > { %v3012_v7 = vpop.f32.mrb[41].mxu1 }
 0x343   : > { %v3013_v56 = vadd.f32 %v3012_v7, %v3011_v43  ;;  %v3014_v53 = vpop.f32.mrb[42].mxu1  ;;  %v4931_v43 = vld [vmem:[#allocation19_spill] sm:$0xff] }
 0x344   : > { %v3015_v58 = vpop.f32.mrb[43].mxu1  ;;  %v1937_v4 = vmul.f32 %v4931_v43, %v1745_v32 }
 0x345   : > { %v2249_v6 = vadd.f32 %v3013_v56, %v1928_v49  ;;  %v3016_v59 = vadd.f32 %v3015_v58, %v3014_v53  ;;  %v2391_v53 = vld [vmem:[#allocation4] sm:$0xff] }
 0x346   : > { %v2411_v57 = vld [vmem:[#allocation4 + $0xa0] sm:$0xff] }
 0x347   : > { %2282 = vst.msk [vmem:[#allocation4 + $0xb0] sm:$0xff] %vm450_vm2, %v2249_v6  ;;  %v2250_v62 = vadd.f32 %v3016_v59, %v1929_v17  ;;  %v2392_v17 = vld [vmem:[#allocation4 + $0x8] sm:$0xff] }
 0x348   : > { %v2412_v43 = vld [vmem:[#allocation4 + $0xa8] sm:$0xff] }
 0x349   : > { %2283 = vst.msk [vmem:[#allocation4 + $0xb8] sm:$0xff] %vm450_vm2, %v2250_v62  ;;  %v3017_v37 = vpop.f32.mrb[44].mxu1 }
 0x34a   : > { %v3018_v41 = vpop.f32.mrb[45].mxu1 }
 0x34b   : > { %v3019_v33 = vadd.f32 %v3018_v41, %v3017_v37  ;;  %v3020_v27 = vpop.f32.mrb[46].mxu1 }
 0x34c   : > { %v3021_v26 = vpop.f32.mrb[47].mxu1 }
 0x34d   : > { %v2251_v14 = vadd.f32 %v3019_v33, %v1930_v47  ;;  %v3022_v28 = vadd.f32 %v3021_v26, %v3020_v27  ;;  %v2395_v26 = vld [vmem:[#allocation4 + $0x20] sm:$0xff] }
 0x34f   : > { %2284 = vst.msk [vmem:[#allocation4 + $0xc0] sm:$0xff] %vm450_vm2, %v2251_v14  ;;  %v2252_v2 = vadd.f32 %v3022_v28, %v1931_v1  ;;  %v2396_v28 = vld [vmem:[#allocation4 + $0x28] sm:$0xff] }
 0x351   : > { %2285 = vst.msk [vmem:[#allocation4 + $0xc8] sm:$0xff] %vm450_vm2, %v2252_v2 }
 0x352   : > { %v3023_v63 = vpop.f32.mrb[48].mxu1 }
 0x353   : > { %v3024_v38 = vpop.f32.mrb[49].mxu1 }
 0x354   : > { %v3025_v44 = vadd.f32 %v3024_v38, %v3023_v63  ;;  %v3026_v29 = vpop.f32.mrb[50].mxu1 }
 0x355   : > { %v3027_v42 = vpop.f32.mrb[51].mxu1 }
 0x356   : > { %v2253_v55 = vadd.f32 %v3025_v44, %v1932_v9  ;;  %v3028_v35 = vadd.f32 %v3027_v42, %v3026_v29  ;;  %v2398_v44 = vld [vmem:[#allocation4 + $0x38] sm:$0xff] }
 0x358   : > { %2286 = vst.msk [vmem:[#allocation4 + $0xd0] sm:$0xff] %vm450_vm2, %v2253_v55  ;;  %v2254_v48 = vadd.f32 %v3028_v35, %v1933_v18  ;;  %v2399_v18 = vld [vmem:[#allocation4 + $0x40] sm:$0xff] }
 0x359   : > { %v2407_v55 = vld [vmem:[#allocation4 + $0x80] sm:$0xff] }
 0x35a   : > { %2287 = vst.msk [vmem:[#allocation4 + $0xd8] sm:$0xff] %vm450_vm2, %v2254_v48  ;;  %v3029_v39 = vpop.f32.mrb[52].mxu1 }
 0x35b   : > { %v3030_v24 = vpop.f32.mrb[53].mxu1 }
 0x35c   : > { %v3031_v12 = vadd.f32 %v3030_v24, %v3029_v39  ;;  %v3032_v22 = vpop.f32.mrb[54].mxu1  ;;  %v2408_v24 = vld [vmem:[#allocation4 + $0x88] sm:$0xff] }
 0x35d   : > { %v3033_v15 = vpop.f32.mrb[55].mxu1 }
 0x35e   : > { %v2255_v11 = vadd.f32 %v3031_v12, %v1934_v23  ;;  %v3034_v34 = vadd.f32 %v3033_v15, %v3032_v22  ;;  %v2401_v22 = vld [vmem:[#allocation4 + $0x50] sm:$0xff] }
 0x35f   : > { %v2409_v15 = vld [vmem:[#allocation4 + $0x90] sm:$0xff] }
 0x360   : > { %2288 = vst.msk [vmem:[#allocation4 + $0xe0] sm:$0xff] %vm450_vm2, %v2255_v11  ;;  %v2256_v13 = vadd.f32 %v3034_v34, %v1935_v8  ;;  %v2402_v34 = vld [vmem:[#allocation4 + $0x58] sm:$0xff] }
 0x362   : > { %2289 = vst.msk [vmem:[#allocation4 + $0xe8] sm:$0xff] %vm450_vm2, %v2256_v13  ;;  %v3035_v10 = vpop.f32.mrb[56].mxu1  ;;  %v2410_v13 = vld [vmem:[#allocation4 + $0x98] sm:$0xff] }
 0x363   : > { %v3036_v5 = vpop.f32.mrb[57].mxu1 }
 0x364   : > { %v3037_v19 = vadd.f32 %v3036_v5, %v3035_v10  ;;  %v3038_v21 = vpop.f32.mrb[58].mxu1  ;;  %v2403_v5 = vld [vmem:[#allocation4 + $0x60] sm:$0xff] }
 0x365   : > { %v3039_v46 = vpop.f32.mrb[59].mxu1 }
 0x366   : > { %v2257_v7 = vadd.f32 %v3037_v19, %v1936_v40  ;;  %v3040_v20 = vadd.f32 %v3039_v46, %v3038_v21  ;;  %v2404_v46 = vld [vmem:[#allocation4 + $0x68] sm:$0xff] }
 0x368   : > { %2290 = vst.msk [vmem:[#allocation4 + $0xf0] sm:$0xff] %vm450_vm2, %v2257_v7  ;;  %v2258_v49 = vadd.f32 %v3040_v20, %v1937_v4 }
 0x36a   : > { %2291 = vst.msk [vmem:[#allocation4 + $0xf8] sm:$0xff] %vm450_vm2, %v2258_v49  ;;  %v2405_v49 = vld [vmem:[#allocation4 + $0x70] sm:$0xff] }
 0x36e   : > { %v2431_v56 = vpop.permute.xlu0 %2430 }
 0x36f   : > { %v2584_v62 = vmul.f32 %v2431_v56, %v2392_v17  ;;  %v2413_v56 = vld [vmem:[#allocation4 + $0xb0] sm:$0xff]  ;;  %v2406_v17 = vld [vmem:[#allocation4 + $0x78] sm:$0xff] }
 0x371   : > { %v2426_v58 = vpop.permute.xlu1 %2425 }
 0x372   : > { %v2583_v50 = vmul.f32 %v2426_v58, %v2391_v53 }
 0x374   : > { %2624 = vxpose.xlu1.b32.start [1/16] (narrow) %v2583_v50, 32 }
 0x375   : > { %v2441_v6 = vpop.permute.xlu0 %2440  ;;  %v2436_v59 = vpop.permute.xlu1 %2435 }
 0x376   : > { %v2585_v41 = vmul.f32 %v2436_v59, %v2393_v25  ;;  %v2586_v27 = vmul.f32 %v2441_v6, %v2394_v45  ;;  %v2414_v6 = vld [vmem:[#allocation4 + $0xb8] sm:$0xff]  ;;  %v2416_v45 = vld [vmem:[#allocation4 + $0xc8] sm:$0xff] }
 0x378   : > { %2625 = vxpose.xlu1.b32.cont [2/16] (narrow) %v2584_v62, 32 }
 0x379   : > { %v2451_v37 = vpop.permute.xlu0 %2450  ;;  %v2446_v54 = vpop.permute.xlu1 %2445 }
 0x37a   : > { %v2587_v14 = vmul.f32 %v2446_v54, %v2395_v26  ;;  %v2588_v63 = vmul.f32 %v2451_v37, %v2396_v28  ;;  %v2415_v37 = vld [vmem:[#allocation4 + $0xc0] sm:$0xff] }
 0x37c   : > { %2626 = vxpose.xlu1.b32.cont [3/16] (narrow) %v2585_v41, 32 }
 0x37d   : > { %v2461_v47 = vpop.permute.xlu0 %2460  ;;  %v2456_v33 = vpop.permute.xlu1 %2455 }
 0x37e   : > { %v2589_v9 = vmul.f32 %v2456_v33, %v2397_v61  ;;  %v2590_v31 = vmul.f32 %v2461_v47, %v2398_v44  ;;  %v2420_v61 = vld [vmem:[#allocation4 + $0xe8] sm:$0xff] }
 0x380   : > { %2627 = vxpose.xlu1.b32.cont [4/16] (narrow) %v2586_v27, 32  ;;  %v2417_v27 = vld [vmem:[#allocation4 + $0xd0] sm:$0xff] }
 0x381   : > { %v2466_v1 = vpop.permute.xlu1 %2465 }
 0x382   : > { %v2471_v0 = vpop.permute.xlu0 %2470  ;;  %v2591_v48 = vmul.f32 %v2466_v1, %v2399_v18  ;;  %v2418_v1 = vld [vmem:[#allocation4 + $0xd8] sm:$0xff]  ;;  %v2688_v18 = vstv %s2623_s9 }
 0x383   : > { %v2592_v52 = vmul.f32 %v2471_v0, %v2400_v60  ;;  %v2617_v60 = vld [vmem:[%s4671_s13 + $0x10] sm:$0xff] }
 0x384   : > { %2628 = vxpose.xlu1.b32.cont [5/16] (narrow) %v2587_v14, 32 }
 0x385   : > { %v2476_v51 = vpop.permute.xlu1 %2475 }
 0x386   : > { %v2481_v2 = vpop.permute.xlu0 %2480  ;;  %v2593_v16 = vmul.f32 %v2476_v51, %v2401_v22 }
 0x387   : > { %v2594_v30 = vmul.f32 %v2481_v2, %v2402_v34  ;;  %v2419_v2 = vld [vmem:[#allocation4 + $0xe0] sm:$0xff] }
 0x388   : > { %2629 = vxpose.xlu1.b32.cont [6/16] (narrow) %v2588_v63, 32 }
 0x389   : > { %v2486_v3 = vpop.permute.xlu1 %2485 }
 0x38a   : > { %v2491_v38 = vpop.permute.xlu0 %2490  ;;  %v2595_v40 = vmul.f32 %v2486_v3, %v2403_v5 }
 0x38b   : > { %v2596_v4 = vmul.f32 %v2491_v38, %v2404_v46  ;;  %v2620_v46 = vld [vmem:[%s4671_s13 + $0x28] sm:$0xff] }
 0x38c   : > { %2630 = vxpose.xlu1.b32.cont [7/16] (narrow) %v2589_v9, 32  ;;  %v2421_v9 = vld [vmem:[#allocation4 + $0xf0] sm:$0xff] }
 0x38d   : > { %v2496_v42 = vpop.permute.xlu1 %2495 }
 0x38e   : > { %v2501_v29 = vpop.permute.xlu0 %2500  ;;  %v2597_v53 = vmul.f32 %v2496_v42, %v2405_v49  ;;  %v2422_v42 = vld [vmem:[#allocation4 + $0xf8] sm:$0xff] }
 0x38f   : > { %v2598_v59 = vmul.f32 %v2501_v29, %v2406_v17 }
 0x390   : > { %2631 = vxpose.xlu1.b32.cont [8/16] (narrow) %v2590_v31, 32 }
 0x391   : > { %v2506_v35 = vpop.permute.xlu1 %2505 }
 0x392   : > { %v2599_v36 = vmul.f32 %v2506_v35, %v2407_v55  ;;  %v2511_v39 = vpop.permute.xlu0 %2510  ;;  %v2615_v35 = vld [vmem:[%s4671_s13] sm:$0xff] }
 0x393   : > { %v2600_v23 = vmul.f32 %v2511_v39, %v2408_v24 }
 0x394   : > { %2632 = vxpose.xlu1.b32.cont [9/16] (narrow) %v2591_v48, 32  ;;  %2656 = vxpose.xlu0.b32.start [1/16] (narrow) %v2599_v36, 32 }
 0x395   : > { %v2516_v12 = vpop.permute.xlu1 %2515 }
 0x396   : > { %v2601_v8 = vmul.f32 %v2516_v12, %v2409_v15  ;;  %v2521_v11 = vpop.permute.xlu0 %2520  ;;  %v2619_v12 = vld [vmem:[%s4671_s13 + $0x20] sm:$0xff] }
 0x397   : > { %v2602_v10 = vmul.f32 %v2521_v11, %v2410_v13 }
 0x398   : > { %2633 = vxpose.xlu1.b32.cont [10/16] (narrow) %v2592_v52, 32  ;;  %2657 = vxpose.xlu0.b32.cont [2/16] (narrow) %v2600_v23, 32 }
 0x399   : > { %v2526_v32 = vpop.permute.xlu1 %2525 }
 0x39a   : > { %v2603_v19 = vmul.f32 %v2526_v32, %v2411_v57  ;;  %v2531_v21 = vpop.permute.xlu0 %2530  ;;  %v2618_v57 = vld [vmem:[%s4671_s13 + $0x18] sm:$0xff] }
 0x39b   : > { %v2604_v7 = vmul.f32 %v2531_v21, %v2412_v43 }
 0x39c   : > { %2634 = vxpose.xlu1.b32.cont [11/16] (narrow) %v2593_v16, 32  ;;  %2658 = vxpose.xlu0.b32.cont [3/16] (narrow) %v2601_v8, 32  ;;  %v2621_v8 = vld [vmem:[%s4671_s13 + $0x30] sm:$0xff] }
 0x39d   : > { %v2536_v20 = vpop.permute.xlu1 %2535 }
 0x39e   : > { %v2605_v58 = vmul.f32 %v2536_v20, %v2413_v56  ;;  %v2541_v50 = vpop.permute.xlu0 %2540  ;;  %v2622_v20 = vld [vmem:[%s4671_s13 + $0x38] sm:$0xff] }
 0x39f   : > { %v2606_v62 = vmul.f32 %v2541_v50, %v2414_v6 }
 0x3a0   : > { %2635 = vxpose.xlu1.b32.cont [12/16] (narrow) %v2594_v30, 32  ;;  %2659 = vxpose.xlu0.b32.cont [4/16] (narrow) %v2602_v10, 32  ;;  %v2616_v30 = vld [vmem:[%s4671_s13 + $0x8] sm:$0xff] }
 0x3a1   : > { %v2546_v25 = vpop.permute.xlu1 %2545 }
 0x3a2   : > { %v2607_v54 = vmul.f32 %v2546_v25, %v2415_v37  ;;  %v2551_v41 = vpop.permute.xlu0 %2550 }
 0x3a3   : > { %v2608_v47 = vmul.f32 %v2551_v41, %v2416_v45 }
 0x3a4   : > { %2636 = vxpose.xlu1.b32.cont [13/16] (narrow) %v2595_v40, 32  ;;  %2660 = vxpose.xlu0.b32.cont [5/16] (narrow) %v2603_v19, 32 }
 0x3a5   : > { %v2556_v33 = vpop.permute.xlu1 %2555 }
 0x3a6   : > { %v2609_v26 = vmul.f32 %v2556_v33, %v2417_v27  ;;  %v2561_v0 = vpop.permute.xlu0 %2560 }
 0x3a7   : > { %v2610_v14 = vmul.f32 %v2561_v0, %v2418_v1 }
 0x3a8   : > { %2637 = vxpose.xlu1.b32.cont [14/16] (narrow) %v2596_v4, 32  ;;  %2661 = vxpose.xlu0.b32.cont [6/16] (narrow) %v2604_v7, 32 }
 0x3a9   : > { %v2566_v28 = vpop.permute.xlu1 %2565 }
 0x3aa   : > { %v2611_v51 = vmul.f32 %v2566_v28, %v2419_v2  ;;  %v2571_v63 = vpop.permute.xlu0 %2570 }
 0x3ab   : > { %v2612_v38 = vmul.f32 %v2571_v63, %v2420_v61 }
 0x3ac   : > { %2638 = vxpose.xlu1.b32.cont [15/16] (narrow) %v2597_v53, 32  ;;  %2662 = vxpose.xlu0.b32.cont [7/16] (narrow) %v2605_v58, 32 }
 0x3ae   : > { %v2581_v29 = vpop.permute.xlu0 %2580 }
 0x3af   : > { %v2576_v3 = vpop.permute.xlu1 %2575  ;;  %v2614_v31 = vmul.f32 %v2581_v29, %v2422_v42 }
 0x3b0   : > { %2639 = vxpose.xlu1.b32.end [16/16] (narrow) %v2598_v59, 32  ;;  %2663 = vxpose.xlu0.b32.cont [8/16] (narrow) %v2606_v62, 32  ;;  %v2613_v44 = vmul.f32 %v2576_v3, %v2421_v9 }
 0x3b4   : > { %2664 = vxpose.xlu0.b32.cont [9/16] (narrow) %v2607_v54, 32 }
 0x3b8   : > { %2665 = vxpose.xlu0.b32.cont [10/16] (narrow) %v2608_v47, 32 }
 0x3bc   : > { %2666 = vxpose.xlu0.b32.cont [11/16] (narrow) %v2609_v26, 32 }
 0x3c0   : > { %2667 = vxpose.xlu0.b32.cont [12/16] (narrow) %v2610_v14, 32 }
 0x3c4   : > { %2668 = vxpose.xlu0.b32.cont [13/16] (narrow) %v2611_v51, 32 }
 0x3c8   : > { %2669 = vxpose.xlu0.b32.cont [14/16] (narrow) %v2612_v38, 32 }
 0x3cc   : > { %2670 = vxpose.xlu0.b32.cont [15/16] (narrow) %v2613_v44, 32 }
 0x3d0   : > { %2671 = vxpose.xlu0.b32.end [16/16] (narrow) %v2614_v31, 32 }
 0x3f4   : > { %v2640_v55 = vpop.trf.xlu1 }
 0x3f5   : > { %v2689_v48 = vmul.f32 %v2688_v18, %v2640_v55 }
 0x3f7   : > { %v2697_v36 = vadd.f32 %v2689_v48, %v2615_v35 }
 0x3f8   : > { %v2641_v39 = vpop.trf.xlu1 }
 0x3f9   : > { %2705 = vst [vmem:[%s4677_s16] sm:$0xff] %v2697_v36  ;;  %v2691_v24 = vmul.f32 %v2688_v18, %v2641_v39 }
 0x3fb   : > { %v2699_v52 = vadd.f32 %v2691_v24, %v2617_v60 }
 0x3fc   : > { %v2642_v23 = vpop.trf.xlu1 }
 0x3fd   : > { %2707 = vst [vmem:[%s4677_s16 + $0x10] sm:$0xff] %v2699_v52  ;;  %v2693_v22 = vmul.f32 %v2688_v18, %v2642_v23 }
 0x3ff   : > { %v2701_v15 = vadd.f32 %v2693_v22, %v2619_v12 }
 0x400   : > { %v2643_v16 = vpop.trf.xlu1 }
 0x401   : > { %2709 = vst [vmem:[%s4677_s16 + $0x20] sm:$0xff] %v2701_v15  ;;  %v2695_v11 = vmul.f32 %v2688_v18, %v2643_v16 }
 0x403   : > { %v2703_v34 = vadd.f32 %v2695_v11, %v2621_v8 }
 0x405   : > { %2711 = vst [vmem:[%s4677_s16 + $0x30] sm:$0xff] %v2703_v34 }
 0x414   : > { %v2672_v13 = vpop.trf.xlu0 }
 0x415   : > { %v2690_v10 = vmul.f32 %v2688_v18, %v2672_v13 }
 0x417   : > { %v2698_v32 = vadd.f32 %v2690_v10, %v2616_v30 }
 0x418   : > { %v2673_v5 = vpop.trf.xlu0 }
 0x419   : > { %2706 = vst [vmem:[%s4677_s16 + $0x8] sm:$0xff] %v2698_v32  ;;  %v2692_v40 = vmul.f32 %v2688_v18, %v2673_v5 }
 0x41b   : > { %v2700_v19 = vadd.f32 %v2692_v40, %v2618_v57 }
 0x41c   : > { %v2674_v21 = vpop.trf.xlu0 }
 0x41d   : > { %2708 = vst [vmem:[%s4677_s16 + $0x18] sm:$0xff] %v2700_v19  ;;  %v2694_v43 = vmul.f32 %v2688_v18, %v2674_v21 }
 0x41f   : > { %v2702_v4 = vadd.f32 %v2694_v43, %v2620_v46 }
 0x420   : > { %v2675_v7 = vpop.trf.xlu0 }
 0x421   : > { %2710 = vst [vmem:[%s4677_s16 + $0x28] sm:$0xff] %v2702_v4  ;;  %v2696_v49 = vmul.f32 %v2688_v18, %v2675_v7 }
 0x423   : > { %v2704_v56 = vadd.f32 %v2696_v49, %v2622_v20 }
 0x425   : > { %2712 = vst [vmem:[%s4677_s16 + $0x38] sm:$0xff] %v2704_v56 }
 0x426 PF: > { %s16_s22 = sadd.s32 1, %s3399_s22   ;;  %s4932_s20 = smov %s3395_s21 }
 0x427   : > { %p13_p5 = scmp.ge.s32.totalorder %s16_s22, 4   ;;  %s4933_s21 = smov %s4935_s4 }
 0x429   :  { %15 = sbr.rel (!%p13_p5) target bundleno = 2 (0x2), region = 87 }

</bundles_post_ra>
